<compile_context>
chip_gen: v7x
topology: tpu7x:2x2x1
jax: 0.10.0
libtpu: 0.0.40
codegen_flags: <defaults>
</compile_context>

<pallas_src>
import functools
import numpy as np
import jax
import jax.numpy as jnp
from jax.experimental import pallas as pl
from jax.experimental.pallas import tpu as pltpu


def _make_relative_position_index(window_size):
    """Same construction as the PyTorch __init__, done with numpy."""
    wd, wh, ww = window_size
    coords_d = np.arange(wd)
    coords_h = np.arange(wh)
    coords_w = np.arange(ww)
    coords = np.stack(np.meshgrid(coords_d, coords_h, coords_w, indexing="ij"))  # (3, wd, wh, ww)
    coords_flatten = coords.reshape(3, -1)                                       # (3, N)
    relative_coords = coords_flatten[:, :, None] - coords_flatten[:, None, :]    # (3, N, N)
    relative_coords = relative_coords.transpose(1, 2, 0).copy()                  # (N, N, 3)
    relative_coords[:, :, 0] += wd - 1
    relative_coords[:, :, 1] += wh - 1
    relative_coords[:, :, 2] += ww - 1
    relative_coords[:, :, 0] *= (2 * wh - 1) * (2 * ww - 1)
    relative_coords[:, :, 1] *= 2 * ww - 1
    relative_position_index = relative_coords.sum(-1)                            # (N, N)
    return relative_position_index.astype(np.int32)


def _hw_plan_defaults():
    """Generation-aware VMEM limit / target matmul rows / minimum grid length."""
    try:
        kind = jax.devices()[0].device_kind.lower()
    except Exception:
        kind = ""
    try:
        cap = int(pltpu.get_tpu_info().vmem_capacity_bytes)
    except Exception:
        cap = 128 * 2 ** 20
    # Scoped VMEM limit: half of physical, capped at 64 MiB (v7x only has 64 MiB).
    vmem_limit = min(64 * 2 ** 20, max(16 * 2 ** 20, cap // 2))
    if "v5 lite" in kind or "v5e" in kind:
        target_rows, min_grid = 256, 1          # 128x128 MXU, single TensorCore
    elif "v7" in kind:
        target_rows, min_grid = 512, 4          # 2 TensorCores share the parallel grid
    else:                                       # v6e and other recent parts (default)
        target_rows, min_grid = 512, 2
    return vmem_limit, target_rows, min_grid


def _plan_window_batch(B_, nW, N, C, num_heads, has_mask, *,
                       vmem_limit, target_rows, min_grid,
                       fuse_limit=2 * 2 ** 20):
    """Pick WB (windows per grid step) and whether rpb+mask are pre-fused.

    WB must divide B_ and be a multiple of nW (so the tiled shift mask is
    grid-invariant).  The per-step VMEM estimate counts resident weights and
    biases (conservatively double-buffered), streamed x/out blocks, the qkv
    slab, the bf16 output scratch and one head's softmax temporaries, plus 25%
    headroom for Mosaic internal scratch.
    """
    H = num_heads
    cands = [nW * k for k in range(1, B_ // nW + 1) if B_ % (nW * k) == 0]

    def fused(wb):
        return has_mask and H * wb * N * N * 4 <= fuse_limit

    def step_bytes(wb):
        rows = wb * N
        resident = 2 * (C * 3 * C + C * C) + 4 * (3 * C + C)        # bf16 W, f32 b
        if not has_mask:
            resident += 4 * H * N * N
        elif fused(wb):
            resident += 4 * H * wb * N * N
        else:
            resident += 4 * (H * N * N + wb * N * N)
        resident *= 2                                               # worst case: 2 buffers
        streamed = 2 * 2 * rows * C * 4                             # x + out, double-buffered
        work = (rows * 3 * C * 4        # f32 qkv accumulator
                + rows * 3 * C * 2      # bf16 qkv slab
                + rows * C * 2          # bf16 head-output scratch
                + 3 * wb * N * N * 4    # logits / softmax temporaries (one head live)
                + 3 * rows * max(C // H, 8) * 2)
        return int(1.25 * (resident + streamed + work))

    budget = int(0.75 * vmem_limit)
    feasible = [wb for wb in cands if step_bytes(wb) <= budget] or cands[:1]
    # Keep enough grid steps to shard across TensorCores (v7x / megacore).
    pref = [wb for wb in feasible if B_ // wb >= min_grid] or feasible
    hit = [wb for wb in pref if wb * N >= target_rows]
    wb = hit[0] if hit else pref[-1]
    return wb, fused(wb)


def _window_attention_kernel(*refs, num_heads, head_dim, wb, n_tok,
                             split_bias, fold_rows):
    if split_bias:
        (x_ref, wqkv_ref, bqkv_ref, wproj_ref, bproj_ref,
         rpb_ref, mask_ref, o_ref, acc_ref) = refs
        mask_v = mask_ref[...]                                   # (wb, N, N) f32, resident
        bias = lambda h: rpb_ref[h] + mask_v
    else:
        (x_ref, wqkv_ref, bqkv_ref, wproj_ref, bproj_ref,
         bias_ref, o_ref, acc_ref) = refs
        bias = lambda h: bias_ref[h]                             # (wb,N,N) fused or (N,N) rpb

    C = num_heads * head_dim
    rows = wb * n_tok

    # ---- QKV projection: (WB*N, C) @ (C, 3C), bf16 operands, f32 accumulation.
    x_bf = x_ref[...].astype(jnp.bfloat16)
    qkv = jnp.dot(x_bf, wqkv_ref[...], preferred_element_type=jnp.float32)
    # qk scale already folded into q columns / q bias; one dense cast of the slab.
    qkv_bf = (qkv + bqkv_ref[...]).astype(jnp.bfloat16)          # (rows, 3C)

    # TODO(synk): for num_heads >= 8 switch to lax.fori_loop over a VMEM qkv
    # scratch (pl.ds lane slices) so only one head's temporaries stay live.
    for h in range(num_heads):
        lo = h * head_dim
        qh = qkv_bf[:, 0 * C + lo:0 * C + lo + head_dim].reshape(wb, n_tok, head_dim)
        kh = qkv_bf[:, 1 * C + lo:1 * C + lo + head_dim].reshape(wb, n_tok, head_dim)
        vh = qkv_bf[:, 2 * C + lo:2 * C + lo + head_dim].reshape(wb, n_tok, head_dim)

        # Attention logits batched over the WB windows of this step.
        s = jnp.einsum("bnd,bmd->bnm", qh, kh,
                       preferred_element_type=jnp.float32)       # (wb, N, N)
        s = s + bias(h)

        # Softmax over keys (f32); reciprocal goes to the EUP slot.
        s = s - jnp.max(s, axis=-1, keepdims=True)
        p = jnp.exp(s)
        p = p * pl.reciprocal(jnp.sum(p, axis=-1, keepdims=True), approx=True)

        oh = jnp.einsum("bnm,bmd->bnd", p.astype(jnp.bfloat16), vh,
                        preferred_element_type=jnp.float32)      # (wb, N, d)
        # Static lane slice of the bf16 scratch accumulator (no minor-axis concat).
        acc_ref[:, lo:lo + head_dim] = oh.reshape(rows, head_dim).astype(jnp.bfloat16)

    # ---- Output projection from the bf16 scratch accumulator.
    y = jnp.dot(acc_ref[...], wproj_ref[...], preferred_element_type=jnp.float32)
    y = (y + bproj_ref[...]).astype(o_ref.dtype)
    if fold_rows is not None:
        # One relayout per step -> lane-dense (128-wide) output store.
        y = y.reshape(fold_rows, 128)
    o_ref[...] = y


def window_attention_3d(x, params, window_size, num_heads, mask=None, *,
                        fuse_bias=None):
    """x: (B_, N, C); mask: (nW, N, N) additive (0 / -inf-like) or None."""
    B_, N, C = x.shape
    assert C % num_heads == 0
    head_dim = C // num_heads
    scale = head_dim ** (-0.5)

    vmem_limit, target_rows, min_grid = _hw_plan_defaults()

    # Fold the qk scale into the q columns of Wqkv and the q bias; bf16 weights.
    scale_vec = jnp.concatenate([jnp.full((C,), scale, jnp.float32),
                                 jnp.ones((2 * C,), jnp.float32)])
    wqkv_t = ((params["qkv_w"].astype(jnp.float32) * scale_vec[:, None]).T
              ).astype(jnp.bfloat16)                                     # (C, 3C)
    bqkv = (params["qkv_b"].astype(jnp.float32) * scale_vec).reshape(1, 3 * C)
    wproj_t = params["proj_w"].T.astype(jnp.bfloat16)                    # (C, C)
    bproj = params["proj_b"].astype(jnp.float32).reshape(1, C)

    # Relative position bias gather -> (H, N, N).  (Glue, not hot path.)
    rel_index = jnp.asarray(_make_relative_position_index(window_size))
    rpb = params["rpb_table"][rel_index[:N, :N].reshape(-1)]
    rpb = rpb.reshape(N, N, num_heads).transpose(2, 0, 1).astype(jnp.float32)

    has_mask = mask is not None
    nW = mask.shape[0] if has_mask else 1
    if has_mask:
        assert B_ % nW == 0, "B_ must be a multiple of the number of masks"

    WB, fused = _plan_window_batch(B_, nW, N, C, num_heads, has_mask,
                                   vmem_limit=vmem_limit,
                                   target_rows=target_rows, min_grid=min_grid)
    if has_mask and fuse_bias is not None:
        fused = bool(fuse_bias)
    rows = WB * N
    grid = (B_ // WB,)
    split = has_mask and not fused

    if not has_mask:
        bias_inputs = (rpb,)                          # (H, N, N), broadcasts over WB
        bias_specs = [(num_heads, N, N)]
    else:
        mask_rep = jnp.tile(mask.astype(jnp.float32), (WB // nW, 1, 1))  # (WB, N, N)
        if fused:
            bias_arr = rpb[:, None, :, :] + mask_rep[None, :, :, :]      # (H, WB, N, N)
            bias_inputs = (bias_arr,)
            bias_specs = [(num_heads, WB, N, N)]
        else:
            bias_inputs = (rpb, mask_rep)
            bias_specs = [(num_heads, N, N), (WB, N, N)]

    x_flat = x.reshape(B_ * N, C)
    # Lane-dense output store is possible when C < 128 and the folded block tiles.
    fold_ok = (C < 128 and (rows * C) % 128 == 0 and ((rows * C) // 128) % 8 == 0)

    def build(single_buffer, fold):
        resident_kw = {"pipeline_mode": pl.Buffered(1)} if single_buffer else {}

        def const_spec(shape):
            nd = len(shape)
            return pl.BlockSpec(shape, lambda b: (0,) * nd, **resident_kw)

        in_specs = [pl.BlockSpec((rows, C), lambda b: (b, 0))]   # streamed x rows
        in_specs += [const_spec((C, 3 * C)),                     # Wqkv^T (bf16, resident)
                     const_spec((1, 3 * C)),                     # bqkv (scale folded)
                     const_spec((C, C)),                         # Wproj^T (bf16, resident)
                     const_spec((1, C))]                         # bproj
        in_specs += [const_spec(s) for s in bias_specs]          # rpb / mask / fused bias

        if fold:
            fold_rows = rows * C // 128
            out_shape = jax.ShapeDtypeStruct((B_ * N * C // 128, 128), x.dtype)
            out_spec = pl.BlockSpec((fold_rows, 128), lambda b: (b, 0))
        else:
            fold_rows = None
            out_shape = jax.ShapeDtypeStruct((B_ * N, C), x.dtype)
            out_spec = pl.BlockSpec((rows, C), lambda b: (b, 0))

        kernel = functools.partial(
            _window_attention_kernel, num_heads=num_heads, head_dim=head_dim,
            wb=WB, n_tok=N, split_bias=split, fold_rows=fold_rows)

        return pl.pallas_call(
            kernel,
            out_shape=out_shape,
            grid_spec=pltpu.PrefetchScalarGridSpec(
                num_scalar_prefetch=0, grid=grid,
                in_specs=in_specs, out_specs=out_spec,
                scratch_shapes=[pltpu.VMEM((rows, C), jnp.bfloat16)]),
            compiler_params=pltpu.CompilerParams(
                dimension_semantics=("parallel",),
                vmem_limit_bytes=vmem_limit))

    inputs = (x_flat, wqkv_t, bqkv, wproj_t, bproj) + bias_inputs

    if fold_ok:
        attempts = [(True, True), (False, True), (True, False), (False, False)]
    else:
        attempts = [(True, False), (False, False)]

    out_flat, last_err = None, None
    for single_buffer, fold in attempts:
        try:
            out_flat = jax.block_until_ready(build(single_buffer, fold)(*inputs))
            break
        except Exception as e:   # fallback if Buffered(1) / lane-fold unsupported
            last_err = e
            out_flat = None
    if out_flat is None:
        raise last_err

    return out_flat.reshape(B_, N, C)


def reference_window_attention_3d(x, params, window_size, num_heads, mask=None):
    """Pure-JAX f32 reference mirroring the PyTorch forward."""
    B_, N, C = x.shape
    head_dim = C // num_heads
    scale = head_dim ** (-0.5)

    qkv = x @ params["qkv_w"].T + params["qkv_b"]                    # (B_, N, 3C)
    qkv = qkv.reshape(B_, N, 3, num_heads, head_dim).transpose(2, 0, 3, 1, 4)
    q, k, v = qkv[0], qkv[1], qkv[2]                                 # (B_, H, N, hd)
    q = q * scale
    attn = jnp.einsum("bhnd,bhmd->bhnm", q, k)

    rel_index = jnp.asarray(_make_relative_position_index(window_size))
    rpb = params["rpb_table"][rel_index[:N, :N].reshape(-1)]
    rpb = rpb.reshape(N, N, num_heads).transpose(2, 0, 1)            # (H, N, N)
    attn = attn + rpb[None]

    if mask is not None:
        nW = mask.shape[0]
        attn = attn.reshape(B_ // nW, nW, num_heads, N, N) + mask[None, :, None]
        attn = attn.reshape(-1, num_heads, N, N)
    attn = jax.nn.softmax(attn, axis=-1)

    out = jnp.einsum("bhnm,bhmd->bhnd", attn, v)
    out = out.transpose(0, 2, 1, 3).reshape(B_, N, C)
    out = out @ params["proj_w"].T + params["proj_b"]
    return out


if __name__ == "__main__":
    # Small, module-consistent shapes.
    window_size = (2, 4, 4)                 # N = 2*4*4 = 32
    dim = 32
    num_heads = 4
    N = window_size[0] * window_size[1] * window_size[2]
    B = 2
    nW = 2
    B_ = B * nW                             # (num_windows * batch)

    key = jax.random.PRNGKey(0)
    k_x, k_qw, k_qb, k_pw, k_pb, k_rpb, k_m = jax.random.split(key, 7)

    x = jax.random.normal(k_x, (B_, N, dim), dtype=jnp.float32)

    rpb_size = (2 * window_size[0] - 1) * (2 * window_size[1] - 1) * (2 * window_size[2] - 1)
    params = {
        "qkv_w": jax.random.normal(k_qw, (3 * dim, dim), jnp.float32) * 0.05,
        "qkv_b": jax.random.normal(k_qb, (3 * dim,), jnp.float32) * 0.05,
        "proj_w": jax.random.normal(k_pw, (dim, dim), jnp.float32) * 0.05,
        "proj_b": jax.random.normal(k_pb, (dim,), jnp.float32) * 0.05,
        # trunc_normal_(std=0.02) approximated by a plain normal (deterministic, synthetic).
        "rpb_table": jax.random.normal(k_rpb, (rpb_size, num_heads), jnp.float32) * 0.02,
    }

    # Shifted-window style additive mask: 0 or -100 (what Swin uses for -inf).
    mask_bits = jax.random.bernoulli(k_m, p=0.2, shape=(nW, N, N))
    mask = jnp.where(mask_bits, -100.0, 0.0).astype(jnp.float32)

    tol = dict(atol=2e-2, rtol=2e-2)   # bf16 MXU operands + approx reciprocal vs f32 ref

    # 1) Shifted-window path (mask present, fused rpb+mask bias).
    out = jax.block_until_ready(
        window_attention_3d(x, params, window_size, num_heads, mask=mask))
    ref = reference_window_attention_3d(x, params, window_size, num_heads, mask=mask)
    assert out.shape == (B_, N, dim)
    np.testing.assert_allclose(np.asarray(out), np.asarray(ref), **tol)

    # 2) Non-shifted path (mask=None -> no mask buffer, rpb-only bias kernel).
    out_nm = jax.block_until_ready(
        window_attention_3d(x, params, window_size, num_heads, mask=None))
    ref_nm = reference_window_attention_3d(x, params, window_size, num_heads, mask=None)
    np.testing.assert_allclose(np.asarray(out_nm), np.asarray(ref_nm), **tol)

    # 3) Split rpb + mask kernel (path used when the fused bias would be too big).
    out_sp = jax.block_until_ready(
        window_attention_3d(x, params, window_size, num_heads, mask=mask,
                            fuse_bias=False))
    np.testing.assert_allclose(np.asarray(out_sp), np.asarray(ref), **tol)

    print("KERNEL_OK")
</pallas_src>

<mosaic_0001>
module attributes {stable_mosaic.version = 11 : i64} {
  func.func @_window_attention_kernel(%arg0: i32, %arg1: memref<64x32xf32, #tpu.memory_space<vmem>>, %arg2: memref<32x96xbf16, #tpu.memory_space<vmem>>, %arg3: memref<1x96xf32, #tpu.memory_space<vmem>>, %arg4: memref<32x32xbf16, #tpu.memory_space<vmem>>, %arg5: memref<1x32xf32, #tpu.memory_space<vmem>>, %arg6: memref<4x2x32x32xf32, #tpu.memory_space<vmem>>, %arg7: memref<16x128xf32, #tpu.memory_space<vmem>>, %arg8: memref<64x32xbf16, #tpu.memory_space<vmem>>) attributes {dimension_semantics = [#tpu.dimension_semantics<parallel>], iteration_bounds = array<i64: 2>, scalar_prefetch = 0 : i64, scratch_operands = 1 : i64, tpu.core_type = #tpu.core_type<tc>, window_params = [{transform_indices = @transform_0, window_bounds = array<i64: 64, 32>}, {pipeline_mode = #tpu.pipeline_mode<synchronous>, transform_indices = @transform_1, window_bounds = array<i64: 32, 96>}, {pipeline_mode = #tpu.pipeline_mode<synchronous>, transform_indices = @transform_2, window_bounds = array<i64: 1, 96>}, {pipeline_mode = #tpu.pipeline_mode<synchronous>, transform_indices = @transform_3, window_bounds = array<i64: 32, 32>}, {pipeline_mode = #tpu.pipeline_mode<synchronous>, transform_indices = @transform_4, window_bounds = array<i64: 1, 32>}, {pipeline_mode = #tpu.pipeline_mode<synchronous>, transform_indices = @transform_5, window_bounds = array<i64: 4, 2, 32, 32>}, {transform_indices = @transform_6, window_bounds = array<i64: 16, 128>}]} {
    %c0 = arith.constant 0 : index
    %c0_0 = arith.constant 0 : index
    %0 = vector.load %arg1[%c0, %c0_0] : memref<64x32xf32, #tpu.memory_space<vmem>>, vector<64x32xf32>
    %1 = arith.truncf %0 : vector<64x32xf32> to vector<64x32xbf16>
    %c0_1 = arith.constant 0 : index
    %c0_2 = arith.constant 0 : index
    %2 = vector.load %arg2[%c0_1, %c0_2] : memref<32x96xbf16, #tpu.memory_space<vmem>>, vector<32x96xbf16>
    %cst = arith.constant dense<0.000000e+00> : vector<64x96xf32>
    %3 = tpu.matmul %1, %2, %cst {dimension_numbers = #tpu.dot_dimension_numbers<[1], [0], [0], [1], [0, 0, 1, 1], [], []>} : vector<64x32xbf16>, vector<32x96xbf16>, vector<64x96xf32> -> vector<64x96xf32>
    %c0_3 = arith.constant 0 : index
    %c0_4 = arith.constant 0 : index
    %4 = vector.load %arg3[%c0_3, %c0_4] : memref<1x96xf32, #tpu.memory_space<vmem>>, vector<1x96xf32>
    %5 = vector.broadcast %4 : vector<1x96xf32> to vector<64x96xf32>
    %6 = arith.addf %3, %5 : vector<64x96xf32>
    %7 = arith.truncf %6 : vector<64x96xf32> to vector<64x96xbf16>
    %8 = vector.extract_strided_slice %7 {offsets = [0, 0], sizes = [64, 8], strides = [1, 1]} : vector<64x96xbf16> to vector<64x8xbf16>
    %9 = vector.shape_cast %8 : vector<64x8xbf16> to vector<2x32x8xbf16>
    %10 = vector.extract_strided_slice %7 {offsets = [0, 32], sizes = [64, 8], strides = [1, 1]} : vector<64x96xbf16> to vector<64x8xbf16>
    %11 = vector.shape_cast %10 : vector<64x8xbf16> to vector<2x32x8xbf16>
    %12 = vector.extract_strided_slice %7 {offsets = [0, 64], sizes = [64, 8], strides = [1, 1]} : vector<64x96xbf16> to vector<64x8xbf16>
    %13 = vector.shape_cast %12 : vector<64x8xbf16> to vector<2x32x8xbf16>
    "tpu.trace_start"() <{level = 10 : i32, message = "bnd,bmd->bnm"}> : () -> ()
    %cst_5 = arith.constant dense<0.000000e+00> : vector<2x32x32xf32>
    %14 = tpu.matmul %9, %11, %cst_5 {dimension_numbers = #tpu.dot_dimension_numbers<[2], [2], [1], [1], [0, 0, 0, 1, 1, 1], [0], [0]>} : vector<2x32x8xbf16>, vector<2x32x8xbf16>, vector<2x32x32xf32> -> vector<2x32x32xf32>
    "tpu.trace_stop"() : () -> ()
    %c0_6 = arith.constant 0 : index
    %c0_7 = arith.constant 0 : index
    %c0_8 = arith.constant 0 : index
    %c0_9 = arith.constant 0 : index
    %15 = vector.load %arg6[%c0_6, %c0_7, %c0_8, %c0_9] : memref<4x2x32x32xf32, #tpu.memory_space<vmem>>, vector<1x2x32x32xf32>
    %16 = vector.shape_cast %15 : vector<1x2x32x32xf32> to vector<2x32x32xf32>
    %17 = arith.addf %14, %16 : vector<2x32x32xf32>
    %cst_10 = arith.constant dense<0xFF800000> : vector<2x32xf32>
    %18 = vector.multi_reduction <maximumf>, %17, %cst_10 [2] : vector<2x32x32xf32> to vector<2x32xf32>
    %19 = vector.shape_cast %18 : vector<2x32xf32> to vector<2x32x1xf32>
    %20 = vector.broadcast %19 : vector<2x32x1xf32> to vector<2x32x32xf32>
    %21 = arith.subf %17, %20 : vector<2x32x32xf32>
    %22 = math.exp %21 : vector<2x32x32xf32>
    %cst_11 = arith.constant dense<0.000000e+00> : vector<2x32xf32>
    %23 = vector.multi_reduction <add>, %22, %cst_11 [2] : vector<2x32x32xf32> to vector<2x32xf32>
    %24 = vector.shape_cast %23 : vector<2x32xf32> to vector<2x32x1xf32>
    %25 = tpu.reciprocal %24 {approx = true} : vector<2x32x1xf32> -> vector<2x32x1xf32>
    %26 = vector.broadcast %25 : vector<2x32x1xf32> to vector<2x32x32xf32>
    %27 = arith.mulf %22, %26 : vector<2x32x32xf32>
    %28 = arith.truncf %27 : vector<2x32x32xf32> to vector<2x32x32xbf16>
    "tpu.trace_start"() <{level = 10 : i32, message = "bnm,bmd->bnd"}> : () -> ()
    %cst_12 = arith.constant dense<0.000000e+00> : vector<2x32x8xf32>
    %29 = tpu.matmul %28, %13, %cst_12 {dimension_numbers = #tpu.dot_dimension_numbers<[2], [1], [1], [2], [0, 0, 0, 1, 1, 2], [0], [0]>} : vector<2x32x32xbf16>, vector<2x32x8xbf16>, vector<2x32x8xf32> -> vector<2x32x8xf32>
    "tpu.trace_stop"() : () -> ()
    %30 = vector.shape_cast %29 : vector<2x32x8xf32> to vector<64x8xf32>
    %31 = arith.truncf %30 : vector<64x8xf32> to vector<64x8xbf16>
    %c0_13 = arith.constant 0 : index
    %c0_14 = arith.constant 0 : index
    %32 = vector.load %arg8[%c0_13, %c0_14] : memref<64x32xbf16, #tpu.memory_space<vmem>>, vector<64x8xbf16>
    tpu.vector_store %arg8[%c0_13, %c0_14], %31 {strides = array<i32>} : memref<64x32xbf16, #tpu.memory_space<vmem>>, vector<64x8xbf16>,
    %33 = vector.extract_strided_slice %7 {offsets = [0, 8], sizes = [64, 8], strides = [1, 1]} : vector<64x96xbf16> to vector<64x8xbf16>
    %34 = vector.shape_cast %33 : vector<64x8xbf16> to vector<2x32x8xbf16>
    %35 = vector.extract_strided_slice %7 {offsets = [0, 40], sizes = [64, 8], strides = [1, 1]} : vector<64x96xbf16> to vector<64x8xbf16>
    %36 = vector.shape_cast %35 : vector<64x8xbf16> to vector<2x32x8xbf16>
    %37 = vector.extract_strided_slice %7 {offsets = [0, 72], sizes = [64, 8], strides = [1, 1]} : vector<64x96xbf16> to vector<64x8xbf16>
    %38 = vector.shape_cast %37 : vector<64x8xbf16> to vector<2x32x8xbf16>
    "tpu.trace_start"() <{level = 10 : i32, message = "bnd,bmd->bnm"}> : () -> ()
    %cst_15 = arith.constant dense<0.000000e+00> : vector<2x32x32xf32>
    %39 = tpu.matmul %34, %36, %cst_15 {dimension_numbers = #tpu.dot_dimension_numbers<[2], [2], [1], [1], [0, 0, 0, 1, 1, 1], [0], [0]>} : vector<2x32x8xbf16>, vector<2x32x8xbf16>, vector<2x32x32xf32> -> vector<2x32x32xf32>
    "tpu.trace_stop"() : () -> ()
    %c1 = arith.constant 1 : index
    %c0_16 = arith.constant 0 : index
    %c0_17 = arith.constant 0 : index
    %c0_18 = arith.constant 0 : index
    %40 = vector.load %arg6[%c1, %c0_16, %c0_17, %c0_18] : memref<4x2x32x32xf32, #tpu.memory_space<vmem>>, vector<1x2x32x32xf32>
    %41 = vector.shape_cast %40 : vector<1x2x32x32xf32> to vector<2x32x32xf32>
    %42 = arith.addf %39, %41 : vector<2x32x32xf32>
    %cst_19 = arith.constant dense<0xFF800000> : vector<2x32xf32>
    %43 = vector.multi_reduction <maximumf>, %42, %cst_19 [2] : vector<2x32x32xf32> to vector<2x32xf32>
    %44 = vector.shape_cast %43 : vector<2x32xf32> to vector<2x32x1xf32>
    %45 = vector.broadcast %44 : vector<2x32x1xf32> to vector<2x32x32xf32>
    %46 = arith.subf %42, %45 : vector<2x32x32xf32>
    %47 = math.exp %46 : vector<2x32x32xf32>
    %cst_20 = arith.constant dense<0.000000e+00> : vector<2x32xf32>
    %48 = vector.multi_reduction <add>, %47, %cst_20 [2] : vector<2x32x32xf32> to vector<2x32xf32>
    %49 = vector.shape_cast %48 : vector<2x32xf32> to vector<2x32x1xf32>
    %50 = tpu.reciprocal %49 {approx = true} : vector<2x32x1xf32> -> vector<2x32x1xf32>
    %51 = vector.broadcast %50 : vector<2x32x1xf32> to vector<2x32x32xf32>
    %52 = arith.mulf %47, %51 : vector<2x32x32xf32>
    %53 = arith.truncf %52 : vector<2x32x32xf32> to vector<2x32x32xbf16>
    "tpu.trace_start"() <{level = 10 : i32, message = "bnm,bmd->bnd"}> : () -> ()
    %cst_21 = arith.constant dense<0.000000e+00> : vector<2x32x8xf32>
    %54 = tpu.matmul %53, %38, %cst_21 {dimension_numbers = #tpu.dot_dimension_numbers<[2], [1], [1], [2], [0, 0, 0, 1, 1, 2], [0], [0]>} : vector<2x32x32xbf16>, vector<2x32x8xbf16>, vector<2x32x8xf32> -> vector<2x32x8xf32>
    "tpu.trace_stop"() : () -> ()
    %55 = vector.shape_cast %54 : vector<2x32x8xf32> to vector<64x8xf32>
    %56 = arith.truncf %55 : vector<64x8xf32> to vector<64x8xbf16>
    %c0_22 = arith.constant 0 : index
    %c8 = arith.constant 8 : index
    %57 = vector.load %arg8[%c0_22, %c8] : memref<64x32xbf16, #tpu.memory_space<vmem>>, vector<64x8xbf16>
    tpu.vector_store %arg8[%c0_22, %c8], %56 {strides = array<i32>} : memref<64x32xbf16, #tpu.memory_space<vmem>>, vector<64x8xbf16>,
    %58 = vector.extract_strided_slice %7 {offsets = [0, 16], sizes = [64, 8], strides = [1, 1]} : vector<64x96xbf16> to vector<64x8xbf16>
    %59 = vector.shape_cast %58 : vector<64x8xbf16> to vector<2x32x8xbf16>
    %60 = vector.extract_strided_slice %7 {offsets = [0, 48], sizes = [64, 8], strides = [1, 1]} : vector<64x96xbf16> to vector<64x8xbf16>
    %61 = vector.shape_cast %60 : vector<64x8xbf16> to vector<2x32x8xbf16>
    %62 = vector.extract_strided_slice %7 {offsets = [0, 80], sizes = [64, 8], strides = [1, 1]} : vector<64x96xbf16> to vector<64x8xbf16>
    %63 = vector.shape_cast %62 : vector<64x8xbf16> to vector<2x32x8xbf16>
    "tpu.trace_start"() <{level = 10 : i32, message = "bnd,bmd->bnm"}> : () -> ()
    %cst_23 = arith.constant dense<0.000000e+00> : vector<2x32x32xf32>
    %64 = tpu.matmul %59, %61, %cst_23 {dimension_numbers = #tpu.dot_dimension_numbers<[2], [2], [1], [1], [0, 0, 0, 1, 1, 1], [0], [0]>} : vector<2x32x8xbf16>, vector<2x32x8xbf16>, vector<2x32x32xf32> -> vector<2x32x32xf32>
    "tpu.trace_stop"() : () -> ()
    %c2 = arith.constant 2 : index
    %c0_24 = arith.constant 0 : index
    %c0_25 = arith.constant 0 : index
    %c0_26 = arith.constant 0 : index
    %65 = vector.load %arg6[%c2, %c0_24, %c0_25, %c0_26] : memref<4x2x32x32xf32, #tpu.memory_space<vmem>>, vector<1x2x32x32xf32>
    %66 = vector.shape_cast %65 : vector<1x2x32x32xf32> to vector<2x32x32xf32>
    %67 = arith.addf %64, %66 : vector<2x32x32xf32>
    %cst_27 = arith.constant dense<0xFF800000> : vector<2x32xf32>
    %68 = vector.multi_reduction <maximumf>, %67, %cst_27 [2] : vector<2x32x32xf32> to vector<2x32xf32>
    %69 = vector.shape_cast %68 : vector<2x32xf32> to vector<2x32x1xf32>
    %70 = vector.broadcast %69 : vector<2x32x1xf32> to vector<2x32x32xf32>
    %71 = arith.subf %67, %70 : vector<2x32x32xf32>
    %72 = math.exp %71 : vector<2x32x32xf32>
    %cst_28 = arith.constant dense<0.000000e+00> : vector<2x32xf32>
    %73 = vector.multi_reduction <add>, %72, %cst_28 [2] : vector<2x32x32xf32> to vector<2x32xf32>
    %74 = vector.shape_cast %73 : vector<2x32xf32> to vector<2x32x1xf32>
    %75 = tpu.reciprocal %74 {approx = true} : vector<2x32x1xf32> -> vector<2x32x1xf32>
    %76 = vector.broadcast %75 : vector<2x32x1xf32> to vector<2x32x32xf32>
    %77 = arith.mulf %72, %76 : vector<2x32x32xf32>
    %78 = arith.truncf %77 : vector<2x32x32xf32> to vector<2x32x32xbf16>
    "tpu.trace_start"() <{level = 10 : i32, message = "bnm,bmd->bnd"}> : () -> ()
    %cst_29 = arith.constant dense<0.000000e+00> : vector<2x32x8xf32>
    %79 = tpu.matmul %78, %63, %cst_29 {dimension_numbers = #tpu.dot_dimension_numbers<[2], [1], [1], [2], [0, 0, 0, 1, 1, 2], [0], [0]>} : vector<2x32x32xbf16>, vector<2x32x8xbf16>, vector<2x32x8xf32> -> vector<2x32x8xf32>
    "tpu.trace_stop"() : () -> ()
    %80 = vector.shape_cast %79 : vector<2x32x8xf32> to vector<64x8xf32>
    %81 = arith.truncf %80 : vector<64x8xf32> to vector<64x8xbf16>
    %c0_30 = arith.constant 0 : index
    %c16 = arith.constant 16 : index
    %82 = vector.load %arg8[%c0_30, %c16] : memref<64x32xbf16, #tpu.memory_space<vmem>>, vector<64x8xbf16>
    tpu.vector_store %arg8[%c0_30, %c16], %81 {strides = array<i32>} : memref<64x32xbf16, #tpu.memory_space<vmem>>, vector<64x8xbf16>,
    %83 = vector.extract_strided_slice %7 {offsets = [0, 24], sizes = [64, 8], strides = [1, 1]} : vector<64x96xbf16> to vector<64x8xbf16>
    %84 = vector.shape_cast %83 : vector<64x8xbf16> to vector<2x32x8xbf16>
    %85 = vector.extract_strided_slice %7 {offsets = [0, 56], sizes = [64, 8], strides = [1, 1]} : vector<64x96xbf16> to vector<64x8xbf16>
    %86 = vector.shape_cast %85 : vector<64x8xbf16> to vector<2x32x8xbf16>
    %87 = vector.extract_strided_slice %7 {offsets = [0, 88], sizes = [64, 8], strides = [1, 1]} : vector<64x96xbf16> to vector<64x8xbf16>
    %88 = vector.shape_cast %87 : vector<64x8xbf16> to vector<2x32x8xbf16>
    "tpu.trace_start"() <{level = 10 : i32, message = "bnd,bmd->bnm"}> : () -> ()
    %cst_31 = arith.constant dense<0.000000e+00> : vector<2x32x32xf32>
    %89 = tpu.matmul %84, %86, %cst_31 {dimension_numbers = #tpu.dot_dimension_numbers<[2], [2], [1], [1], [0, 0, 0, 1, 1, 1], [0], [0]>} : vector<2x32x8xbf16>, vector<2x32x8xbf16>, vector<2x32x32xf32> -> vector<2x32x32xf32>
    "tpu.trace_stop"() : () -> ()
    %c3 = arith.constant 3 : index
    %c0_32 = arith.constant 0 : index
    %c0_33 = arith.constant 0 : index
    %c0_34 = arith.constant 0 : index
    %90 = vector.load %arg6[%c3, %c0_32, %c0_33, %c0_34] : memref<4x2x32x32xf32, #tpu.memory_space<vmem>>, vector<1x2x32x32xf32>
    %91 = vector.shape_cast %90 : vector<1x2x32x32xf32> to vector<2x32x32xf32>
    %92 = arith.addf %89, %91 : vector<2x32x32xf32>
    %cst_35 = arith.constant dense<0xFF800000> : vector<2x32xf32>
    %93 = vector.multi_reduction <maximumf>, %92, %cst_35 [2] : vector<2x32x32xf32> to vector<2x32xf32>
    %94 = vector.shape_cast %93 : vector<2x32xf32> to vector<2x32x1xf32>
    %95 = vector.broadcast %94 : vector<2x32x1xf32> to vector<2x32x32xf32>
    %96 = arith.subf %92, %95 : vector<2x32x32xf32>
    %97 = math.exp %96 : vector<2x32x32xf32>
    %cst_36 = arith.constant dense<0.000000e+00> : vector<2x32xf32>
    %98 = vector.multi_reduction <add>, %97, %cst_36 [2] : vector<2x32x32xf32> to vector<2x32xf32>
    %99 = vector.shape_cast %98 : vector<2x32xf32> to vector<2x32x1xf32>
    %100 = tpu.reciprocal %99 {approx = true} : vector<2x32x1xf32> -> vector<2x32x1xf32>
    %101 = vector.broadcast %100 : vector<2x32x1xf32> to vector<2x32x32xf32>
    %102 = arith.mulf %97, %101 : vector<2x32x32xf32>
    %103 = arith.truncf %102 : vector<2x32x32xf32> to vector<2x32x32xbf16>
    "tpu.trace_start"() <{level = 10 : i32, message = "bnm,bmd->bnd"}> : () -> ()
    %cst_37 = arith.constant dense<0.000000e+00> : vector<2x32x8xf32>
    %104 = tpu.matmul %103, %88, %cst_37 {dimension_numbers = #tpu.dot_dimension_numbers<[2], [1], [1], [2], [0, 0, 0, 1, 1, 2], [0], [0]>} : vector<2x32x32xbf16>, vector<2x32x8xbf16>, vector<2x32x8xf32> -> vector<2x32x8xf32>
    "tpu.trace_stop"() : () -> ()
    %105 = vector.shape_cast %104 : vector<2x32x8xf32> to vector<64x8xf32>
    %106 = arith.truncf %105 : vector<64x8xf32> to vector<64x8xbf16>
    %c0_38 = arith.constant 0 : index
    %c24 = arith.constant 24 : index
    %107 = vector.load %arg8[%c0_38, %c24] : memref<64x32xbf16, #tpu.memory_space<vmem>>, vector<64x8xbf16>
    tpu.vector_store %arg8[%c0_38, %c24], %106 {strides = array<i32>} : memref<64x32xbf16, #tpu.memory_space<vmem>>, vector<64x8xbf16>,
    %c0_39 = arith.constant 0 : index
    %c0_40 = arith.constant 0 : index
    %108 = vector.load %arg8[%c0_39, %c0_40] : memref<64x32xbf16, #tpu.memory_space<vmem>>, vector<64x32xbf16>
    %c0_41 = arith.constant 0 : index
    %c0_42 = arith.constant 0 : index
    %109 = vector.load %arg4[%c0_41, %c0_42] : memref<32x32xbf16, #tpu.memory_space<vmem>>, vector<32x32xbf16>
    %cst_43 = arith.constant dense<0.000000e+00> : vector<64x32xf32>
    %110 = tpu.matmul %108, %109, %cst_43 {dimension_numbers = #tpu.dot_dimension_numbers<[1], [0], [0], [1], [0, 0, 1, 1], [], []>} : vector<64x32xbf16>, vector<32x32xbf16>, vector<64x32xf32> -> vector<64x32xf32>
    %c0_44 = arith.constant 0 : index
    %c0_45 = arith.constant 0 : index
    %111 = vector.load %arg5[%c0_44, %c0_45] : memref<1x32xf32, #tpu.memory_space<vmem>>, vector<1x32xf32>
    %112 = vector.broadcast %111 : vector<1x32xf32> to vector<64x32xf32>
    %113 = arith.addf %110, %112 : vector<64x32xf32>
    %114 = vector.shape_cast %113 : vector<64x32xf32> to vector<16x128xf32>
    %c0_46 = arith.constant 0 : index
    %c0_47 = arith.constant 0 : index
    %115 = vector.load %arg7[%c0_46, %c0_47] : memref<16x128xf32, #tpu.memory_space<vmem>>, vector<16x128xf32>
    tpu.vector_store %arg7[%c0_46, %c0_47], %114 {strides = array<i32>} : memref<16x128xf32, #tpu.memory_space<vmem>>, vector<16x128xf32>,
    return
  }
  func.func @transform_0(%arg0: i32) -> (i32, i32) {
    %c0_i32 = arith.constant 0 : i32
    %c0_i32_0 = arith.constant 0 : i32
    return %arg0, %c0_i32 : i32, i32
  }
  func.func @transform_1(%arg0: i32) -> (i32, i32) {
    %c0_i32 = arith.constant 0 : i32
    %c0_i32_0 = arith.constant 0 : i32
    %c0_i32_1 = arith.constant 0 : i32
    return %c0_i32, %c0_i32_0 : i32, i32
  }
  func.func @transform_2(%arg0: i32) -> (i32, i32) {
    %c0_i32 = arith.constant 0 : i32
    %c0_i32_0 = arith.constant 0 : i32
    %c0_i32_1 = arith.constant 0 : i32
    return %c0_i32, %c0_i32_0 : i32, i32
  }
  func.func @transform_3(%arg0: i32) -> (i32, i32) {
    %c0_i32 = arith.constant 0 : i32
    %c0_i32_0 = arith.constant 0 : i32
    %c0_i32_1 = arith.constant 0 : i32
    return %c0_i32, %c0_i32_0 : i32, i32
  }
  func.func @transform_4(%arg0: i32) -> (i32, i32) {
    %c0_i32 = arith.constant 0 : i32
    %c0_i32_0 = arith.constant 0 : i32
    %c0_i32_1 = arith.constant 0 : i32
    return %c0_i32, %c0_i32_0 : i32, i32
  }
  func.func @transform_5(%arg0: i32) -> (i32, i32, i32, i32) {
    %c0_i32 = arith.constant 0 : i32
    %c0_i32_0 = arith.constant 0 : i32
    %c0_i32_1 = arith.constant 0 : i32
    %c0_i32_2 = arith.constant 0 : i32
    %c0_i32_3 = arith.constant 0 : i32
    return %c0_i32, %c0_i32_0, %c0_i32_1, %c0_i32_2 : i32, i32, i32, i32
  }
  func.func @transform_6(%arg0: i32) -> (i32, i32) {
    %c0_i32 = arith.constant 0 : i32
    %c0_i32_0 = arith.constant 0 : i32
    return %arg0, %c0_i32 : i32, i32
  }
}

module attributes {stable_mosaic.version = 11 : i64} {
  func.func @_window_attention_kernel(%arg0: i32, %arg1: memref<64x32xf32, #tpu.memory_space<vmem>>, %arg2: memref<32x96xbf16, #tpu.memory_space<vmem>>, %arg3: memref<1x96xf32, #tpu.memory_space<vmem>>, %arg4: memref<32x32xbf16, #tpu.memory_space<vmem>>, %arg5: memref<1x32xf32, #tpu.memory_space<vmem>>, %arg6: memref<4x2x32x32xf32, #tpu.memory_space<vmem>>, %arg7: memref<16x128xf32, #tpu.memory_space<vmem>>, %arg8: memref<64x32xbf16, #tpu.memory_space<vmem>>) attributes {dimension_semantics = [#tpu.dimension_semantics<parallel>], iteration_bounds = array<i64: 2>, scalar_prefetch = 0 : i64, scratch_operands = 1 : i64, tpu.core_type = #tpu.core_type<tc>, window_params = [{transform_indices = @transform_0, window_bounds = array<i64: 64, 32>}, {pipeline_mode = #tpu.pipeline_mode<synchronous>, transform_indices = @transform_1, window_bounds = array<i64: 32, 96>}, {pipeline_mode = #tpu.pipeline_mode<synchronous>, transform_indices = @transform_2, window_bounds = array<i64: 1, 96>}, {pipeline_mode = #tpu.pipeline_mode<synchronous>, transform_indices = @transform_3, window_bounds = array<i64: 32, 32>}, {pipeline_mode = #tpu.pipeline_mode<synchronous>, transform_indices = @transform_4, window_bounds = array<i64: 1, 32>}, {pipeline_mode = #tpu.pipeline_mode<synchronous>, transform_indices = @transform_5, window_bounds = array<i64: 4, 2, 32, 32>}, {transform_indices = @transform_6, window_bounds = array<i64: 16, 128>}]} {
    %c0 = arith.constant 0 : index
    %c0_0 = arith.constant 0 : index
    %0 = vector.load %arg1[%c0, %c0_0] : memref<64x32xf32, #tpu.memory_space<vmem>>, vector<64x32xf32>
    %1 = arith.truncf %0 : vector<64x32xf32> to vector<64x32xbf16>
    %c0_1 = arith.constant 0 : index
    %c0_2 = arith.constant 0 : index
    %2 = vector.load %arg2[%c0_1, %c0_2] : memref<32x96xbf16, #tpu.memory_space<vmem>>, vector<32x96xbf16>
    %cst = arith.constant dense<0.000000e+00> : vector<64x96xf32>
    %3 = tpu.matmul %1, %2, %cst {dimension_numbers = #tpu.dot_dimension_numbers<[1], [0], [0], [1], [0, 0, 1, 1], [], []>} : vector<64x32xbf16>, vector<32x96xbf16>, vector<64x96xf32> -> vector<64x96xf32>
    %c0_3 = arith.constant 0 : index
    %c0_4 = arith.constant 0 : index
    %4 = vector.load %arg3[%c0_3, %c0_4] : memref<1x96xf32, #tpu.memory_space<vmem>>, vector<1x96xf32>
    %5 = vector.broadcast %4 : vector<1x96xf32> to vector<64x96xf32>
    %6 = arith.addf %3, %5 : vector<64x96xf32>
    %7 = arith.truncf %6 : vector<64x96xf32> to vector<64x96xbf16>
    %8 = vector.extract_strided_slice %7 {offsets = [0, 0], sizes = [64, 8], strides = [1, 1]} : vector<64x96xbf16> to vector<64x8xbf16>
    %9 = vector.shape_cast %8 : vector<64x8xbf16> to vector<2x32x8xbf16>
    %10 = vector.extract_strided_slice %7 {offsets = [0, 32], sizes = [64, 8], strides = [1, 1]} : vector<64x96xbf16> to vector<64x8xbf16>
    %11 = vector.shape_cast %10 : vector<64x8xbf16> to vector<2x32x8xbf16>
    %12 = vector.extract_strided_slice %7 {offsets = [0, 64], sizes = [64, 8], strides = [1, 1]} : vector<64x96xbf16> to vector<64x8xbf16>
    %13 = vector.shape_cast %12 : vector<64x8xbf16> to vector<2x32x8xbf16>
    "tpu.trace_start"() <{level = 10 : i32, message = "bnd,bmd->bnm"}> : () -> ()
    %cst_5 = arith.constant dense<0.000000e+00> : vector<2x32x32xf32>
    %14 = tpu.matmul %9, %11, %cst_5 {dimension_numbers = #tpu.dot_dimension_numbers<[2], [2], [1], [1], [0, 0, 0, 1, 1, 1], [0], [0]>} : vector<2x32x8xbf16>, vector<2x32x8xbf16>, vector<2x32x32xf32> -> vector<2x32x32xf32>
    "tpu.trace_stop"() : () -> ()
    %c0_6 = arith.constant 0 : index
    %c0_7 = arith.constant 0 : index
    %c0_8 = arith.constant 0 : index
    %c0_9 = arith.constant 0 : index
    %15 = vector.load %arg6[%c0_6, %c0_7, %c0_8, %c0_9] : memref<4x2x32x32xf32, #tpu.memory_space<vmem>>, vector<1x2x32x32xf32>
    %16 = vector.shape_cast %15 : vector<1x2x32x32xf32> to vector<2x32x32xf32>
    %17 = arith.addf %14, %16 : vector<2x32x32xf32>
    %cst_10 = arith.constant dense<0xFF800000> : vector<2x32xf32>
    %18 = vector.multi_reduction <maximumf>, %17, %cst_10 [2] : vector<2x32x32xf32> to vector<2x32xf32>
    %19 = vector.shape_cast %18 : vector<2x32xf32> to vector<2x32x1xf32>
    %20 = vector.broadcast %19 : vector<2x32x1xf32> to vector<2x32x32xf32>
    %21 = arith.subf %17, %20 : vector<2x32x32xf32>
    %22 = math.exp %21 : vector<2x32x32xf32>
    %cst_11 = arith.constant dense<0.000000e+00> : vector<2x32xf32>
    %23 = vector.multi_reduction <add>, %22, %cst_11 [2] : vector<2x32x32xf32> to vector<2x32xf32>
    %24 = vector.shape_cast %23 : vector<2x32xf32> to vector<2x32x1xf32>
    %25 = tpu.reciprocal %24 {approx = true} : vector<2x32x1xf32> -> vector<2x32x1xf32>
    %26 = vector.broadcast %25 : vector<2x32x1xf32> to vector<2x32x32xf32>
    %27 = arith.mulf %22, %26 : vector<2x32x32xf32>
    %28 = arith.truncf %27 : vector<2x32x32xf32> to vector<2x32x32xbf16>
    "tpu.trace_start"() <{level = 10 : i32, message = "bnm,bmd->bnd"}> : () -> ()
    %cst_12 = arith.constant dense<0.000000e+00> : vector<2x32x8xf32>
    %29 = tpu.matmul %28, %13, %cst_12 {dimension_numbers = #tpu.dot_dimension_numbers<[2], [1], [1], [2], [0, 0, 0, 1, 1, 2], [0], [0]>} : vector<2x32x32xbf16>, vector<2x32x8xbf16>, vector<2x32x8xf32> -> vector<2x32x8xf32>
    "tpu.trace_stop"() : () -> ()
    %30 = vector.shape_cast %29 : vector<2x32x8xf32> to vector<64x8xf32>
    %31 = arith.truncf %30 : vector<64x8xf32> to vector<64x8xbf16>
    %c0_13 = arith.constant 0 : index
    %c0_14 = arith.constant 0 : index
    %32 = vector.load %arg8[%c0_13, %c0_14] : memref<64x32xbf16, #tpu.memory_space<vmem>>, vector<64x8xbf16>
    tpu.vector_store %arg8[%c0_13, %c0_14], %31 {strides = array<i32>} : memref<64x32xbf16, #tpu.memory_space<vmem>>, vector<64x8xbf16>,
    %33 = vector.extract_strided_slice %7 {offsets = [0, 8], sizes = [64, 8], strides = [1, 1]} : vector<64x96xbf16> to vector<64x8xbf16>
    %34 = vector.shape_cast %33 : vector<64x8xbf16> to vector<2x32x8xbf16>
    %35 = vector.extract_strided_slice %7 {offsets = [0, 40], sizes = [64, 8], strides = [1, 1]} : vector<64x96xbf16> to vector<64x8xbf16>
    %36 = vector.shape_cast %35 : vector<64x8xbf16> to vector<2x32x8xbf16>
    %37 = vector.extract_strided_slice %7 {offsets = [0, 72], sizes = [64, 8], strides = [1, 1]} : vector<64x96xbf16> to vector<64x8xbf16>
    %38 = vector.shape_cast %37 : vector<64x8xbf16> to vector<2x32x8xbf16>
    "tpu.trace_start"() <{level = 10 : i32, message = "bnd,bmd->bnm"}> : () -> ()
    %cst_15 = arith.constant dense<0.000000e+00> : vector<2x32x32xf32>
    %39 = tpu.matmul %34, %36, %cst_15 {dimension_numbers = #tpu.dot_dimension_numbers<[2], [2], [1], [1], [0, 0, 0, 1, 1, 1], [0], [0]>} : vector<2x32x8xbf16>, vector<2x32x8xbf16>, vector<2x32x32xf32> -> vector<2x32x32xf32>
    "tpu.trace_stop"() : () -> ()
    %c1 = arith.constant 1 : index
    %c0_16 = arith.constant 0 : index
    %c0_17 = arith.constant 0 : index
    %c0_18 = arith.constant 0 : index
    %40 = vector.load %arg6[%c1, %c0_16, %c0_17, %c0_18] : memref<4x2x32x32xf32, #tpu.memory_space<vmem>>, vector<1x2x32x32xf32>
    %41 = vector.shape_cast %40 : vector<1x2x32x32xf32> to vector<2x32x32xf32>
    %42 = arith.addf %39, %41 : vector<2x32x32xf32>
    %cst_19 = arith.constant dense<0xFF800000> : vector<2x32xf32>
    %43 = vector.multi_reduction <maximumf>, %42, %cst_19 [2] : vector<2x32x32xf32> to vector<2x32xf32>
    %44 = vector.shape_cast %43 : vector<2x32xf32> to vector<2x32x1xf32>
    %45 = vector.broadcast %44 : vector<2x32x1xf32> to vector<2x32x32xf32>
    %46 = arith.subf %42, %45 : vector<2x32x32xf32>
    %47 = math.exp %46 : vector<2x32x32xf32>
    %cst_20 = arith.constant dense<0.000000e+00> : vector<2x32xf32>
    %48 = vector.multi_reduction <add>, %47, %cst_20 [2] : vector<2x32x32xf32> to vector<2x32xf32>
    %49 = vector.shape_cast %48 : vector<2x32xf32> to vector<2x32x1xf32>
    %50 = tpu.reciprocal %49 {approx = true} : vector<2x32x1xf32> -> vector<2x32x1xf32>
    %51 = vector.broadcast %50 : vector<2x32x1xf32> to vector<2x32x32xf32>
    %52 = arith.mulf %47, %51 : vector<2x32x32xf32>
    %53 = arith.truncf %52 : vector<2x32x32xf32> to vector<2x32x32xbf16>
    "tpu.trace_start"() <{level = 10 : i32, message = "bnm,bmd->bnd"}> : () -> ()
    %cst_21 = arith.constant dense<0.000000e+00> : vector<2x32x8xf32>
    %54 = tpu.matmul %53, %38, %cst_21 {dimension_numbers = #tpu.dot_dimension_numbers<[2], [1], [1], [2], [0, 0, 0, 1, 1, 2], [0], [0]>} : vector<2x32x32xbf16>, vector<2x32x8xbf16>, vector<2x32x8xf32> -> vector<2x32x8xf32>
    "tpu.trace_stop"() : () -> ()
    %55 = vector.shape_cast %54 : vector<2x32x8xf32> to vector<64x8xf32>
    %56 = arith.truncf %55 : vector<64x8xf32> to vector<64x8xbf16>
    %c0_22 = arith.constant 0 : index
    %c8 = arith.constant 8 : index
    %57 = vector.load %arg8[%c0_22, %c8] : memref<64x32xbf16, #tpu.memory_space<vmem>>, vector<64x8xbf16>
    tpu.vector_store %arg8[%c0_22, %c8], %56 {strides = array<i32>} : memref<64x32xbf16, #tpu.memory_space<vmem>>, vector<64x8xbf16>,
    %58 = vector.extract_strided_slice %7 {offsets = [0, 16], sizes = [64, 8], strides = [1, 1]} : vector<64x96xbf16> to vector<64x8xbf16>
    %59 = vector.shape_cast %58 : vector<64x8xbf16> to vector<2x32x8xbf16>
    %60 = vector.extract_strided_slice %7 {offsets = [0, 48], sizes = [64, 8], strides = [1, 1]} : vector<64x96xbf16> to vector<64x8xbf16>
    %61 = vector.shape_cast %60 : vector<64x8xbf16> to vector<2x32x8xbf16>
    %62 = vector.extract_strided_slice %7 {offsets = [0, 80], sizes = [64, 8], strides = [1, 1]} : vector<64x96xbf16> to vector<64x8xbf16>
    %63 = vector.shape_cast %62 : vector<64x8xbf16> to vector<2x32x8xbf16>
    "tpu.trace_start"() <{level = 10 : i32, message = "bnd,bmd->bnm"}> : () -> ()
    %cst_23 = arith.constant dense<0.000000e+00> : vector<2x32x32xf32>
    %64 = tpu.matmul %59, %61, %cst_23 {dimension_numbers = #tpu.dot_dimension_numbers<[2], [2], [1], [1], [0, 0, 0, 1, 1, 1], [0], [0]>} : vector<2x32x8xbf16>, vector<2x32x8xbf16>, vector<2x32x32xf32> -> vector<2x32x32xf32>
    "tpu.trace_stop"() : () -> ()
    %c2 = arith.constant 2 : index
    %c0_24 = arith.constant 0 : index
    %c0_25 = arith.constant 0 : index
    %c0_26 = arith.constant 0 : index
    %65 = vector.load %arg6[%c2, %c0_24, %c0_25, %c0_26] : memref<4x2x32x32xf32, #tpu.memory_space<vmem>>, vector<1x2x32x32xf32>
    %66 = vector.shape_cast %65 : vector<1x2x32x32xf32> to vector<2x32x32xf32>
    %67 = arith.addf %64, %66 : vector<2x32x32xf32>
    %cst_27 = arith.constant dense<0xFF800000> : vector<2x32xf32>
    %68 = vector.multi_reduction <maximumf>, %67, %cst_27 [2] : vector<2x32x32xf32> to vector<2x32xf32>
    %69 = vector.shape_cast %68 : vector<2x32xf32> to vector<2x32x1xf32>
    %70 = vector.broadcast %69 : vector<2x32x1xf32> to vector<2x32x32xf32>
    %71 = arith.subf %67, %70 : vector<2x32x32xf32>
    %72 = math.exp %71 : vector<2x32x32xf32>
    %cst_28 = arith.constant dense<0.000000e+00> : vector<2x32xf32>
    %73 = vector.multi_reduction <add>, %72, %cst_28 [2] : vector<2x32x32xf32> to vector<2x32xf32>
    %74 = vector.shape_cast %73 : vector<2x32xf32> to vector<2x32x1xf32>
    %75 = tpu.reciprocal %74 {approx = true} : vector<2x32x1xf32> -> vector<2x32x1xf32>
    %76 = vector.broadcast %75 : vector<2x32x1xf32> to vector<2x32x32xf32>
    %77 = arith.mulf %72, %76 : vector<2x32x32xf32>
    %78 = arith.truncf %77 : vector<2x32x32xf32> to vector<2x32x32xbf16>
    "tpu.trace_start"() <{level = 10 : i32, message = "bnm,bmd->bnd"}> : () -> ()
    %cst_29 = arith.constant dense<0.000000e+00> : vector<2x32x8xf32>
    %79 = tpu.matmul %78, %63, %cst_29 {dimension_numbers = #tpu.dot_dimension_numbers<[2], [1], [1], [2], [0, 0, 0, 1, 1, 2], [0], [0]>} : vector<2x32x32xbf16>, vector<2x32x8xbf16>, vector<2x32x8xf32> -> vector<2x32x8xf32>
    "tpu.trace_stop"() : () -> ()
    %80 = vector.shape_cast %79 : vector<2x32x8xf32> to vector<64x8xf32>
    %81 = arith.truncf %80 : vector<64x8xf32> to vector<64x8xbf16>
    %c0_30 = arith.constant 0 : index
    %c16 = arith.constant 16 : index
    %82 = vector.load %arg8[%c0_30, %c16] : memref<64x32xbf16, #tpu.memory_space<vmem>>, vector<64x8xbf16>
    tpu.vector_store %arg8[%c0_30, %c16], %81 {strides = array<i32>} : memref<64x32xbf16, #tpu.memory_space<vmem>>, vector<64x8xbf16>,
    %83 = vector.extract_strided_slice %7 {offsets = [0, 24], sizes = [64, 8], strides = [1, 1]} : vector<64x96xbf16> to vector<64x8xbf16>
    %84 = vector.shape_cast %83 : vector<64x8xbf16> to vector<2x32x8xbf16>
    %85 = vector.extract_strided_slice %7 {offsets = [0, 56], sizes = [64, 8], strides = [1, 1]} : vector<64x96xbf16> to vector<64x8xbf16>
    %86 = vector.shape_cast %85 : vector<64x8xbf16> to vector<2x32x8xbf16>
    %87 = vector.extract_strided_slice %7 {offsets = [0, 88], sizes = [64, 8], strides = [1, 1]} : vector<64x96xbf16> to vector<64x8xbf16>
    %88 = vector.shape_cast %87 : vector<64x8xbf16> to vector<2x32x8xbf16>
    "tpu.trace_start"() <{level = 10 : i32, message = "bnd,bmd->bnm"}> : () -> ()
    %cst_31 = arith.constant dense<0.000000e+00> : vector<2x32x32xf32>
    %89 = tpu.matmul %84, %86, %cst_31 {dimension_numbers = #tpu.dot_dimension_numbers<[2], [2], [1], [1], [0, 0, 0, 1, 1, 1], [0], [0]>} : vector<2x32x8xbf16>, vector<2x32x8xbf16>, vector<2x32x32xf32> -> vector<2x32x32xf32>
    "tpu.trace_stop"() : () -> ()
    %c3 = arith.constant 3 : index
    %c0_32 = arith.constant 0 : index
    %c0_33 = arith.constant 0 : index
    %c0_34 = arith.constant 0 : index
    %90 = vector.load %arg6[%c3, %c0_32, %c0_33, %c0_34] : memref<4x2x32x32xf32, #tpu.memory_space<vmem>>, vector<1x2x32x32xf32>
    %91 = vector.shape_cast %90 : vector<1x2x32x32xf32> to vector<2x32x32xf32>
    %92 = arith.addf %89, %91 : vector<2x32x32xf32>
    %cst_35 = arith.constant dense<0xFF800000> : vector<2x32xf32>
    %93 = vector.multi_reduction <maximumf>, %92, %cst_35 [2] : vector<2x32x32xf32> to vector<2x32xf32>
    %94 = vector.shape_cast %93 : vector<2x32xf32> to vector<2x32x1xf32>
    %95 = vector.broadcast %94 : vector<2x32x1xf32> to vector<2x32x32xf32>
    %96 = arith.subf %92, %95 : vector<2x32x32xf32>
    %97 = math.exp %96 : vector<2x32x32xf32>
    %cst_36 = arith.constant dense<0.000000e+00> : vector<2x32xf32>
    %98 = vector.multi_reduction <add>, %97, %cst_36 [2] : vector<2x32x32xf32> to vector<2x32xf32>
    %99 = vector.shape_cast %98 : vector<2x32xf32> to vector<2x32x1xf32>
    %100 = tpu.reciprocal %99 {approx = true} : vector<2x32x1xf32> -> vector<2x32x1xf32>
    %101 = vector.broadcast %100 : vector<2x32x1xf32> to vector<2x32x32xf32>
    %102 = arith.mulf %97, %101 : vector<2x32x32xf32>
    %103 = arith.truncf %102 : vector<2x32x32xf32> to vector<2x32x32xbf16>
    "tpu.trace_start"() <{level = 10 : i32, message = "bnm,bmd->bnd"}> : () -> ()
    %cst_37 = arith.constant dense<0.000000e+00> : vector<2x32x8xf32>
    %104 = tpu.matmul %103, %88, %cst_37 {dimension_numbers = #tpu.dot_dimension_numbers<[2], [1], [1], [2], [0, 0, 0, 1, 1, 2], [0], [0]>} : vector<2x32x32xbf16>, vector<2x32x8xbf16>, vector<2x32x8xf32> -> vector<2x32x8xf32>
    "tpu.trace_stop"() : () -> ()
    %105 = vector.shape_cast %104 : vector<2x32x8xf32> to vector<64x8xf32>
    %106 = arith.truncf %105 : vector<64x8xf32> to vector<64x8xbf16>
    %c0_38 = arith.constant 0 : index
    %c24 = arith.constant 24 : index
    %107 = vector.load %arg8[%c0_38, %c24] : memref<64x32xbf16, #tpu.memory_space<vmem>>, vector<64x8xbf16>
    tpu.vector_store %arg8[%c0_38, %c24], %106 {strides = array<i32>} : memref<64x32xbf16, #tpu.memory_space<vmem>>, vector<64x8xbf16>,
    %c0_39 = arith.constant 0 : index
    %c0_40 = arith.constant 0 : index
    %108 = vector.load %arg8[%c0_39, %c0_40] : memref<64x32xbf16, #tpu.memory_space<vmem>>, vector<64x32xbf16>
    %c0_41 = arith.constant 0 : index
    %c0_42 = arith.constant 0 : index
    %109 = vector.load %arg4[%c0_41, %c0_42] : memref<32x32xbf16, #tpu.memory_space<vmem>>, vector<32x32xbf16>
    %cst_43 = arith.constant dense<0.000000e+00> : vector<64x32xf32>
    %110 = tpu.matmul %108, %109, %cst_43 {dimension_numbers = #tpu.dot_dimension_numbers<[1], [0], [0], [1], [0, 0, 1, 1], [], []>} : vector<64x32xbf16>, vector<32x32xbf16>, vector<64x32xf32> -> vector<64x32xf32>
    %c0_44 = arith.constant 0 : index
    %c0_45 = arith.constant 0 : index
    %111 = vector.load %arg5[%c0_44, %c0_45] : memref<1x32xf32, #tpu.memory_space<vmem>>, vector<1x32xf32>
    %112 = vector.broadcast %111 : vector<1x32xf32> to vector<64x32xf32>
    %113 = arith.addf %110, %112 : vector<64x32xf32>
    %114 = vector.shape_cast %113 : vector<64x32xf32> to vector<16x128xf32>
    %c0_46 = arith.constant 0 : index
    %c0_47 = arith.constant 0 : index
    %115 = vector.load %arg7[%c0_46, %c0_47] : memref<16x128xf32, #tpu.memory_space<vmem>>, vector<16x128xf32>
    tpu.vector_store %arg7[%c0_46, %c0_47], %114 {strides = array<i32>} : memref<16x128xf32, #tpu.memory_space<vmem>>, vector<16x128xf32>,
    return
  }
  func.func @transform_0(%arg0: i32) -> (i32, i32) {
    %c0_i32 = arith.constant 0 : i32
    %c0_i32_0 = arith.constant 0 : i32
    return %arg0, %c0_i32 : i32, i32
  }
  func.func @transform_1(%arg0: i32) -> (i32, i32) {
    %c0_i32 = arith.constant 0 : i32
    %c0_i32_0 = arith.constant 0 : i32
    %c0_i32_1 = arith.constant 0 : i32
    return %c0_i32, %c0_i32_0 : i32, i32
  }
  func.func @transform_2(%arg0: i32) -> (i32, i32) {
    %c0_i32 = arith.constant 0 : i32
    %c0_i32_0 = arith.constant 0 : i32
    %c0_i32_1 = arith.constant 0 : i32
    return %c0_i32, %c0_i32_0 : i32, i32
  }
  func.func @transform_3(%arg0: i32) -> (i32, i32) {
    %c0_i32 = arith.constant 0 : i32
    %c0_i32_0 = arith.constant 0 : i32
    %c0_i32_1 = arith.constant 0 : i32
    return %c0_i32, %c0_i32_0 : i32, i32
  }
  func.func @transform_4(%arg0: i32) -> (i32, i32) {
    %c0_i32 = arith.constant 0 : i32
    %c0_i32_0 = arith.constant 0 : i32
    %c0_i32_1 = arith.constant 0 : i32
    return %c0_i32, %c0_i32_0 : i32, i32
  }
  func.func @transform_5(%arg0: i32) -> (i32, i32, i32, i32) {
    %c0_i32 = arith.constant 0 : i32
    %c0_i32_0 = arith.constant 0 : i32
    %c0_i32_1 = arith.constant 0 : i32
    %c0_i32_2 = arith.constant 0 : i32
    %c0_i32_3 = arith.constant 0 : i32
    return %c0_i32, %c0_i32_0, %c0_i32_1, %c0_i32_2 : i32, i32, i32, i32
  }
  func.func @transform_6(%arg0: i32) -> (i32, i32) {
    %c0_i32 = arith.constant 0 : i32
    %c0_i32_0 = arith.constant 0 : i32
    return %arg0, %c0_i32 : i32, i32
  }
}

module attributes {stable_mosaic.version = 11 : i64} {
  func.func @_window_attention_kernel(%arg0: i32, %arg1: memref<64x32xf32, #tpu.memory_space<vmem>>, %arg2: memref<32x96xbf16, #tpu.memory_space<vmem>>, %arg3: memref<1x96xf32, #tpu.memory_space<vmem>>, %arg4: memref<32x32xbf16, #tpu.memory_space<vmem>>, %arg5: memref<1x32xf32, #tpu.memory_space<vmem>>, %arg6: memref<4x2x32x32xf32, #tpu.memory_space<vmem>>, %arg7: memref<64x32xf32, #tpu.memory_space<vmem>>, %arg8: memref<64x32xbf16, #tpu.memory_space<vmem>>) attributes {dimension_semantics = [#tpu.dimension_semantics<parallel>], iteration_bounds = array<i64: 2>, scalar_prefetch = 0 : i64, scratch_operands = 1 : i64, tpu.core_type = #tpu.core_type<tc>, window_params = [{transform_indices = @transform_0, window_bounds = array<i64: 64, 32>}, {pipeline_mode = #tpu.pipeline_mode<synchronous>, transform_indices = @transform_1, window_bounds = array<i64: 32, 96>}, {pipeline_mode = #tpu.pipeline_mode<synchronous>, transform_indices = @transform_2, window_bounds = array<i64: 1, 96>}, {pipeline_mode = #tpu.pipeline_mode<synchronous>, transform_indices = @transform_3, window_bounds = array<i64: 32, 32>}, {pipeline_mode = #tpu.pipeline_mode<synchronous>, transform_indices = @transform_4, window_bounds = array<i64: 1, 32>}, {pipeline_mode = #tpu.pipeline_mode<synchronous>, transform_indices = @transform_5, window_bounds = array<i64: 4, 2, 32, 32>}, {transform_indices = @transform_6, window_bounds = array<i64: 64, 32>}]} {
    %c0 = arith.constant 0 : index
    %c0_0 = arith.constant 0 : index
    %0 = vector.load %arg1[%c0, %c0_0] : memref<64x32xf32, #tpu.memory_space<vmem>>, vector<64x32xf32>
    %1 = arith.truncf %0 : vector<64x32xf32> to vector<64x32xbf16>
    %c0_1 = arith.constant 0 : index
    %c0_2 = arith.constant 0 : index
    %2 = vector.load %arg2[%c0_1, %c0_2] : memref<32x96xbf16, #tpu.memory_space<vmem>>, vector<32x96xbf16>
    %cst = arith.constant dense<0.000000e+00> : vector<64x96xf32>
    %3 = tpu.matmul %1, %2, %cst {dimension_numbers = #tpu.dot_dimension_numbers<[1], [0], [0], [1], [0, 0, 1, 1], [], []>} : vector<64x32xbf16>, vector<32x96xbf16>, vector<64x96xf32> -> vector<64x96xf32>
    %c0_3 = arith.constant 0 : index
    %c0_4 = arith.constant 0 : index
    %4 = vector.load %arg3[%c0_3, %c0_4] : memref<1x96xf32, #tpu.memory_space<vmem>>, vector<1x96xf32>
    %5 = vector.broadcast %4 : vector<1x96xf32> to vector<64x96xf32>
    %6 = arith.addf %3, %5 : vector<64x96xf32>
    %7 = arith.truncf %6 : vector<64x96xf32> to vector<64x96xbf16>
    %8 = vector.extract_strided_slice %7 {offsets = [0, 0], sizes = [64, 8], strides = [1, 1]} : vector<64x96xbf16> to vector<64x8xbf16>
    %9 = vector.shape_cast %8 : vector<64x8xbf16> to vector<2x32x8xbf16>
    %10 = vector.extract_strided_slice %7 {offsets = [0, 32], sizes = [64, 8], strides = [1, 1]} : vector<64x96xbf16> to vector<64x8xbf16>
    %11 = vector.shape_cast %10 : vector<64x8xbf16> to vector<2x32x8xbf16>
    %12 = vector.extract_strided_slice %7 {offsets = [0, 64], sizes = [64, 8], strides = [1, 1]} : vector<64x96xbf16> to vector<64x8xbf16>
    %13 = vector.shape_cast %12 : vector<64x8xbf16> to vector<2x32x8xbf16>
    "tpu.trace_start"() <{level = 10 : i32, message = "bnd,bmd->bnm"}> : () -> ()
    %cst_5 = arith.constant dense<0.000000e+00> : vector<2x32x32xf32>
    %14 = tpu.matmul %9, %11, %cst_5 {dimension_numbers = #tpu.dot_dimension_numbers<[2], [2], [1], [1], [0, 0, 0, 1, 1, 1], [0], [0]>} : vector<2x32x8xbf16>, vector<2x32x8xbf16>, vector<2x32x32xf32> -> vector<2x32x32xf32>
    "tpu.trace_stop"() : () -> ()
    %c0_6 = arith.constant 0 : index
    %c0_7 = arith.constant 0 : index
    %c0_8 = arith.constant 0 : index
    %c0_9 = arith.constant 0 : index
    %15 = vector.load %arg6[%c0_6, %c0_7, %c0_8, %c0_9] : memref<4x2x32x32xf32, #tpu.memory_space<vmem>>, vector<1x2x32x32xf32>
    %16 = vector.shape_cast %15 : vector<1x2x32x32xf32> to vector<2x32x32xf32>
    %17 = arith.addf %14, %16 : vector<2x32x32xf32>
    %cst_10 = arith.constant dense<0xFF800000> : vector<2x32xf32>
    %18 = vector.multi_reduction <maximumf>, %17, %cst_10 [2] : vector<2x32x32xf32> to vector<2x32xf32>
    %19 = vector.shape_cast %18 : vector<2x32xf32> to vector<2x32x1xf32>
    %20 = vector.broadcast %19 : vector<2x32x1xf32> to vector<2x32x32xf32>
    %21 = arith.subf %17, %20 : vector<2x32x32xf32>
    %22 = math.exp %21 : vector<2x32x32xf32>
    %cst_11 = arith.constant dense<0.000000e+00> : vector<2x32xf32>
    %23 = vector.multi_reduction <add>, %22, %cst_11 [2] : vector<2x32x32xf32> to vector<2x32xf32>
    %24 = vector.shape_cast %23 : vector<2x32xf32> to vector<2x32x1xf32>
    %25 = tpu.reciprocal %24 {approx = true} : vector<2x32x1xf32> -> vector<2x32x1xf32>
    %26 = vector.broadcast %25 : vector<2x32x1xf32> to vector<2x32x32xf32>
    %27 = arith.mulf %22, %26 : vector<2x32x32xf32>
    %28 = arith.truncf %27 : vector<2x32x32xf32> to vector<2x32x32xbf16>
    "tpu.trace_start"() <{level = 10 : i32, message = "bnm,bmd->bnd"}> : () -> ()
    %cst_12 = arith.constant dense<0.000000e+00> : vector<2x32x8xf32>
    %29 = tpu.matmul %28, %13, %cst_12 {dimension_numbers = #tpu.dot_dimension_numbers<[2], [1], [1], [2], [0, 0, 0, 1, 1, 2], [0], [0]>} : vector<2x32x32xbf16>, vector<2x32x8xbf16>, vector<2x32x8xf32> -> vector<2x32x8xf32>
    "tpu.trace_stop"() : () -> ()
    %30 = vector.shape_cast %29 : vector<2x32x8xf32> to vector<64x8xf32>
    %31 = arith.truncf %30 : vector<64x8xf32> to vector<64x8xbf16>
    %c0_13 = arith.constant 0 : index
    %c0_14 = arith.constant 0 : index
    %32 = vector.load %arg8[%c0_13, %c0_14] : memref<64x32xbf16, #tpu.memory_space<vmem>>, vector<64x8xbf16>
    tpu.vector_store %arg8[%c0_13, %c0_14], %31 {strides = array<i32>} : memref<64x32xbf16, #tpu.memory_space<vmem>>, vector<64x8xbf16>,
    %33 = vector.extract_strided_slice %7 {offsets = [0, 8], sizes = [64, 8], strides = [1, 1]} : vector<64x96xbf16> to vector<64x8xbf16>
    %34 = vector.shape_cast %33 : vector<64x8xbf16> to vector<2x32x8xbf16>
    %35 = vector.extract_strided_slice %7 {offsets = [0, 40], sizes = [64, 8], strides = [1, 1]} : vector<64x96xbf16> to vector<64x8xbf16>
    %36 = vector.shape_cast %35 : vector<64x8xbf16> to vector<2x32x8xbf16>
    %37 = vector.extract_strided_slice %7 {offsets = [0, 72], sizes = [64, 8], strides = [1, 1]} : vector<64x96xbf16> to vector<64x8xbf16>
    %38 = vector.shape_cast %37 : vector<64x8xbf16> to vector<2x32x8xbf16>
    "tpu.trace_start"() <{level = 10 : i32, message = "bnd,bmd->bnm"}> : () -> ()
    %cst_15 = arith.constant dense<0.000000e+00> : vector<2x32x32xf32>
    %39 = tpu.matmul %34, %36, %cst_15 {dimension_numbers = #tpu.dot_dimension_numbers<[2], [2], [1], [1], [0, 0, 0, 1, 1, 1], [0], [0]>} : vector<2x32x8xbf16>, vector<2x32x8xbf16>, vector<2x32x32xf32> -> vector<2x32x32xf32>
    "tpu.trace_stop"() : () -> ()
    %c1 = arith.constant 1 : index
    %c0_16 = arith.constant 0 : index
    %c0_17 = arith.constant 0 : index
    %c0_18 = arith.constant 0 : index
    %40 = vector.load %arg6[%c1, %c0_16, %c0_17, %c0_18] : memref<4x2x32x32xf32, #tpu.memory_space<vmem>>, vector<1x2x32x32xf32>
    %41 = vector.shape_cast %40 : vector<1x2x32x32xf32> to vector<2x32x32xf32>
    %42 = arith.addf %39, %41 : vector<2x32x32xf32>
    %cst_19 = arith.constant dense<0xFF800000> : vector<2x32xf32>
    %43 = vector.multi_reduction <maximumf>, %42, %cst_19 [2] : vector<2x32x32xf32> to vector<2x32xf32>
    %44 = vector.shape_cast %43 : vector<2x32xf32> to vector<2x32x1xf32>
    %45 = vector.broadcast %44 : vector<2x32x1xf32> to vector<2x32x32xf32>
    %46 = arith.subf %42, %45 : vector<2x32x32xf32>
    %47 = math.exp %46 : vector<2x32x32xf32>
    %cst_20 = arith.constant dense<0.000000e+00> : vector<2x32xf32>
    %48 = vector.multi_reduction <add>, %47, %cst_20 [2] : vector<2x32x32xf32> to vector<2x32xf32>
    %49 = vector.shape_cast %48 : vector<2x32xf32> to vector<2x32x1xf32>
    %50 = tpu.reciprocal %49 {approx = true} : vector<2x32x1xf32> -> vector<2x32x1xf32>
    %51 = vector.broadcast %50 : vector<2x32x1xf32> to vector<2x32x32xf32>
    %52 = arith.mulf %47, %51 : vector<2x32x32xf32>
    %53 = arith.truncf %52 : vector<2x32x32xf32> to vector<2x32x32xbf16>
    "tpu.trace_start"() <{level = 10 : i32, message = "bnm,bmd->bnd"}> : () -> ()
    %cst_21 = arith.constant dense<0.000000e+00> : vector<2x32x8xf32>
    %54 = tpu.matmul %53, %38, %cst_21 {dimension_numbers = #tpu.dot_dimension_numbers<[2], [1], [1], [2], [0, 0, 0, 1, 1, 2], [0], [0]>} : vector<2x32x32xbf16>, vector<2x32x8xbf16>, vector<2x32x8xf32> -> vector<2x32x8xf32>
    "tpu.trace_stop"() : () -> ()
    %55 = vector.shape_cast %54 : vector<2x32x8xf32> to vector<64x8xf32>
    %56 = arith.truncf %55 : vector<64x8xf32> to vector<64x8xbf16>
    %c0_22 = arith.constant 0 : index
    %c8 = arith.constant 8 : index
    %57 = vector.load %arg8[%c0_22, %c8] : memref<64x32xbf16, #tpu.memory_space<vmem>>, vector<64x8xbf16>
    tpu.vector_store %arg8[%c0_22, %c8], %56 {strides = array<i32>} : memref<64x32xbf16, #tpu.memory_space<vmem>>, vector<64x8xbf16>,
    %58 = vector.extract_strided_slice %7 {offsets = [0, 16], sizes = [64, 8], strides = [1, 1]} : vector<64x96xbf16> to vector<64x8xbf16>
    %59 = vector.shape_cast %58 : vector<64x8xbf16> to vector<2x32x8xbf16>
    %60 = vector.extract_strided_slice %7 {offsets = [0, 48], sizes = [64, 8], strides = [1, 1]} : vector<64x96xbf16> to vector<64x8xbf16>
    %61 = vector.shape_cast %60 : vector<64x8xbf16> to vector<2x32x8xbf16>
    %62 = vector.extract_strided_slice %7 {offsets = [0, 80], sizes = [64, 8], strides = [1, 1]} : vector<64x96xbf16> to vector<64x8xbf16>
    %63 = vector.shape_cast %62 : vector<64x8xbf16> to vector<2x32x8xbf16>
    "tpu.trace_start"() <{level = 10 : i32, message = "bnd,bmd->bnm"}> : () -> ()
    %cst_23 = arith.constant dense<0.000000e+00> : vector<2x32x32xf32>
    %64 = tpu.matmul %59, %61, %cst_23 {dimension_numbers = #tpu.dot_dimension_numbers<[2], [2], [1], [1], [0, 0, 0, 1, 1, 1], [0], [0]>} : vector<2x32x8xbf16>, vector<2x32x8xbf16>, vector<2x32x32xf32> -> vector<2x32x32xf32>
    "tpu.trace_stop"() : () -> ()
    %c2 = arith.constant 2 : index
    %c0_24 = arith.constant 0 : index
    %c0_25 = arith.constant 0 : index
    %c0_26 = arith.constant 0 : index
    %65 = vector.load %arg6[%c2, %c0_24, %c0_25, %c0_26] : memref<4x2x32x32xf32, #tpu.memory_space<vmem>>, vector<1x2x32x32xf32>
    %66 = vector.shape_cast %65 : vector<1x2x32x32xf32> to vector<2x32x32xf32>
    %67 = arith.addf %64, %66 : vector<2x32x32xf32>
    %cst_27 = arith.constant dense<0xFF800000> : vector<2x32xf32>
    %68 = vector.multi_reduction <maximumf>, %67, %cst_27 [2] : vector<2x32x32xf32> to vector<2x32xf32>
    %69 = vector.shape_cast %68 : vector<2x32xf32> to vector<2x32x1xf32>
    %70 = vector.broadcast %69 : vector<2x32x1xf32> to vector<2x32x32xf32>
    %71 = arith.subf %67, %70 : vector<2x32x32xf32>
    %72 = math.exp %71 : vector<2x32x32xf32>
    %cst_28 = arith.constant dense<0.000000e+00> : vector<2x32xf32>
    %73 = vector.multi_reduction <add>, %72, %cst_28 [2] : vector<2x32x32xf32> to vector<2x32xf32>
    %74 = vector.shape_cast %73 : vector<2x32xf32> to vector<2x32x1xf32>
    %75 = tpu.reciprocal %74 {approx = true} : vector<2x32x1xf32> -> vector<2x32x1xf32>
    %76 = vector.broadcast %75 : vector<2x32x1xf32> to vector<2x32x32xf32>
    %77 = arith.mulf %72, %76 : vector<2x32x32xf32>
    %78 = arith.truncf %77 : vector<2x32x32xf32> to vector<2x32x32xbf16>
    "tpu.trace_start"() <{level = 10 : i32, message = "bnm,bmd->bnd"}> : () -> ()
    %cst_29 = arith.constant dense<0.000000e+00> : vector<2x32x8xf32>
    %79 = tpu.matmul %78, %63, %cst_29 {dimension_numbers = #tpu.dot_dimension_numbers<[2], [1], [1], [2], [0, 0, 0, 1, 1, 2], [0], [0]>} : vector<2x32x32xbf16>, vector<2x32x8xbf16>, vector<2x32x8xf32> -> vector<2x32x8xf32>
    "tpu.trace_stop"() : () -> ()
    %80 = vector.shape_cast %79 : vector<2x32x8xf32> to vector<64x8xf32>
    %81 = arith.truncf %80 : vector<64x8xf32> to vector<64x8xbf16>
    %c0_30 = arith.constant 0 : index
    %c16 = arith.constant 16 : index
    %82 = vector.load %arg8[%c0_30, %c16] : memref<64x32xbf16, #tpu.memory_space<vmem>>, vector<64x8xbf16>
    tpu.vector_store %arg8[%c0_30, %c16], %81 {strides = array<i32>} : memref<64x32xbf16, #tpu.memory_space<vmem>>, vector<64x8xbf16>,
    %83 = vector.extract_strided_slice %7 {offsets = [0, 24], sizes = [64, 8], strides = [1, 1]} : vector<64x96xbf16> to vector<64x8xbf16>
    %84 = vector.shape_cast %83 : vector<64x8xbf16> to vector<2x32x8xbf16>
    %85 = vector.extract_strided_slice %7 {offsets = [0, 56], sizes = [64, 8], strides = [1, 1]} : vector<64x96xbf16> to vector<64x8xbf16>
    %86 = vector.shape_cast %85 : vector<64x8xbf16> to vector<2x32x8xbf16>
    %87 = vector.extract_strided_slice %7 {offsets = [0, 88], sizes = [64, 8], strides = [1, 1]} : vector<64x96xbf16> to vector<64x8xbf16>
    %88 = vector.shape_cast %87 : vector<64x8xbf16> to vector<2x32x8xbf16>
    "tpu.trace_start"() <{level = 10 : i32, message = "bnd,bmd->bnm"}> : () -> ()
    %cst_31 = arith.constant dense<0.000000e+00> : vector<2x32x32xf32>
    %89 = tpu.matmul %84, %86, %cst_31 {dimension_numbers = #tpu.dot_dimension_numbers<[2], [2], [1], [1], [0, 0, 0, 1, 1, 1], [0], [0]>} : vector<2x32x8xbf16>, vector<2x32x8xbf16>, vector<2x32x32xf32> -> vector<2x32x32xf32>
    "tpu.trace_stop"() : () -> ()
    %c3 = arith.constant 3 : index
    %c0_32 = arith.constant 0 : index
    %c0_33 = arith.constant 0 : index
    %c0_34 = arith.constant 0 : index
    %90 = vector.load %arg6[%c3, %c0_32, %c0_33, %c0_34] : memref<4x2x32x32xf32, #tpu.memory_space<vmem>>, vector<1x2x32x32xf32>
    %91 = vector.shape_cast %90 : vector<1x2x32x32xf32> to vector<2x32x32xf32>
    %92 = arith.addf %89, %91 : vector<2x32x32xf32>
    %cst_35 = arith.constant dense<0xFF800000> : vector<2x32xf32>
    %93 = vector.multi_reduction <maximumf>, %92, %cst_35 [2] : vector<2x32x32xf32> to vector<2x32xf32>
    %94 = vector.shape_cast %93 : vector<2x32xf32> to vector<2x32x1xf32>
    %95 = vector.broadcast %94 : vector<2x32x1xf32> to vector<2x32x32xf32>
    %96 = arith.subf %92, %95 : vector<2x32x32xf32>
    %97 = math.exp %96 : vector<2x32x32xf32>
    %cst_36 = arith.constant dense<0.000000e+00> : vector<2x32xf32>
    %98 = vector.multi_reduction <add>, %97, %cst_36 [2] : vector<2x32x32xf32> to vector<2x32xf32>
    %99 = vector.shape_cast %98 : vector<2x32xf32> to vector<2x32x1xf32>
    %100 = tpu.reciprocal %99 {approx = true} : vector<2x32x1xf32> -> vector<2x32x1xf32>
    %101 = vector.broadcast %100 : vector<2x32x1xf32> to vector<2x32x32xf32>
    %102 = arith.mulf %97, %101 : vector<2x32x32xf32>
    %103 = arith.truncf %102 : vector<2x32x32xf32> to vector<2x32x32xbf16>
    "tpu.trace_start"() <{level = 10 : i32, message = "bnm,bmd->bnd"}> : () -> ()
    %cst_37 = arith.constant dense<0.000000e+00> : vector<2x32x8xf32>
    %104 = tpu.matmul %103, %88, %cst_37 {dimension_numbers = #tpu.dot_dimension_numbers<[2], [1], [1], [2], [0, 0, 0, 1, 1, 2], [0], [0]>} : vector<2x32x32xbf16>, vector<2x32x8xbf16>, vector<2x32x8xf32> -> vector<2x32x8xf32>
    "tpu.trace_stop"() : () -> ()
    %105 = vector.shape_cast %104 : vector<2x32x8xf32> to vector<64x8xf32>
    %106 = arith.truncf %105 : vector<64x8xf32> to vector<64x8xbf16>
    %c0_38 = arith.constant 0 : index
    %c24 = arith.constant 24 : index
    %107 = vector.load %arg8[%c0_38, %c24] : memref<64x32xbf16, #tpu.memory_space<vmem>>, vector<64x8xbf16>
    tpu.vector_store %arg8[%c0_38, %c24], %106 {strides = array<i32>} : memref<64x32xbf16, #tpu.memory_space<vmem>>, vector<64x8xbf16>,
    %c0_39 = arith.constant 0 : index
    %c0_40 = arith.constant 0 : index
    %108 = vector.load %arg8[%c0_39, %c0_40] : memref<64x32xbf16, #tpu.memory_space<vmem>>, vector<64x32xbf16>
    %c0_41 = arith.constant 0 : index
    %c0_42 = arith.constant 0 : index
    %109 = vector.load %arg4[%c0_41, %c0_42] : memref<32x32xbf16, #tpu.memory_space<vmem>>, vector<32x32xbf16>
    %cst_43 = arith.constant dense<0.000000e+00> : vector<64x32xf32>
    %110 = tpu.matmul %108, %109, %cst_43 {dimension_numbers = #tpu.dot_dimension_numbers<[1], [0], [0], [1], [0, 0, 1, 1], [], []>} : vector<64x32xbf16>, vector<32x32xbf16>, vector<64x32xf32> -> vector<64x32xf32>
    %c0_44 = arith.constant 0 : index
    %c0_45 = arith.constant 0 : index
    %111 = vector.load %arg5[%c0_44, %c0_45] : memref<1x32xf32, #tpu.memory_space<vmem>>, vector<1x32xf32>
    %112 = vector.broadcast %111 : vector<1x32xf32> to vector<64x32xf32>
    %113 = arith.addf %110, %112 : vector<64x32xf32>
    %c0_46 = arith.constant 0 : index
    %c0_47 = arith.constant 0 : index
    %114 = vector.load %arg7[%c0_46, %c0_47] : memref<64x32xf32, #tpu.memory_space<vmem>>, vector<64x32xf32>
    tpu.vector_store %arg7[%c0_46, %c0_47], %113 {strides = array<i32>} : memref<64x32xf32, #tpu.memory_space<vmem>>, vector<64x32xf32>,
    return
  }
  func.func @transform_0(%arg0: i32) -> (i32, i32) {
    %c0_i32 = arith.constant 0 : i32
    %c0_i32_0 = arith.constant 0 : i32
    return %arg0, %c0_i32 : i32, i32
  }
  func.func @transform_1(%arg0: i32) -> (i32, i32) {
    %c0_i32 = arith.constant 0 : i32
    %c0_i32_0 = arith.constant 0 : i32
    %c0_i32_1 = arith.constant 0 : i32
    return %c0_i32, %c0_i32_0 : i32, i32
  }
  func.func @transform_2(%arg0: i32) -> (i32, i32) {
    %c0_i32 = arith.constant 0 : i32
    %c0_i32_0 = arith.constant 0 : i32
    %c0_i32_1 = arith.constant 0 : i32
    return %c0_i32, %c0_i32_0 : i32, i32
  }
  func.func @transform_3(%arg0: i32) -> (i32, i32) {
    %c0_i32 = arith.constant 0 : i32
    %c0_i32_0 = arith.constant 0 : i32
    %c0_i32_1 = arith.constant 0 : i32
    return %c0_i32, %c0_i32_0 : i32, i32
  }
  func.func @transform_4(%arg0: i32) -> (i32, i32) {
    %c0_i32 = arith.constant 0 : i32
    %c0_i32_0 = arith.constant 0 : i32
    %c0_i32_1 = arith.constant 0 : i32
    return %c0_i32, %c0_i32_0 : i32, i32
  }
  func.func @transform_5(%arg0: i32) -> (i32, i32, i32, i32) {
    %c0_i32 = arith.constant 0 : i32
    %c0_i32_0 = arith.constant 0 : i32
    %c0_i32_1 = arith.constant 0 : i32
    %c0_i32_2 = arith.constant 0 : i32
    %c0_i32_3 = arith.constant 0 : i32
    return %c0_i32, %c0_i32_0, %c0_i32_1, %c0_i32_2 : i32, i32, i32, i32
  }
  func.func @transform_6(%arg0: i32) -> (i32, i32) {
    %c0_i32 = arith.constant 0 : i32
    %c0_i32_0 = arith.constant 0 : i32
    return %arg0, %c0_i32 : i32, i32
  }
}

module attributes {stable_mosaic.version = 11 : i64} {
  func.func @_window_attention_kernel(%arg0: i32, %arg1: memref<64x32xf32, #tpu.memory_space<vmem>>, %arg2: memref<32x96xbf16, #tpu.memory_space<vmem>>, %arg3: memref<1x96xf32, #tpu.memory_space<vmem>>, %arg4: memref<32x32xbf16, #tpu.memory_space<vmem>>, %arg5: memref<1x32xf32, #tpu.memory_space<vmem>>, %arg6: memref<4x2x32x32xf32, #tpu.memory_space<vmem>>, %arg7: memref<64x32xf32, #tpu.memory_space<vmem>>, %arg8: memref<64x32xbf16, #tpu.memory_space<vmem>>) attributes {dimension_semantics = [#tpu.dimension_semantics<parallel>], iteration_bounds = array<i64: 2>, scalar_prefetch = 0 : i64, scratch_operands = 1 : i64, tpu.core_type = #tpu.core_type<tc>, window_params = [{transform_indices = @transform_0, window_bounds = array<i64: 64, 32>}, {pipeline_mode = #tpu.pipeline_mode<synchronous>, transform_indices = @transform_1, window_bounds = array<i64: 32, 96>}, {pipeline_mode = #tpu.pipeline_mode<synchronous>, transform_indices = @transform_2, window_bounds = array<i64: 1, 96>}, {pipeline_mode = #tpu.pipeline_mode<synchronous>, transform_indices = @transform_3, window_bounds = array<i64: 32, 32>}, {pipeline_mode = #tpu.pipeline_mode<synchronous>, transform_indices = @transform_4, window_bounds = array<i64: 1, 32>}, {pipeline_mode = #tpu.pipeline_mode<synchronous>, transform_indices = @transform_5, window_bounds = array<i64: 4, 2, 32, 32>}, {transform_indices = @transform_6, window_bounds = array<i64: 64, 32>}]} {
    %c0 = arith.constant 0 : index
    %c0_0 = arith.constant 0 : index
    %0 = vector.load %arg1[%c0, %c0_0] : memref<64x32xf32, #tpu.memory_space<vmem>>, vector<64x32xf32>
    %1 = arith.truncf %0 : vector<64x32xf32> to vector<64x32xbf16>
    %c0_1 = arith.constant 0 : index
    %c0_2 = arith.constant 0 : index
    %2 = vector.load %arg2[%c0_1, %c0_2] : memref<32x96xbf16, #tpu.memory_space<vmem>>, vector<32x96xbf16>
    %cst = arith.constant dense<0.000000e+00> : vector<64x96xf32>
    %3 = tpu.matmul %1, %2, %cst {dimension_numbers = #tpu.dot_dimension_numbers<[1], [0], [0], [1], [0, 0, 1, 1], [], []>} : vector<64x32xbf16>, vector<32x96xbf16>, vector<64x96xf32> -> vector<64x96xf32>
    %c0_3 = arith.constant 0 : index
    %c0_4 = arith.constant 0 : index
    %4 = vector.load %arg3[%c0_3, %c0_4] : memref<1x96xf32, #tpu.memory_space<vmem>>, vector<1x96xf32>
    %5 = vector.broadcast %4 : vector<1x96xf32> to vector<64x96xf32>
    %6 = arith.addf %3, %5 : vector<64x96xf32>
    %7 = arith.truncf %6 : vector<64x96xf32> to vector<64x96xbf16>
    %8 = vector.extract_strided_slice %7 {offsets = [0, 0], sizes = [64, 8], strides = [1, 1]} : vector<64x96xbf16> to vector<64x8xbf16>
    %9 = vector.shape_cast %8 : vector<64x8xbf16> to vector<2x32x8xbf16>
    %10 = vector.extract_strided_slice %7 {offsets = [0, 32], sizes = [64, 8], strides = [1, 1]} : vector<64x96xbf16> to vector<64x8xbf16>
    %11 = vector.shape_cast %10 : vector<64x8xbf16> to vector<2x32x8xbf16>
    %12 = vector.extract_strided_slice %7 {offsets = [0, 64], sizes = [64, 8], strides = [1, 1]} : vector<64x96xbf16> to vector<64x8xbf16>
    %13 = vector.shape_cast %12 : vector<64x8xbf16> to vector<2x32x8xbf16>
    "tpu.trace_start"() <{level = 10 : i32, message = "bnd,bmd->bnm"}> : () -> ()
    %cst_5 = arith.constant dense<0.000000e+00> : vector<2x32x32xf32>
    %14 = tpu.matmul %9, %11, %cst_5 {dimension_numbers = #tpu.dot_dimension_numbers<[2], [2], [1], [1], [0, 0, 0, 1, 1, 1], [0], [0]>} : vector<2x32x8xbf16>, vector<2x32x8xbf16>, vector<2x32x32xf32> -> vector<2x32x32xf32>
    "tpu.trace_stop"() : () -> ()
    %c0_6 = arith.constant 0 : index
    %c0_7 = arith.constant 0 : index
    %c0_8 = arith.constant 0 : index
    %c0_9 = arith.constant 0 : index
    %15 = vector.load %arg6[%c0_6, %c0_7, %c0_8, %c0_9] : memref<4x2x32x32xf32, #tpu.memory_space<vmem>>, vector<1x2x32x32xf32>
    %16 = vector.shape_cast %15 : vector<1x2x32x32xf32> to vector<2x32x32xf32>
    %17 = arith.addf %14, %16 : vector<2x32x32xf32>
    %cst_10 = arith.constant dense<0xFF800000> : vector<2x32xf32>
    %18 = vector.multi_reduction <maximumf>, %17, %cst_10 [2] : vector<2x32x32xf32> to vector<2x32xf32>
    %19 = vector.shape_cast %18 : vector<2x32xf32> to vector<2x32x1xf32>
    %20 = vector.broadcast %19 : vector<2x32x1xf32> to vector<2x32x32xf32>
    %21 = arith.subf %17, %20 : vector<2x32x32xf32>
    %22 = math.exp %21 : vector<2x32x32xf32>
    %cst_11 = arith.constant dense<0.000000e+00> : vector<2x32xf32>
    %23 = vector.multi_reduction <add>, %22, %cst_11 [2] : vector<2x32x32xf32> to vector<2x32xf32>
    %24 = vector.shape_cast %23 : vector<2x32xf32> to vector<2x32x1xf32>
    %25 = tpu.reciprocal %24 {approx = true} : vector<2x32x1xf32> -> vector<2x32x1xf32>
    %26 = vector.broadcast %25 : vector<2x32x1xf32> to vector<2x32x32xf32>
    %27 = arith.mulf %22, %26 : vector<2x32x32xf32>
    %28 = arith.truncf %27 : vector<2x32x32xf32> to vector<2x32x32xbf16>
    "tpu.trace_start"() <{level = 10 : i32, message = "bnm,bmd->bnd"}> : () -> ()
    %cst_12 = arith.constant dense<0.000000e+00> : vector<2x32x8xf32>
    %29 = tpu.matmul %28, %13, %cst_12 {dimension_numbers = #tpu.dot_dimension_numbers<[2], [1], [1], [2], [0, 0, 0, 1, 1, 2], [0], [0]>} : vector<2x32x32xbf16>, vector<2x32x8xbf16>, vector<2x32x8xf32> -> vector<2x32x8xf32>
    "tpu.trace_stop"() : () -> ()
    %30 = vector.shape_cast %29 : vector<2x32x8xf32> to vector<64x8xf32>
    %31 = arith.truncf %30 : vector<64x8xf32> to vector<64x8xbf16>
    %c0_13 = arith.constant 0 : index
    %c0_14 = arith.constant 0 : index
    %32 = vector.load %arg8[%c0_13, %c0_14] : memref<64x32xbf16, #tpu.memory_space<vmem>>, vector<64x8xbf16>
    tpu.vector_store %arg8[%c0_13, %c0_14], %31 {strides = array<i32>} : memref<64x32xbf16, #tpu.memory_space<vmem>>, vector<64x8xbf16>,
    %33 = vector.extract_strided_slice %7 {offsets = [0, 8], sizes = [64, 8], strides = [1, 1]} : vector<64x96xbf16> to vector<64x8xbf16>
    %34 = vector.shape_cast %33 : vector<64x8xbf16> to vector<2x32x8xbf16>
    %35 = vector.extract_strided_slice %7 {offsets = [0, 40], sizes = [64, 8], strides = [1, 1]} : vector<64x96xbf16> to vector<64x8xbf16>
    %36 = vector.shape_cast %35 : vector<64x8xbf16> to vector<2x32x8xbf16>
    %37 = vector.extract_strided_slice %7 {offsets = [0, 72], sizes = [64, 8], strides = [1, 1]} : vector<64x96xbf16> to vector<64x8xbf16>
    %38 = vector.shape_cast %37 : vector<64x8xbf16> to vector<2x32x8xbf16>
    "tpu.trace_start"() <{level = 10 : i32, message = "bnd,bmd->bnm"}> : () -> ()
    %cst_15 = arith.constant dense<0.000000e+00> : vector<2x32x32xf32>
    %39 = tpu.matmul %34, %36, %cst_15 {dimension_numbers = #tpu.dot_dimension_numbers<[2], [2], [1], [1], [0, 0, 0, 1, 1, 1], [0], [0]>} : vector<2x32x8xbf16>, vector<2x32x8xbf16>, vector<2x32x32xf32> -> vector<2x32x32xf32>
    "tpu.trace_stop"() : () -> ()
    %c1 = arith.constant 1 : index
    %c0_16 = arith.constant 0 : index
    %c0_17 = arith.constant 0 : index
    %c0_18 = arith.constant 0 : index
    %40 = vector.load %arg6[%c1, %c0_16, %c0_17, %c0_18] : memref<4x2x32x32xf32, #tpu.memory_space<vmem>>, vector<1x2x32x32xf32>
    %41 = vector.shape_cast %40 : vector<1x2x32x32xf32> to vector<2x32x32xf32>
    %42 = arith.addf %39, %41 : vector<2x32x32xf32>
    %cst_19 = arith.constant dense<0xFF800000> : vector<2x32xf32>
    %43 = vector.multi_reduction <maximumf>, %42, %cst_19 [2] : vector<2x32x32xf32> to vector<2x32xf32>
    %44 = vector.shape_cast %43 : vector<2x32xf32> to vector<2x32x1xf32>
    %45 = vector.broadcast %44 : vector<2x32x1xf32> to vector<2x32x32xf32>
    %46 = arith.subf %42, %45 : vector<2x32x32xf32>
    %47 = math.exp %46 : vector<2x32x32xf32>
    %cst_20 = arith.constant dense<0.000000e+00> : vector<2x32xf32>
    %48 = vector.multi_reduction <add>, %47, %cst_20 [2] : vector<2x32x32xf32> to vector<2x32xf32>
    %49 = vector.shape_cast %48 : vector<2x32xf32> to vector<2x32x1xf32>
    %50 = tpu.reciprocal %49 {approx = true} : vector<2x32x1xf32> -> vector<2x32x1xf32>
    %51 = vector.broadcast %50 : vector<2x32x1xf32> to vector<2x32x32xf32>
    %52 = arith.mulf %47, %51 : vector<2x32x32xf32>
    %53 = arith.truncf %52 : vector<2x32x32xf32> to vector<2x32x32xbf16>
    "tpu.trace_start"() <{level = 10 : i32, message = "bnm,bmd->bnd"}> : () -> ()
    %cst_21 = arith.constant dense<0.000000e+00> : vector<2x32x8xf32>
    %54 = tpu.matmul %53, %38, %cst_21 {dimension_numbers = #tpu.dot_dimension_numbers<[2], [1], [1], [2], [0, 0, 0, 1, 1, 2], [0], [0]>} : vector<2x32x32xbf16>, vector<2x32x8xbf16>, vector<2x32x8xf32> -> vector<2x32x8xf32>
    "tpu.trace_stop"() : () -> ()
    %55 = vector.shape_cast %54 : vector<2x32x8xf32> to vector<64x8xf32>
    %56 = arith.truncf %55 : vector<64x8xf32> to vector<64x8xbf16>
    %c0_22 = arith.constant 0 : index
    %c8 = arith.constant 8 : index
    %57 = vector.load %arg8[%c0_22, %c8] : memref<64x32xbf16, #tpu.memory_space<vmem>>, vector<64x8xbf16>
    tpu.vector_store %arg8[%c0_22, %c8], %56 {strides = array<i32>} : memref<64x32xbf16, #tpu.memory_space<vmem>>, vector<64x8xbf16>,
    %58 = vector.extract_strided_slice %7 {offsets = [0, 16], sizes = [64, 8], strides = [1, 1]} : vector<64x96xbf16> to vector<64x8xbf16>
    %59 = vector.shape_cast %58 : vector<64x8xbf16> to vector<2x32x8xbf16>
    %60 = vector.extract_strided_slice %7 {offsets = [0, 48], sizes = [64, 8], strides = [1, 1]} : vector<64x96xbf16> to vector<64x8xbf16>
    %61 = vector.shape_cast %60 : vector<64x8xbf16> to vector<2x32x8xbf16>
    %62 = vector.extract_strided_slice %7 {offsets = [0, 80], sizes = [64, 8], strides = [1, 1]} : vector<64x96xbf16> to vector<64x8xbf16>
    %63 = vector.shape_cast %62 : vector<64x8xbf16> to vector<2x32x8xbf16>
    "tpu.trace_start"() <{level = 10 : i32, message = "bnd,bmd->bnm"}> : () -> ()
    %cst_23 = arith.constant dense<0.000000e+00> : vector<2x32x32xf32>
    %64 = tpu.matmul %59, %61, %cst_23 {dimension_numbers = #tpu.dot_dimension_numbers<[2], [2], [1], [1], [0, 0, 0, 1, 1, 1], [0], [0]>} : vector<2x32x8xbf16>, vector<2x32x8xbf16>, vector<2x32x32xf32> -> vector<2x32x32xf32>
    "tpu.trace_stop"() : () -> ()
    %c2 = arith.constant 2 : index
    %c0_24 = arith.constant 0 : index
    %c0_25 = arith.constant 0 : index
    %c0_26 = arith.constant 0 : index
    %65 = vector.load %arg6[%c2, %c0_24, %c0_25, %c0_26] : memref<4x2x32x32xf32, #tpu.memory_space<vmem>>, vector<1x2x32x32xf32>
    %66 = vector.shape_cast %65 : vector<1x2x32x32xf32> to vector<2x32x32xf32>
    %67 = arith.addf %64, %66 : vector<2x32x32xf32>
    %cst_27 = arith.constant dense<0xFF800000> : vector<2x32xf32>
    %68 = vector.multi_reduction <maximumf>, %67, %cst_27 [2] : vector<2x32x32xf32> to vector<2x32xf32>
    %69 = vector.shape_cast %68 : vector<2x32xf32> to vector<2x32x1xf32>
    %70 = vector.broadcast %69 : vector<2x32x1xf32> to vector<2x32x32xf32>
    %71 = arith.subf %67, %70 : vector<2x32x32xf32>
    %72 = math.exp %71 : vector<2x32x32xf32>
    %cst_28 = arith.constant dense<0.000000e+00> : vector<2x32xf32>
    %73 = vector.multi_reduction <add>, %72, %cst_28 [2] : vector<2x32x32xf32> to vector<2x32xf32>
    %74 = vector.shape_cast %73 : vector<2x32xf32> to vector<2x32x1xf32>
    %75 = tpu.reciprocal %74 {approx = true} : vector<2x32x1xf32> -> vector<2x32x1xf32>
    %76 = vector.broadcast %75 : vector<2x32x1xf32> to vector<2x32x32xf32>
    %77 = arith.mulf %72, %76 : vector<2x32x32xf32>
    %78 = arith.truncf %77 : vector<2x32x32xf32> to vector<2x32x32xbf16>
    "tpu.trace_start"() <{level = 10 : i32, message = "bnm,bmd->bnd"}> : () -> ()
    %cst_29 = arith.constant dense<0.000000e+00> : vector<2x32x8xf32>
    %79 = tpu.matmul %78, %63, %cst_29 {dimension_numbers = #tpu.dot_dimension_numbers<[2], [1], [1], [2], [0, 0, 0, 1, 1, 2], [0], [0]>} : vector<2x32x32xbf16>, vector<2x32x8xbf16>, vector<2x32x8xf32> -> vector<2x32x8xf32>
    "tpu.trace_stop"() : () -> ()
    %80 = vector.shape_cast %79 : vector<2x32x8xf32> to vector<64x8xf32>
    %81 = arith.truncf %80 : vector<64x8xf32> to vector<64x8xbf16>
    %c0_30 = arith.constant 0 : index
    %c16 = arith.constant 16 : index
    %82 = vector.load %arg8[%c0_30, %c16] : memref<64x32xbf16, #tpu.memory_space<vmem>>, vector<64x8xbf16>
    tpu.vector_store %arg8[%c0_30, %c16], %81 {strides = array<i32>} : memref<64x32xbf16, #tpu.memory_space<vmem>>, vector<64x8xbf16>,
    %83 = vector.extract_strided_slice %7 {offsets = [0, 24], sizes = [64, 8], strides = [1, 1]} : vector<64x96xbf16> to vector<64x8xbf16>
    %84 = vector.shape_cast %83 : vector<64x8xbf16> to vector<2x32x8xbf16>
    %85 = vector.extract_strided_slice %7 {offsets = [0, 56], sizes = [64, 8], strides = [1, 1]} : vector<64x96xbf16> to vector<64x8xbf16>
    %86 = vector.shape_cast %85 : vector<64x8xbf16> to vector<2x32x8xbf16>
    %87 = vector.extract_strided_slice %7 {offsets = [0, 88], sizes = [64, 8], strides = [1, 1]} : vector<64x96xbf16> to vector<64x8xbf16>
    %88 = vector.shape_cast %87 : vector<64x8xbf16> to vector<2x32x8xbf16>
    "tpu.trace_start"() <{level = 10 : i32, message = "bnd,bmd->bnm"}> : () -> ()
    %cst_31 = arith.constant dense<0.000000e+00> : vector<2x32x32xf32>
    %89 = tpu.matmul %84, %86, %cst_31 {dimension_numbers = #tpu.dot_dimension_numbers<[2], [2], [1], [1], [0, 0, 0, 1, 1, 1], [0], [0]>} : vector<2x32x8xbf16>, vector<2x32x8xbf16>, vector<2x32x32xf32> -> vector<2x32x32xf32>
    "tpu.trace_stop"() : () -> ()
    %c3 = arith.constant 3 : index
    %c0_32 = arith.constant 0 : index
    %c0_33 = arith.constant 0 : index
    %c0_34 = arith.constant 0 : index
    %90 = vector.load %arg6[%c3, %c0_32, %c0_33, %c0_34] : memref<4x2x32x32xf32, #tpu.memory_space<vmem>>, vector<1x2x32x32xf32>
    %91 = vector.shape_cast %90 : vector<1x2x32x32xf32> to vector<2x32x32xf32>
    %92 = arith.addf %89, %91 : vector<2x32x32xf32>
    %cst_35 = arith.constant dense<0xFF800000> : vector<2x32xf32>
    %93 = vector.multi_reduction <maximumf>, %92, %cst_35 [2] : vector<2x32x32xf32> to vector<2x32xf32>
    %94 = vector.shape_cast %93 : vector<2x32xf32> to vector<2x32x1xf32>
    %95 = vector.broadcast %94 : vector<2x32x1xf32> to vector<2x32x32xf32>
    %96 = arith.subf %92, %95 : vector<2x32x32xf32>
    %97 = math.exp %96 : vector<2x32x32xf32>
    %cst_36 = arith.constant dense<0.000000e+00> : vector<2x32xf32>
    %98 = vector.multi_reduction <add>, %97, %cst_36 [2] : vector<2x32x32xf32> to vector<2x32xf32>
    %99 = vector.shape_cast %98 : vector<2x32xf32> to vector<2x32x1xf32>
    %100 = tpu.reciprocal %99 {approx = true} : vector<2x32x1xf32> -> vector<2x32x1xf32>
    %101 = vector.broadcast %100 : vector<2x32x1xf32> to vector<2x32x32xf32>
    %102 = arith.mulf %97, %101 : vector<2x32x32xf32>
    %103 = arith.truncf %102 : vector<2x32x32xf32> to vector<2x32x32xbf16>
    "tpu.trace_start"() <{level = 10 : i32, message = "bnm,bmd->bnd"}> : () -> ()
    %cst_37 = arith.constant dense<0.000000e+00> : vector<2x32x8xf32>
    %104 = tpu.matmul %103, %88, %cst_37 {dimension_numbers = #tpu.dot_dimension_numbers<[2], [1], [1], [2], [0, 0, 0, 1, 1, 2], [0], [0]>} : vector<2x32x32xbf16>, vector<2x32x8xbf16>, vector<2x32x8xf32> -> vector<2x32x8xf32>
    "tpu.trace_stop"() : () -> ()
    %105 = vector.shape_cast %104 : vector<2x32x8xf32> to vector<64x8xf32>
    %106 = arith.truncf %105 : vector<64x8xf32> to vector<64x8xbf16>
    %c0_38 = arith.constant 0 : index
    %c24 = arith.constant 24 : index
    %107 = vector.load %arg8[%c0_38, %c24] : memref<64x32xbf16, #tpu.memory_space<vmem>>, vector<64x8xbf16>
    tpu.vector_store %arg8[%c0_38, %c24], %106 {strides = array<i32>} : memref<64x32xbf16, #tpu.memory_space<vmem>>, vector<64x8xbf16>,
    %c0_39 = arith.constant 0 : index
    %c0_40 = arith.constant 0 : index
    %108 = vector.load %arg8[%c0_39, %c0_40] : memref<64x32xbf16, #tpu.memory_space<vmem>>, vector<64x32xbf16>
    %c0_41 = arith.constant 0 : index
    %c0_42 = arith.constant 0 : index
    %109 = vector.load %arg4[%c0_41, %c0_42] : memref<32x32xbf16, #tpu.memory_space<vmem>>, vector<32x32xbf16>
    %cst_43 = arith.constant dense<0.000000e+00> : vector<64x32xf32>
    %110 = tpu.matmul %108, %109, %cst_43 {dimension_numbers = #tpu.dot_dimension_numbers<[1], [0], [0], [1], [0, 0, 1, 1], [], []>} : vector<64x32xbf16>, vector<32x32xbf16>, vector<64x32xf32> -> vector<64x32xf32>
    %c0_44 = arith.constant 0 : index
    %c0_45 = arith.constant 0 : index
    %111 = vector.load %arg5[%c0_44, %c0_45] : memref<1x32xf32, #tpu.memory_space<vmem>>, vector<1x32xf32>
    %112 = vector.broadcast %111 : vector<1x32xf32> to vector<64x32xf32>
    %113 = arith.addf %110, %112 : vector<64x32xf32>
    %c0_46 = arith.constant 0 : index
    %c0_47 = arith.constant 0 : index
    %114 = vector.load %arg7[%c0_46, %c0_47] : memref<64x32xf32, #tpu.memory_space<vmem>>, vector<64x32xf32>
    tpu.vector_store %arg7[%c0_46, %c0_47], %113 {strides = array<i32>} : memref<64x32xf32, #tpu.memory_space<vmem>>, vector<64x32xf32>,
    return
  }
  func.func @transform_0(%arg0: i32) -> (i32, i32) {
    %c0_i32 = arith.constant 0 : i32
    %c0_i32_0 = arith.constant 0 : i32
    return %arg0, %c0_i32 : i32, i32
  }
  func.func @transform_1(%arg0: i32) -> (i32, i32) {
    %c0_i32 = arith.constant 0 : i32
    %c0_i32_0 = arith.constant 0 : i32
    %c0_i32_1 = arith.constant 0 : i32
    return %c0_i32, %c0_i32_0 : i32, i32
  }
  func.func @transform_2(%arg0: i32) -> (i32, i32) {
    %c0_i32 = arith.constant 0 : i32
    %c0_i32_0 = arith.constant 0 : i32
    %c0_i32_1 = arith.constant 0 : i32
    return %c0_i32, %c0_i32_0 : i32, i32
  }
  func.func @transform_3(%arg0: i32) -> (i32, i32) {
    %c0_i32 = arith.constant 0 : i32
    %c0_i32_0 = arith.constant 0 : i32
    %c0_i32_1 = arith.constant 0 : i32
    return %c0_i32, %c0_i32_0 : i32, i32
  }
  func.func @transform_4(%arg0: i32) -> (i32, i32) {
    %c0_i32 = arith.constant 0 : i32
    %c0_i32_0 = arith.constant 0 : i32
    %c0_i32_1 = arith.constant 0 : i32
    return %c0_i32, %c0_i32_0 : i32, i32
  }
  func.func @transform_5(%arg0: i32) -> (i32, i32, i32, i32) {
    %c0_i32 = arith.constant 0 : i32
    %c0_i32_0 = arith.constant 0 : i32
    %c0_i32_1 = arith.constant 0 : i32
    %c0_i32_2 = arith.constant 0 : i32
    %c0_i32_3 = arith.constant 0 : i32
    return %c0_i32, %c0_i32_0, %c0_i32_1, %c0_i32_2 : i32, i32, i32, i32
  }
  func.func @transform_6(%arg0: i32) -> (i32, i32) {
    %c0_i32 = arith.constant 0 : i32
    %c0_i32_0 = arith.constant 0 : i32
    return %arg0, %c0_i32 : i32, i32
  }
}

</mosaic_0001>

<bundles_post_ra>
// kernel: tpu_custom_call.1
= control target key start
LH: loop header
LB: loop body
LE: loop exit
PB: predicated region body
PF: predicated region fallthrough
CT: control target
= control target key end

     0   :  { %11 = vsyncpa [#allocation4], 0  ;;  %s3785_s0 = inlined_call_operand.hbm [shape: f32[128,32], index: 0, kind: input, shape index: {}]   ;;  %s3786_s1 = inlined_call_operand.hbm [shape: bf16[32,96], index: 1, kind: input, shape index: {}]   ;;  %s3787_s2 = inlined_call_operand.hbm [shape: f32[1,96], index: 2, kind: input, shape index: {}]   ;;  %s3788_s3 = inlined_call_operand.hbm [shape: bf16[32,32], index: 3, kind: input, shape index: {}]   ;;  %s3789_s4 = inlined_call_operand.hbm [shape: f32[1,32], index: 4, kind: input, shape index: {}]   ;;  %s3790_s5 = inlined_call_operand.hbm [shape: f32[4,2,32,32], index: 5, kind: input, shape index: {}]   ;;  %s3791_s6 = inlined_call_operand.hbm [shape: f32[128,32], index: 6, kind: output, shape index: {}]  }
   0x1   :  { %13 = vsyncpa [#allocation4 + $0x1], 0 }
   0x2   :  { %14 = vsyncpa [#allocation7], 0 }
   0x3   :  { %15 = vsyncpa [#allocation10], 0 }
   0x4   :  { %16 = vsyncpa [#allocation13], 0 }
   0x5   :  { %17 = vsyncpa [#allocation5], 0 }
   0x6   :  { %19 = vsyncpa [#allocation5 + $0x1], 0  ;;  %s3104_s21 = smov 0   ;;  %s3106_s22 = smov 0  }
   0x7   :  { %s3108_s23 = smov 0   ;;  %s3110_s24 = smov 0  }
   0x8 LB: > { %s3043_s25 = smov [#allocation6]   ;;  %s3125_s27 = sadd.s32 4294967295, %s3041_s24   ;;  %s3041_s24 = sphi %s3110_s24, %s3816_s24   ;;  %s3037_s23 = sphi %s3108_s23, %s3815_s23   ;;  %s3033_s22 = sphi %s3106_s22, %s3814_s22   ;;  %s3029_s21 = sphi %s3104_s21, %s3813_s21  }
   0x9   : > { %s199_s26 = sshll.u32 %s3043_s25, 4  ;;  %p2230_p0 = scmp.ge.s32.totalorder %s3041_s24, 1  ;;  %s3130_s26 = int_to_ptr.vmem [resolvable:$true] %s199_s26 }
   0xa   : > { %p3792_p1 = scmp.eq.s32.totalorder %s3125_s27, 0  ;;  %p187_p2 = scmp.lt.s32.totalorder %s3041_s24, 3 }
   0xb   : > { %s3044_s29 = smov [#allocation9]   ;;  %s3045_s8 = smov [#allocation8]  }
   0xc   : > { %p3132_p3 = pnand %p2230_p0, %p187_p2  ;;  %s223_s30 = sshll.u32 %s3044_s29, 4  ;;  %s3145_s30 = int_to_ptr.vmem [resolvable:$true] %s223_s30 }
   0xd   : > { %s213_s9 = sshll.u32 %s3045_s8, 4  ;;  %s2793_s12 = scalar_lea.hbm %s3786_s1, 256  ;;  %s3147_s9 = int_to_ptr.vmem [resolvable:$true] %s213_s9 }
   0xe   : > { %s3795_s28 = scalar_select %p3132_p3, 1, 0 }
   0xf   : > { %p2569_p5 = pneg %p3132_p3  ;;  %p2794_p7 = scmp.ne.s32.totalorder %s3786_s1, %s2793_s12 }
  0x10   : > { %p2800_p11 = scmp.lt.u32.totalorder %s2793_s12, %s3786_s1 }
  0x11   : > { %p3141_p6 = pnand %p2569_p5, %p3792_p1 }
  0x13   : > { %p3157_p8 = pneg %p3141_p6 }
  0x15   : > { %p2796_p9 = pnand %p3157_p8, %p2794_p7 }
  0x17   : > { %p2797_p10 = pneg %p2796_p9 }
  0x19   : > { %p2802_p12 = pnand %p2800_p11, %p2797_p10 }
  0x1b   : > { %2805 = shalt.err (!%p2802_p12)
}
  0x1c   : > { %s2806_s18 = scalar_lea.vmem %s3130_s26, 256  ;;  %p2814_p5 = scmp.lt.s32.totalorder %s3130_s26, %s3130_s26 }
  0x1d   : > { %p2807_p13 = scmp.ne.s32.totalorder %s3130_s26, %s2806_s18  ;;  %p2815_p4 = scmp.lt.s32.totalorder %s2806_s18, %s2806_s18 }
  0x1f   : > { %p2809_p0 = pnand %p2807_p13, %p3157_p8  ;;  %p2816_p7 = por %p2815_p4, %p2814_p5 }
  0x21   : > { %p2810_p2 = pneg %p2809_p0 }
  0x23   : > { %p2817_p9 = pnand %p2816_p7, %p2810_p2 }
  0x25   : > { %2820 = shalt.err (!%p2817_p9)
}
  0x26   : > { %s3046_s19 = smov 64   ;;  %s3047_s20 = smov 4  }
  0x27   : > { %2572 = dma.hbm_to_vmem [thread:$0]  (!%p3141_p6), %s3786_s1, 256, %s3130_s26, [#allocation7], %s3046_s19, %s3046_s19, %s3047_s20  }
  0x28   : > { %s2821_s11 = scalar_lea.hbm %s3788_s3, 256 }
  0x29   : > { %p2822_p4 = scmp.ne.s32.totalorder %s3788_s3, %s2821_s11  ;;  %p2828_p12 = scmp.lt.u32.totalorder %s2821_s11, %s3788_s3 }
  0x2b   : > { %p2824_p10 = pnand %p2822_p4, %p3157_p8 }
  0x2d   : > { %p2825_p11 = pneg %p2824_p10 }
  0x2f   : > { %p2830_p13 = pnand %p2828_p12, %p2825_p11 }
  0x31   : > { %2833 = shalt.err (!%p2830_p13)
}
  0x32   : > { %s2834_s26 = scalar_lea.vmem %s3145_s30, 256  ;;  %p2842_p7 = scmp.lt.s32.totalorder %s3145_s30, %s3145_s30 }
  0x33   : > { %p2835_p0 = scmp.ne.s32.totalorder %s3145_s30, %s2834_s26  ;;  %p2843_p9 = scmp.lt.s32.totalorder %s2834_s26, %s2834_s26 }
  0x35   : > { %p2837_p2 = pnand %p2835_p0, %p3157_p8  ;;  %p2844_p4 = por %p2843_p9, %p2842_p7 }
  0x37   : > { %p2838_p5 = pneg %p2837_p2 }
  0x39   : > { %p2845_p10 = pnand %p2844_p4, %p2838_p5 }
  0x3b   : > { %2848 = shalt.err (!%p2845_p10)
}
  0x3c   : > { %2578 = dma.hbm_to_vmem [thread:$0]  (!%p3141_p6), %s3788_s3, 256, %s3145_s30, [#allocation10], %s3046_s19, %s3046_s19, %s3047_s20  }
  0x3d   : > { %s2849_s8 = scalar_lea.hbm %s3787_s2, 16 }
  0x3e   : > { %p2850_p11 = scmp.ne.s32.totalorder %s3787_s2, %s2849_s8  ;;  %p2856_p0 = scmp.lt.u32.totalorder %s2849_s8, %s3787_s2 }
  0x40   : > { %p2852_p12 = pnand %p2850_p11, %p3157_p8 }
  0x42   : > { %p2853_p13 = pneg %p2852_p12 }
  0x44   : > { %p2858_p2 = pnand %p2856_p0, %p2853_p13 }
  0x46   : > { %2861 = shalt.err (!%p2858_p2)
}
  0x47   : > { %s2862_s30 = scalar_lea.vmem %s3147_s9, 16  ;;  %s2869_s19 = scalar_lea.vmem %s3147_s9, 32 }
  0x48   : > { %p2863_p5 = scmp.ne.s32.totalorder %s3147_s9, %s2862_s30  ;;  %p2870_p4 = scmp.lt.s32.totalorder %s3147_s9, %s3147_s9 }
  0x49   : > { %p2871_p10 = scmp.lt.s32.totalorder %s2869_s19, %s2862_s30 }
  0x4a   : > { %p2865_p7 = pnand %p2863_p5, %p3157_p8 }
  0x4b   : > { %p2872_p11 = por %p2871_p10, %p2870_p4 }
  0x4c   : > { %p2866_p9 = pneg %p2865_p7 }
  0x4e   : > { %p2873_p12 = pnand %p2872_p11, %p2866_p9 }
  0x50   : > { %2876 = shalt.err (!%p2873_p12)
}
  0x51   : > { %2575 = dma.hbm_to_vmem [thread:$0]  (!%p3141_p6), %s3787_s2, 16, %s3147_s9, [#allocation7]  }
  0x52   : > { %s3048_s16 = smov [#allocation11]   ;;  %s3049_s17 = smov [#allocation12]  }
  0x53   : > { %s237_s26 = sshll.u32 %s3048_s16, 4  ;;  %s247_s18 = sshll.u32 %s3049_s17, 4  ;;  %s238_s26 = int_to_ptr.vmem [resolvable:$true] %s237_s26  ;;  %s248_s18 = int_to_ptr.vmem [resolvable:$true] %s247_s18 }
  0x54   : > { %s2877_s8 = scalar_lea.hbm %s3789_s4, 16 }
  0x55   : > { %p2878_p13 = scmp.ne.s32.totalorder %s3789_s4, %s2877_s8  ;;  %p2884_p5 = scmp.lt.u32.totalorder %s2877_s8, %s3789_s4 }
  0x57   : > { %p2880_p0 = pnand %p2878_p13, %p3157_p8 }
  0x59   : > { %p2881_p2 = pneg %p2880_p0 }
  0x5b   : > { %p2886_p7 = pnand %p2884_p5, %p2881_p2 }
  0x5d   : > { %2889 = shalt.err (!%p2886_p7)
}
  0x5e   : > { %s2890_s9 = scalar_lea.vmem %s238_s26, 16  ;;  %s2897_s30 = scalar_lea.vmem %s238_s26, 32 }
  0x5f   : > { %p2891_p9 = scmp.ne.s32.totalorder %s238_s26, %s2890_s9  ;;  %p2898_p11 = scmp.lt.s32.totalorder %s238_s26, %s238_s26 }
  0x60   : > { %p2899_p12 = scmp.lt.s32.totalorder %s2897_s30, %s2890_s9 }
  0x61   : > { %p2893_p4 = pnand %p2891_p9, %p3157_p8 }
  0x62   : > { %p2900_p1 = por %p2899_p12, %p2898_p11 }
  0x63   : > { %p2894_p10 = pneg %p2893_p4 }
  0x65   : > { %p2901_p3 = pnand %p2900_p1, %p2894_p10 }
  0x67   : > { %2904 = shalt.err (!%p2901_p3)
}
  0x68   : > { %2581 = dma.hbm_to_vmem [thread:$0]  (!%p3141_p6), %s3789_s4, 16, %s238_s26, [#allocation10]  }
  0x69   : > { %s2905_s17 = scalar_lea.hbm %s3790_s5, 4096 }
  0x6a   : > { %p2906_p13 = scmp.ne.s32.totalorder %s3790_s5, %s2905_s17  ;;  %p2912_p3 = scmp.lt.u32.totalorder %s2905_s17, %s3790_s5 }
  0x6c   : > { %p2908_p0 = pnand %p2906_p13, %p3157_p8 }
  0x6e   : > { %p2909_p1 = pneg %p2908_p0 }
  0x70   : > { %p2914_p2 = pnand %p2912_p3, %p2909_p1 }
  0x72   : > { %2917 = shalt.err (!%p2914_p2)
}
  0x73   : > { %s2918_s11 = scalar_lea.vmem %s248_s18, 4096  ;;  %p2926_p4 = scmp.lt.s32.totalorder %s248_s18, %s248_s18 }
  0x74   : > { %p2919_p5 = scmp.ne.s32.totalorder %s248_s18, %s2918_s11  ;;  %p2927_p10 = scmp.lt.s32.totalorder %s2918_s11, %s2918_s11 }
  0x76   : > { %p2921_p7 = pnand %p2919_p5, %p3157_p8  ;;  %p2928_p11 = por %p2927_p10, %p2926_p4 }
  0x78   : > { %p2922_p9 = pneg %p2921_p7 }
  0x7a   : > { %p2929_p12 = pnand %p2928_p11, %p2922_p9 }
  0x7c   : > { %2932 = shalt.err (!%p2929_p12)
}
  0x7d   : > { %s3050_s26 = smov 128   ;;  %s3051_s15 = smov 8  }
  0x7e   : > { %2584 = dma.hbm_to_vmem [thread:$0]  (!%p3141_p6), %s3790_s5, 4096, %s248_s18, [#allocation13], %s3050_s26, %s3050_s26, %s3051_s15  }
  0x7f   : > { %s2229_s9 = sadd.s32 4294967294, %s3041_s24   ;;  %s3266_s30 = sadd.s32 1, %s3041_s24  }
  0x80   : > { %s32_s19 = sadd.s32 1, %s3037_s23  ;;  %s29_s20 = ssub.s32 %s3041_s24, %s3266_s30 }
  0x81   : > { %p39_p8 = scmp.ne.s32.totalorder %s3037_s23, %s3033_s22  ;;  %p30_p13 = scmp.eq.s32.totalorder %s29_s20, 0 }
  0x82   : > { %p40_p0 = scmp.eq.s32.totalorder %s3041_s24, 0  ;;  %p45_p1 = scmp.ne.s32.totalorder %s3033_s22, %s3029_s21 }
  0x83   : > { %p174_p3 = scmp.eq.s32.totalorder %s3125_s27, 1  ;;  %p3798_p5 = scmp.eq.s32.totalorder %s3125_s27, 0 }
  0x84   : > { %s3278_s7 = scalar_select %p30_p13, %s3037_s23, %s32_s19  }
  0x85   : > { %p41_p2 = por %p40_p0, %p39_p8  ;;  %p3282_p7 = por %p3798_p5, %p45_p1 }
  0x86   : > { %p3286_p6 = por %p174_p3, %p39_p8  ;;  %p180_p9 = scmp.eq.s32.totalorder %s2229_s9, 1 }
  0x87   : > { %p2598_p4 = scmp.lt.s32.totalorder %s3041_s24, 2  ;;  %s261_s16 = sand.u32 1, %s3037_s23  }
  0x88   : > { %s3800_s18 = scalar_select %p3286_p6, 1, 0 }
  0x89   : > { %p3292_p10 = por %p180_p9, %p45_p1  ;;  %s2237_s25 = sshll.u32 %s261_s16, 6 }
  0x8a   : > { %s2299_s29 = sshll.u32 %s3041_s24, 10  ;;  %s265_s12 = scalar_lea.vmem [#allocation3], %s2237_s25 }
  0x8b   : > { %s3801_s17 = scalar_select %p3292_p10, 1, 0 }
  0x8c   : > { %s3300_s11 = scalar_lea.hbm %s3785_s0, %s2299_s29  ;;  %s272_s13 = sshll.u32 %s265_s12, 4  ;;  %s3306_s13 = int_to_ptr.vmem [resolvable:$true] %s272_s13 }
  0x8d   : > { %p3302_p11 = pnand %p2598_p4, %p41_p2  ;;  %s3308_s19 = scalar_lea.sflag [#allocation4], %s261_s16 }
  0x8e   : > { %s2933_s20 = scalar_lea.hbm %s3300_s11, 1024  ;;  %s2938_s8 = scalar_lea.hbm %s3785_s0, 2048 }
  0x8f   : > { %p2934_p12 = scmp.ne.s32.totalorder %s3300_s11, %s2933_s20  ;;  %p2935_p8 = pneg %p3302_p11 }
  0x90   : > { %p2939_p1 = scmp.lt.u32.totalorder %s3300_s11, %s3785_s0  ;;  %p2940_p3 = scmp.lt.u32.totalorder %s2938_s8, %s2933_s20 }
  0x91   : > { %p2936_p13 = pnand %p2935_p8, %p2934_p12  ;;  %p2942_p5 = scmp.lt.u32.totalorder %s2933_s20, %s3300_s11 }
  0x92   : > { %p2941_p2 = por %p2940_p3, %p2939_p1 }
  0x93   : > { %p2937_p0 = pneg %p2936_p13 }
  0x94   : > { %p2943_p9 = por %p2942_p5, %p2941_p2 }
  0x96   : > { %p2944_p4 = pnand %p2943_p9, %p2937_p0 }
  0x98   : > { %2947 = shalt.err (!%p2944_p4)
}
  0x99   : > { %s2948_s16 = scalar_lea.vmem %s3306_s13, 1024  ;;  %s3052_s25 = smov [#allocation3]  }
  0x9a   : > { %p2949_p12 = scmp.ne.s32.totalorder %s3306_s13, %s2948_s16  ;;  %s2953_s29 = sshll.u32 %s3052_s25, 4  ;;  %s2954_s29 = int_to_ptr.vmem [resolvable:$false] %s2953_s29 }
  0x9b   : > { %s2955_s10 = scalar_lea.vmem %s2954_s29, 2048  ;;  %p2956_p6 = scmp.lt.s32.totalorder %s3306_s13, %s2954_s29 }
  0x9c   : > { %p2951_p13 = pnand %p2949_p12, %p2935_p8  ;;  %p2957_p1 = scmp.lt.s32.totalorder %s2955_s10, %s2948_s16 }
  0x9e   : > { %p2952_p10 = pneg %p2951_p13  ;;  %p2958_p3 = por %p2957_p1, %p2956_p6 }
  0xa0   : > { %p2959_p2 = pnand %p2958_p3, %p2952_p10 }
  0xa2   : > { %2962 = shalt.err (!%p2959_p2)
}
  0xa3   : > { %2588 = dma.hbm_to_vmem [thread:$0]  (!%p3302_p11), %s3300_s11, 1024, %s3306_s13, %s3308_s19, %s3050_s26, %s3050_s26, %s3051_s15  }
  0xa4   : > { %p3803_p8 = scmp.ne.s32.totalorder %s3795_s28, 0 }
  0xa5   : > { %s3342_s20 = sand.u32 (!%p3803_p8), 1, %s3033_s22  }
  0xa6   : > { %284 = sbr.rel (%p3803_p8) target bundleno = 3351 (0xd17), region = 44  ;;  %s2241_s8 = sshll.u32 (!%p3803_p8), %s3342_s20, 6 }
  0xa7   : > { %s287_s12 = scalar_lea.sflag (!%p3803_p8), [#allocation4], %s3342_s20  ;;  %s290_s9 = scalar_lea.vmem (!%p3803_p8), [#allocation3], %s2241_s8 }
  0xad   : > { %3008 = dma.done.wait (%p3282_p7), %s287_s12, 1024  }
  0xae   : > { %3010 = vsyncadd (%p3282_p7), %s287_s12, 4294966272  ;;  %p3804_p6 = scmp.eq.s32.totalorder %s3125_s27, 0 }
  0xb0   : > { %3012 = dma.done.wait (%p3804_p6), [#allocation7], 272   ;;  %p3805_p10 = pmov %p3804_p6 }
  0xb1   : > { %p3806_p11 = pmov %p3804_p6 }
  0xb2   : > { %3014 = vsyncadd (%p3805_p10), [#allocation7], 4294967024 }
  0xb3   : > { %3016 = dma.done.wait (%p3806_p11), [#allocation10], 272   ;;  %p3807_p0 = pmov %p3804_p6 }
  0xb5   : > { %3018 = vsyncadd (%p3807_p0), [#allocation10], 4294967024  ;;  %p3808_p5 = pmov %p3807_p0 }
  0xb6   : > { %p3809_p9 = pmov %p3807_p0 }
  0xb7   : > { %3020 = dma.done.wait (%p3808_p5), [#allocation13], 4096  }
  0xb8   : > { %3022 = vsyncadd (%p3809_p9), [#allocation13], 4294963200  ;;  %v2661_v0 = vld [vmem:[#allocation6] sm:$0xff]   ;;  %v2662_v1 = vld [vmem:[#allocation6 + $0x8] sm:$0xff]   ;;  %vm377_vm0 = vcmask 261120   ;;  %vm473_vm1 = vcmask 64512  }
  0xb9   : > { %2377 = vmatprep.subr.bf16.mxu0 %v2661_v0  ;;  %v342_v2 = vld [vmem:[%s290_s9] sm:$0xff]  ;;  %v343_v3 = vld [vmem:[%s290_s9 + $0x8] sm:$0xff]  ;;  %v344_v5 = vld [vmem:[%s290_s9 + $0x10] sm:$0xff]  ;;  %s3053_s28 = smov 96   ;;  %s3054_s26 = smov 64   ;;  %vm1205_vm2 = vcmask 130112  }
  0xba   : > { %2378 = vmatpush3.bf16.msra.mxu0 %v2661_v0  ;;  %v350_v4 = vpack.c.bf16 %v343_v3, %v342_v2  ;;  %v345_v6 = vld [vmem:[%s290_s9 + $0x18] sm:$0xff]  ;;  %v346_v7 = vld [vmem:[%s290_s9 + $0x20] sm:$0xff]  ;;  %v347_v8 = vld [vmem:[%s290_s9 + $0x28] sm:$0xff]  ;;  %s3055_s15 = smov 88   ;;  %s3056_s14 = smov 120   ;;  %vm1591_vm3 = vcmask 195712  }
  0xbb   : > { %2379 = vmatprep.subr.bf16.mxu0 %v2662_v1  ;;  %v351_v9 = vpack.c.bf16 %v345_v6, %v344_v5  ;;  %v352_v10 = vpack.c.bf16 %v347_v8, %v346_v7  ;;  %v348_v11 = vld [vmem:[%s290_s9 + $0x30] sm:$0xff]  ;;  %v349_v12 = vld [vmem:[%s290_s9 + $0x38] sm:$0xff]  ;;  %v459_v43 = vld [vmem:[#allocation12] sm:$0xff]  ;;  %s3057_s11 = smov 56   ;;  %s3058_s13 = smov 80   ;;  %vm1977_vm4 = vcmask 261312  }
  0xbc   : > { %2381 = vmatprep.mubr.msk.bf16.mxu0 %vm377_vm0, %v350_v4  ;;  %v353_v13 = vpack.c.bf16 %v349_v12, %v348_v11  ;;  %v2248_v15 = vld [vmem:[#allocation8] ss:$0 sm:$0xff]  ;;  %v461_v45 = vld [vmem:[#allocation12 + $0x10] sm:$0xff]  ;;  %v462_v54 = vld [vmem:[#allocation12 + $0x18] sm:$0xff]  ;;  %s3059_s19 = smov 112   ;;  %s3060_s16 = smov 48  }
  0xbd   : > { %v460_v47 = vld [vmem:[#allocation12 + $0x8] sm:$0xff]  ;;  %v463_v56 = vld [vmem:[#allocation12 + $0x20] sm:$0xff]  ;;  %v465_v60 = vld [vmem:[#allocation12 + $0x30] sm:$0xff]  ;;  %s3061_s25 = smov 72   ;;  %s3062_s29 = smov 104  }
  0xbe   : > { %2380 = vmatpush3.bf16.msra.mxu0 %v2662_v1  ;;  %v464_v62 = vld [vmem:[#allocation12 + $0x28] sm:$0xff]  ;;  %v466_v6 = vld [vmem:[#allocation12 + $0x38] sm:$0xff]  ;;  %s3063_s10 = smov 40   ;;  %s3064_s12 = smov 8  }
  0xbf   : > { %s3065_s9 = smov 16   ;;  %p3810_p4 = scmp.ne.s32.totalorder %s3800_s18, 0 }
  0xc1   : > { %2382 = vmatmul.mubr.msk.bf16.vlgmr.msra.gmra.mrb[0].mxu0 %vm377_vm0, %v351_v9 }
  0xc2   : > { %2385 = vmatprep.mubr.msk.bf16.mxu0 %vm377_vm0, %v352_v10 }
  0xc9   : > { %2386 = vmatmul.mubr.msk.bf16.gmra.mrb[4].mxu0 %vm377_vm0, %v353_v13 }
 0x194   : > { %v2383_v14 = vpop.f32.mrb[0].mxu0 }
 0x195   : > { %v424_v16 = vpop.f32.mrb[1].mxu0  ;;  %v433_v18 = vadd.f32 %v2383_v14, %v2248_v15 }
 0x196   : > { %v2384_v17 = vpop.f32.mrb[2].mxu0  ;;  %v425_v21 = vadd.f32 %v2248_v15, %v424_v16 }
 0x197   : > { %v436_v19 = vadd.f32 %v2384_v17, %v2248_v15  ;;  %v427_v20 = vpop.f32.mrb[3].mxu0 }
 0x198   : > { %v428_v22 = vadd.f32 %v2248_v15, %v427_v20 }
 0x199   : > { %v3368_v23 = vpack.c.bf16 %v436_v19, %v433_v18 }
 0x19a   : > { %v3370_v24 = vpack.c.bf16 %v428_v22, %v425_v21 }
 0x19c   : > { %v2387_v25 = vpop.f32.mrb[4].mxu0  ;;  %469 = vrot.lane.b32.xlu0 %v3370_v24, %s3053_s28  ;;  %2393 = vmatprep.mubr.msk.bf16.mxu1 %vm473_vm1, %v3370_v24 }
 0x19d   : > { %v449_v26 = vadd.f32 %v2387_v25, %v2248_v15  ;;  %v440_v27 = vpop.f32.mrb[5].mxu0 }
 0x19e   : > { %v441_v28 = vadd.f32 %v2248_v15, %v440_v27  ;;  %v2388_v29 = vpop.f32.mrb[6].mxu0 }
 0x19f   : > { %v452_v30 = vadd.f32 %v2388_v29, %v2248_v15  ;;  %v443_v31 = vpop.f32.mrb[7].mxu0 }
 0x1a0   : > { %v444_v32 = vadd.f32 %v2248_v15, %v443_v31  ;;  %471 = vrot.lane.b32.xlu0 %v3368_v23, %s3053_s28 }
 0x1a1   : > { %v3376_v33 = vpack.c.bf16 %v452_v30, %v449_v26 }
 0x1a2   : > { %v3378_v34 = vpack.c.bf16 %v444_v32, %v441_v28 }
 0x1a4   : > { %537 = vrot.lane.b32.xlu1 %v3378_v34, %s3053_s28  ;;  %2401 = vmatprep.mubr.msk.bf16.mxu0 %vm473_vm1, %v3378_v34 }
 0x1a8   : > { %539 = vrot.lane.b32.xlu1 %v3376_v33, %s3053_s28  ;;  %s3066_s28 = smov 24  }
 0x20e   : > { %v470_v35 = vpop.permute.xlu0 %469 }
 0x20f   : > { %2529 = vmatprep.subr.msk.bf16.mxu1 %vm473_vm1, %v470_v35  ;;  %v481_v36 = vsel %vm473_vm1, %v470_v35, 0 }
 0x210   : > { %2390 = vmatpush3.bf16.xpose.msra.mxu1 %v481_v36 }
 0x212   : > { %v472_v37 = vpop.permute.xlu0 %471 }
 0x213   : > { %2530 = vmatprep.subr.msk.bf16.mxu1 %vm473_vm1, %v472_v37  ;;  %v484_v39 = vsel %vm473_vm1, %v472_v37, 0 }
 0x216   : > { %v538_v38 = vpop.permute.xlu1 %537 }
 0x217   : > { %2531 = vmatprep.subr.msk.bf16.mxu0 %vm473_vm1, %v538_v38  ;;  %v548_v40 = vsel %vm473_vm1, %v538_v38, 0 }
 0x218   : > { %2392 = vmatpush3.bf16.xpose.msra.mxu1 %v484_v39  ;;  %2398 = vmatpush3.bf16.xpose.msra.mxu0 %v548_v40 }
 0x21a   : > { %v540_v41 = vpop.permute.xlu1 %539 }
 0x21b   : > { %2532 = vmatprep.subr.msk.bf16.mxu0 %vm473_vm1, %v540_v41  ;;  %v551_v42 = vsel %vm473_vm1, %v540_v41, 0 }
 0x21f   : > { %2394 = vmatmul.mubr.msk.bf16.vlgmr.msra.gmra.mrb[0].mxu1 %vm473_vm1, %v3368_v23 }
 0x220   : > { %2400 = vmatpush3.bf16.xpose.msra.mxu0 %v551_v42 }
 0x227   : > { %2402 = vmatmul.mubr.msk.bf16.vlgmr.msra.gmra.mrb[8].mxu0 %vm473_vm1, %v3376_v33 }
 0x2f2   : > { %v2395_v44 = vpop.f32.mrb[0].mxu1 }
 0x2f3   : > { %v520_v46 = vpop.f32.mrb[1].mxu1  ;;  %v529_v51 = vadd.f32 %v2395_v44, %v461_v45 }
 0x2f4   : > { %v521_v48 = vadd.f32 %v520_v46, %v459_v43  ;;  %v2396_v49 = vpop.f32.mrb[2].mxu1 }
 0x2f5   : > { %v523_v50 = vpop.f32.mrb[3].mxu1  ;;  %v532_v57 = vadd.f32 %v2396_v49, %v462_v54  ;;  %v608_v59 = vsel %vm377_vm0, %v529_v51, -inf }
 0x2f6   : > { %v524_v52 = vadd.f32 %v523_v50, %v460_v47  ;;  %v602_v53 = vsel %vm377_vm0, %v521_v48, -inf }
 0x2f7   : > { %603 = vmax.xlane.f32.xlu0 %v602_v53  ;;  %v611_v5 = vsel %vm377_vm0, %v532_v57, -inf }
 0x2f8   : > { %v605_v55 = vsel %vm377_vm0, %v524_v52, -inf }
 0x2f9   : > { %606 = vmax.xlane.f32.xlu1 %v605_v55 }
 0x2fa   : > { %v2403_v58 = vpop.f32.mrb[8].mxu0 }
 0x2fb   : > { %v587_v61 = vpop.f32.mrb[9].mxu0  ;;  %609 = vmax.xlane.f32.xlu0 %v608_v59  ;;  %v596_v2 = vadd.f32 %v2403_v58, %v465_v60 }
 0x2fc   : > { %v588_v63 = vadd.f32 %v587_v61, %v463_v56  ;;  %v2404_v0 = vpop.f32.mrb[10].mxu0 }
 0x2fd   : > { %v590_v1 = vpop.f32.mrb[11].mxu0  ;;  %v599_v7 = vadd.f32 %v2404_v0, %v466_v6  ;;  %v620_v8 = vsel %vm377_vm0, %v596_v2, -inf }
 0x2fe   : > { %v591_v3 = vadd.f32 %v590_v1, %v464_v62  ;;  %v614_v4 = vsel %vm377_vm0, %v588_v63, -inf }
 0x2ff   : > { %615 = vmax.xlane.f32.xlu1 %v614_v4  ;;  %612 = vmax.xlane.f32.xlu0 %v611_v5  ;;  %v623_v10 = vsel %vm377_vm0, %v599_v7, -inf }
 0x300   : > { %v617_v9 = vsel %vm377_vm0, %v591_v3, -inf }
 0x303   : > { %621 = vmax.xlane.f32.xlu1 %v620_v8  ;;  %618 = vmax.xlane.f32.xlu0 %v617_v9 }
 0x307   : > { %624 = vmax.xlane.f32.xlu0 %v623_v10 }
 0x314   : > { %694 = vrot.lane.b32.xlu1 %v3370_v24, %s3054_s26 }
 0x318   : > { %755 = vrot.lane.b32.xlu1 %v3378_v34, %s3054_s26 }
 0x31c   : > { %757 = vrot.lane.b32.xlu1 %v3376_v33, %s3054_s26 }
 0x31d   : > { %696 = vrot.lane.b32.xlu0 %v3368_v23, %s3054_s26  ;;  %s338_s26 = scalar_lea.vmem [#allocation14], %s2241_s8 }
 0x320   : > { %839 = vrot.lane.b32.xlu1 %v3368_v23, %s3055_s15 }
 0x321   : > { %837 = vrot.lane.b32.xlu0 %v3370_v24, %s3055_s15 }
 0x384   : > { %v604_v11 = vpop.xlane.xlu0 %603 }
 0x385   : > { %v626_v12 = vsub.f32 %v521_v48, %v604_v11 }
 0x386   : > { %v607_v13 = vpop.xlane.xlu1 %606 }
 0x387   : > { %v634_v16 = vmul.f32 1.442695, %v626_v12  ;;  %v627_v18 = vsub.f32 %v524_v52, %v607_v13 }
 0x388   : > { %v610_v14 = vpop.xlane.xlu0 %609 }
 0x389   : > { %v628_v15 = vsub.f32 %v529_v51, %v610_v14  ;;  %v636_v26 = vmul.f32 1.442695, %v627_v18 }
 0x38b   : > { %v638_v17 = vmul.f32 1.442695, %v628_v15 }
 0x38c   : > { %v616_v19 = vpop.xlane.xlu1 %615  ;;  %v613_v20 = vpop.xlane.xlu0 %612 }
 0x38d   : > { %2665 = vpow2.f32 %v638_v17  ;;  %v629_v21 = vsub.f32 %v532_v57, %v613_v20  ;;  %v630_v22 = vsub.f32 %v588_v63, %v616_v19 }
 0x38e   : > { %2667 = vpow2.f32 %v634_v16 }
 0x38f   : > { %v640_v25 = vmul.f32 1.442695, %v629_v21  ;;  %v642_v30 = vmul.f32 1.442695, %v630_v22 }
 0x390   : > { %v622_v27 = vpop.xlane.xlu1 %621  ;;  %v619_v28 = vpop.xlane.xlu0 %618 }
 0x391   : > { %v632_v29 = vsub.f32 %v596_v2, %v622_v27  ;;  %2669 = vpow2.f32 %v640_v25  ;;  %v631_v32 = vsub.f32 %v591_v3, %v619_v28 }
 0x392   : > { %2671 = vpow2.f32 %v636_v26 }
 0x393   : > { %v646_v31 = vmul.f32 1.442695, %v632_v29  ;;  %v644_v40 = vmul.f32 1.442695, %v631_v32 }
 0x394   : > { %v695_v35 = vpop.permute.xlu1 %694  ;;  %v625_v36 = vpop.xlane.xlu0 %624 }
 0x395   : > { %2673 = vpow2.f32 %v646_v31  ;;  %v633_v37 = vsub.f32 %v599_v7, %v625_v36  ;;  %2405 = vmatprep.subr.bf16.mxu1 %v695_v35 }
 0x396   : > { %2406 = vmatpush3.bf16.msra.mxu1 %v695_v35  ;;  %2675 = vpow2.f32 %v642_v30 }
 0x397   : > { %v3412_v38 = vpop.eup %2665  ;;  %v648_v39 = vmul.f32 1.442695, %v633_v37 }
 0x398   : > { %v756_v41 = vpop.permute.xlu1 %755  ;;  %v697_v42 = vpop.permute.xlu0 %696  ;;  %v656_v43 = vsel %vm377_vm0, %v3412_v38, 0.0 }
 0x399   : > { %v3416_v44 = vpop.eup %2667  ;;  %2677 = vpow2.f32 %v648_v39  ;;  %2413 = vmatprep.subr.bf16.mxu0 %v756_v41  ;;  %657 = vadd.xlane.f32.xlu1 %v656_v43 }
 0x39a   : > { %2407 = vmatprep.subr.bf16.mxu1 %v697_v42  ;;  %2414 = vmatpush3.bf16.msra.mxu0 %v756_v41  ;;  %2679 = vpow2.f32 %v644_v40  ;;  %v650_v48 = vsel %vm377_vm0, %v3416_v44, 0.0 }
 0x39b   : > { %2408 = vmatpush3.bf16.msra.mxu1 %v697_v42  ;;  %v2670_v45 = vpop.eup %2669 }
 0x39c   : > { %v758_v46 = vpop.permute.xlu1 %757  ;;  %v3418_v47 = vpop.permute.xlu0 %837  ;;  %v659_v49 = vsel %vm377_vm0, %v2670_v45, 0.0 }
 0x39d   : > { %2415 = vmatprep.subr.bf16.mxu0 %v758_v46  ;;  %651 = vadd.xlane.f32.xlu1 %v650_v48  ;;  %v2672_v50 = vpop.eup %2671  ;;  %v848_v19 = vsel %vm473_vm1, %v3418_v47, 0 }
 0x39e   : > { %660 = vadd.xlane.f32.xlu0 %v659_v49  ;;  %2533 = vmatprep.subr.msk.bf16.mxu1 %vm473_vm1, %v3418_v47  ;;  %v653_v54 = vsel %vm377_vm0, %v2672_v50, 0.0 }
 0x39f   : > { %v3425_v51 = vpop.eup %2673  ;;  %2416 = vmatpush3.bf16.msra.mxu0 %v758_v46 }
 0x3a0   : > { %v668_v52 = vsel %vm377_vm0, %v3425_v51, 0.0  ;;  %v2676_v53 = vpop.eup %2675  ;;  %v840_v60 = vpop.permute.xlu1 %839 }
 0x3a1   : > { %669 = vadd.xlane.f32.xlu1 %v668_v52  ;;  %v662_v56 = vsel %vm377_vm0, %v2676_v53, 0.0  ;;  %v851_v32 = vsel %vm473_vm1, %v840_v60, 0 }
 0x3a2   : > { %654 = vadd.xlane.f32.xlu0 %v653_v54 }
 0x3a3   : > { %v2678_v55 = vpop.eup %2677 }
 0x3a4   : > { %v671_v57 = vsel %vm377_vm0, %v2678_v55, 0.0  ;;  %v2680_v58 = vpop.eup %2679 }
 0x3a5   : > { %663 = vadd.xlane.f32.xlu1 %v662_v56  ;;  %v665_v59 = vsel %vm377_vm0, %v2680_v58, 0.0 }
 0x3a6   : > { %672 = vadd.xlane.f32.xlu0 %v671_v57 }
 0x3aa   : > { %666 = vadd.xlane.f32.xlu0 %v665_v59 }
 0x3b6   : > { %833 = vrot.lane.b32.xlu1 %v3370_v24, %s3056_s14 }
 0x3ba   : > { %908 = vrot.lane.b32.xlu1 %v3376_v33, %s3055_s15 }
 0x3be   : > { %904 = vrot.lane.b32.xlu1 %v3376_v33, %s3056_s14 }
 0x3c0   : > { %906 = vrot.lane.b32.xlu0 %v3378_v34, %s3055_s15  ;;  %s2300_s15 = sshll.u32 %s3125_s27, 10  ;;  %s2095_s27 = scalar_lea.sflag [#allocation5], %s3342_s20 }
 0x3c4   : > { %835 = vrot.lane.b32.xlu0 %v3368_v23, %s3056_s14 }
 0x3c8   : > { %902 = vrot.lane.b32.xlu0 %v3378_v34, %s3056_s14  ;;  %s2108_s14 = sshll.u32 %s338_s26, 4  ;;  %s3738_s14 = int_to_ptr.vmem [resolvable:$true] %s2108_s14 }
 0x426   : > { %v658_v61 = vpop.xlane.xlu1 %657 }
 0x42a   : > { %v652_v62 = vpop.xlane.xlu1 %651 }
 0x42b   : > { %v661_v63 = vpop.xlane.xlu0 %660 }
 0x42c   : > { %2681 = vrcp.f32 %v661_v63 }
 0x42d   : > { %2683 = vrcp.f32 %v652_v62  ;;  %v828_v62 = vld [vmem:[#allocation12 + $0x58] sm:$0xff] }
 0x42e   : > { %v670_v0 = vpop.xlane.xlu1 %669  ;;  %2685 = vrcp.f32 %v658_v61 }
 0x42f   : > { %v655_v1 = vpop.xlane.xlu0 %654 }
 0x430   : > { %2687 = vrcp.f32 %v655_v1 }
 0x432   : > { %v664_v2 = vpop.xlane.xlu1 %663 }
 0x433   : > { %v673_v3 = vpop.xlane.xlu0 %672 }
 0x434   : > { %2689 = vrcp.f32 %v673_v3 }
 0x435   : > { %2691 = vrcp.f32 %v664_v2 }
 0x436   : > { %v2682_v4 = vpop.eup %2681  ;;  %2693 = vrcp.f32 %v670_v0  ;;  %v834_v18 = vpop.permute.xlu1 %833  ;;  %v829_v0 = vld [vmem:[#allocation12 + $0x60] sm:$0xff] }
 0x437   : > { %v667_v5 = vpop.xlane.xlu0 %666  ;;  %v2684_v6 = vpop.eup %2683  ;;  %v685_v9 = vmul.f32 %v2682_v4, %v2670_v45  ;;  %v831_v4 = vld [vmem:[#allocation12 + $0x70] sm:$0xff] }
 0x438   : > { %2695 = vrcp.f32 %v667_v5  ;;  %v2686_v7 = vpop.eup %2685  ;;  %v682_v11 = vmul.f32 %v2684_v6, %v3416_v44  ;;  %v830_v6 = vld [vmem:[#allocation12 + $0x68] sm:$0xff] }
 0x439   : > { %v684_v13 = vmul.f32 %v2686_v7, %v3412_v38 }
 0x43a   : > { %v2688_v8 = vpop.eup %2687  ;;  %v909_v35 = vpop.permute.xlu1 %908 }
 0x43b   : > { %v907_v10 = vpop.permute.xlu0 %906  ;;  %v683_v12 = vmul.f32 %v2688_v8, %v2672_v50  ;;  %v691_v15 = vpack.c.bf16 %v685_v9, %v684_v13  ;;  %v920_v37 = vsel %vm473_vm1, %v909_v35, 0 }
 0x43c   : > { %2535 = vmatprep.subr.msk.bf16.mxu0 %vm473_vm1, %v907_v10  ;;  %v917_v31 = vsel %vm473_vm1, %v907_v10, 0 }
 0x43d   : > { %v690_v14 = vpack.c.bf16 %v683_v12, %v682_v11 }
 0x43e   : > { %v2690_v16 = vpop.eup %2689  ;;  %v905_v38 = vpop.permute.xlu1 %904 }
 0x43f   : > { %2409 = vmatprep.mubr.msk.bf16.mxu1 %vm377_vm0, %v690_v14  ;;  %v2692_v17 = vpop.eup %2691  ;;  %v689_v22 = vmul.f32 %v2690_v16, %v2678_v55  ;;  %v836_v25 = vpop.permute.xlu0 %835  ;;  %v826_v55 = vld [vmem:[#allocation12 + $0x48] sm:$0xff]  ;;  %v832_v14 = vld [vmem:[#allocation12 + $0x78] sm:$0xff] }
 0x440   : > { %2410 = vmatmul.mubr.msk.bf16.vlgmr.msra.gmra.mrb[4].mxu1 %vm377_vm0, %v691_v15  ;;  %v2694_v20 = vpop.eup %2693  ;;  %v686_v26 = vmul.f32 %v2692_v17, %v2676_v53  ;;  %v827_v53 = vld [vmem:[#allocation12 + $0x50] sm:$0xff] }
 0x441   : > { %2422 = vmatpush3.bf16.xpose.msra.mxu1 %v848_v19  ;;  %2425 = vmatprep.mubr.msk.bf16.mxu1 %vm473_vm1, %v834_v18  ;;  %v688_v28 = vmul.f32 %v2694_v20, %v3425_v51  ;;  %v825_v51 = vld [vmem:[#allocation12 + $0x40] sm:$0xff] }
 0x442   : > { %v2696_v21 = vpop.eup %2695  ;;  %2534 = vmatprep.subr.msk.bf16.mxu1 %vm473_vm1, %v840_v60 }
 0x443   : > { %v687_v27 = vmul.f32 %v2696_v21, %v2680_v58  ;;  %v693_v30 = vpack.c.bf16 %v689_v22, %v688_v28  ;;  %v903_v36 = vpop.permute.xlu0 %902 }
 0x445   : > { %v692_v29 = vpack.c.bf16 %v687_v27, %v686_v26 }
 0x447   : > { %2417 = vmatprep.mubr.msk.bf16.mxu0 %vm377_vm0, %v692_v29 }
 0x448   : > { %2418 = vmatmul.mubr.msk.bf16.vlgmr.msra.gmra.mrb[12].mxu0 %vm377_vm0, %v693_v30 }
 0x449   : > { %2424 = vmatpush3.bf16.xpose.msra.mxu1 %v851_v32  ;;  %2430 = vmatpush3.bf16.xpose.msra.mxu0 %v917_v31 }
 0x44a   : > { %2536 = vmatprep.subr.msk.bf16.mxu0 %vm473_vm1, %v909_v35  ;;  %2433 = vmatprep.mubr.msk.bf16.mxu0 %vm473_vm1, %v903_v36 }
 0x450   : > { %2426 = vmatmul.mubr.msk.bf16.vlgmr.msra.gmra.mrb[8].mxu1 %vm473_vm1, %v836_v25 }
 0x451   : > { %2432 = vmatpush3.bf16.xpose.msra.mxu0 %v920_v37 }
 0x458   : > { %2434 = vmatmul.mubr.msk.bf16.vlgmr.msra.gmra.mrb[16].mxu0 %vm473_vm1, %v905_v38 }
 0x513   : > { %v2411_v39 = vpop.f32.mrb[4].mxu1 }
 0x514   : > { %v740_v40 = vpop.f32.mrb[5].mxu1 }
 0x515   : > { %v2412_v41 = vpop.f32.mrb[6].mxu1 }
 0x516   : > { %v817_v42 = vpack.c.bf16 %v2412_v41, %v2411_v39  ;;  %v743_v43 = vpop.f32.mrb[7].mxu1 }
 0x517   : > { %v816_v44 = vpack.c.bf16 %v743_v43, %v740_v40 }
 0x518   : > { %821 = vst.msk [vmem:[#allocation2 + $0x8] sm:$0xff] %vm473_vm1, %v817_v42 }
 0x519   : > { %820 = vst.msk [vmem:[#allocation2] sm:$0xff] %vm473_vm1, %v816_v44 }
 0x51b   : > { %v2419_v45 = vpop.f32.mrb[12].mxu0 }
 0x51c   : > { %v801_v46 = vpop.f32.mrb[13].mxu0 }
 0x51d   : > { %v2420_v47 = vpop.f32.mrb[14].mxu0 }
 0x51e   : > { %v819_v48 = vpack.c.bf16 %v2420_v47, %v2419_v45  ;;  %v804_v49 = vpop.f32.mrb[15].mxu0 }
 0x51f   : > { %v818_v50 = vpack.c.bf16 %v804_v49, %v801_v46 }
 0x520   : > { %823 = vst.msk [vmem:[#allocation2 + $0x18] sm:$0xff] %vm473_vm1, %v819_v48 }
 0x521   : > { %822 = vst.msk [vmem:[#allocation2 + $0x10] sm:$0xff] %vm473_vm1, %v818_v50 }
 0x523   : > { %v2427_v52 = vpop.f32.mrb[8].mxu1 }
 0x524   : > { %v887_v54 = vpop.f32.mrb[9].mxu1  ;;  %v896_v59 = vadd.f32 %v2427_v52, %v827_v53 }
 0x525   : > { %v888_v56 = vadd.f32 %v887_v54, %v825_v51  ;;  %v2428_v57 = vpop.f32.mrb[10].mxu1 }
 0x526   : > { %v890_v58 = vpop.f32.mrb[11].mxu1  ;;  %v899_v1 = vadd.f32 %v2428_v57, %v828_v62  ;;  %v977_v3 = vsel %vm377_vm0, %v896_v59, -inf }
 0x527   : > { %v891_v60 = vadd.f32 %v890_v58, %v826_v55  ;;  %v971_v61 = vsel %vm377_vm0, %v888_v56, -inf }
 0x528   : > { %972 = vmax.xlane.f32.xlu0 %v971_v61  ;;  %v980_v12 = vsel %vm377_vm0, %v899_v1, -inf }
 0x529   : > { %v974_v63 = vsel %vm377_vm0, %v891_v60, -inf }
 0x52a   : > { %975 = vmax.xlane.f32.xlu1 %v974_v63 }
 0x52b   : > { %v2435_v2 = vpop.f32.mrb[16].mxu0 }
 0x52c   : > { %978 = vmax.xlane.f32.xlu0 %v977_v3  ;;  %v956_v5 = vpop.f32.mrb[17].mxu0  ;;  %v965_v10 = vadd.f32 %v2435_v2, %v831_v4 }
 0x52d   : > { %v957_v7 = vadd.f32 %v956_v5, %v829_v0  ;;  %v2436_v8 = vpop.f32.mrb[18].mxu0 }
 0x52e   : > { %v959_v9 = vpop.f32.mrb[19].mxu0  ;;  %v968_v15 = vadd.f32 %v2436_v8, %v832_v14  ;;  %v989_v17 = vsel %vm377_vm0, %v965_v10, -inf }
 0x52f   : > { %v960_v11 = vadd.f32 %v959_v9, %v830_v6  ;;  %v983_v13 = vsel %vm377_vm0, %v957_v7, -inf }
 0x530   : > { %981 = vmax.xlane.f32.xlu0 %v980_v12  ;;  %984 = vmax.xlane.f32.xlu1 %v983_v13  ;;  %v992_v18 = vsel %vm377_vm0, %v968_v15, -inf }
 0x531   : > { %v986_v16 = vsel %vm377_vm0, %v960_v11, -inf }
 0x534   : > { %987 = vmax.xlane.f32.xlu0 %v986_v16  ;;  %990 = vmax.xlane.f32.xlu1 %v989_v17 }
 0x538   : > { %993 = vmax.xlane.f32.xlu0 %v992_v18 }
 0x545   : > { %1063 = vrot.lane.b32.xlu1 %v3370_v24, %s3057_s11 }
 0x549   : > { %1124 = vrot.lane.b32.xlu1 %v3378_v34, %s3057_s11 }
 0x54d   : > { %1126 = vrot.lane.b32.xlu1 %v3376_v33, %s3057_s11 }
 0x54e   : > { %1065 = vrot.lane.b32.xlu0 %v3368_v23, %s3057_s11 }
 0x551   : > { %1225 = vrot.lane.b32.xlu1 %v3368_v23, %s3058_s13 }
 0x552   : > { %1223 = vrot.lane.b32.xlu0 %v3370_v24, %s3058_s13 }
 0x5b5   : > { %v973_v19 = vpop.xlane.xlu0 %972 }
 0x5b6   : > { %v995_v20 = vsub.f32 %v888_v56, %v973_v19 }
 0x5b7   : > { %v976_v21 = vpop.xlane.xlu1 %975 }
 0x5b8   : > { %v1003_v26 = vmul.f32 1.442695, %v995_v20  ;;  %v996_v28 = vsub.f32 %v891_v60, %v976_v21 }
 0x5b9   : > { %v979_v22 = vpop.xlane.xlu0 %978 }
 0x5ba   : > { %v997_v25 = vsub.f32 %v896_v59, %v979_v22  ;;  %v1005_v36 = vmul.f32 1.442695, %v996_v28 }
 0x5bc   : > { %v1007_v27 = vmul.f32 1.442695, %v997_v25 }
 0x5bd   : > { %v985_v29 = vpop.xlane.xlu1 %984  ;;  %v982_v30 = vpop.xlane.xlu0 %981 }
 0x5be   : > { %2697 = vpow2.f32 %v1007_v27  ;;  %v998_v31 = vsub.f32 %v899_v1, %v982_v30  ;;  %v999_v32 = vsub.f32 %v957_v7, %v985_v29 }
 0x5bf   : > { %2699 = vpow2.f32 %v1003_v26 }
 0x5c0   : > { %v1009_v35 = vmul.f32 1.442695, %v998_v31  ;;  %v1011_v40 = vmul.f32 1.442695, %v999_v32 }
 0x5c1   : > { %v991_v37 = vpop.xlane.xlu1 %990  ;;  %v988_v38 = vpop.xlane.xlu0 %987 }
 0x5c2   : > { %v1001_v39 = vsub.f32 %v965_v10, %v991_v37  ;;  %2701 = vpow2.f32 %v1009_v35  ;;  %v1000_v42 = vsub.f32 %v960_v11, %v988_v38 }
 0x5c3   : > { %2703 = vpow2.f32 %v1005_v36 }
 0x5c4   : > { %v1015_v41 = vmul.f32 1.442695, %v1001_v39  ;;  %v1013_v48 = vmul.f32 1.442695, %v1000_v42 }
 0x5c5   : > { %v1064_v43 = vpop.permute.xlu1 %1063  ;;  %v994_v44 = vpop.xlane.xlu0 %993 }
 0x5c6   : > { %2705 = vpow2.f32 %v1015_v41  ;;  %v1002_v45 = vsub.f32 %v968_v15, %v994_v44  ;;  %2437 = vmatprep.subr.bf16.mxu1 %v1064_v43 }
 0x5c7   : > { %2438 = vmatpush3.bf16.msra.mxu1 %v1064_v43  ;;  %2707 = vpow2.f32 %v1011_v40 }
 0x5c8   : > { %v3480_v46 = vpop.eup %2697  ;;  %v1017_v47 = vmul.f32 1.442695, %v1002_v45 }
 0x5c9   : > { %v1125_v49 = vpop.permute.xlu1 %1124  ;;  %v1066_v50 = vpop.permute.xlu0 %1065  ;;  %v1025_v51 = vsel %vm377_vm0, %v3480_v46, 0.0 }
 0x5ca   : > { %v3484_v52 = vpop.eup %2699  ;;  %2709 = vpow2.f32 %v1017_v47  ;;  %2445 = vmatprep.subr.bf16.mxu0 %v1125_v49  ;;  %1026 = vadd.xlane.f32.xlu1 %v1025_v51 }
 0x5cb   : > { %2439 = vmatprep.subr.bf16.mxu1 %v1066_v50  ;;  %2446 = vmatpush3.bf16.msra.mxu0 %v1125_v49  ;;  %2711 = vpow2.f32 %v1013_v48  ;;  %v1019_v56 = vsel %vm377_vm0, %v3484_v52, 0.0 }
 0x5cc   : > { %2440 = vmatpush3.bf16.msra.mxu1 %v1066_v50  ;;  %v2702_v53 = vpop.eup %2701 }
 0x5cd   : > { %v1127_v54 = vpop.permute.xlu1 %1126  ;;  %v1224_v55 = vpop.permute.xlu0 %1223  ;;  %v1028_v57 = vsel %vm377_vm0, %v2702_v53, 0.0 }
 0x5ce   : > { %2447 = vmatprep.subr.bf16.mxu0 %v1127_v54  ;;  %1020 = vadd.xlane.f32.xlu1 %v1019_v56  ;;  %v2704_v58 = vpop.eup %2703  ;;  %v1234_v28 = vsel %vm473_vm1, %v1224_v55, 0 }
 0x5cf   : > { %1029 = vadd.xlane.f32.xlu0 %v1028_v57  ;;  %2537 = vmatprep.subr.msk.bf16.mxu1 %vm473_vm1, %v1224_v55  ;;  %v1022_v62 = vsel %vm377_vm0, %v2704_v58, 0.0 }
 0x5d0   : > { %v3490_v59 = vpop.eup %2705  ;;  %2448 = vmatpush3.bf16.msra.mxu0 %v1127_v54 }
 0x5d1   : > { %v1037_v60 = vsel %vm377_vm0, %v3490_v59, 0.0  ;;  %v2708_v61 = vpop.eup %2707  ;;  %v1226_v4 = vpop.permute.xlu1 %1225 }
 0x5d2   : > { %1038 = vadd.xlane.f32.xlu1 %v1037_v60  ;;  %v1031_v0 = vsel %vm377_vm0, %v2708_v61, 0.0  ;;  %v1237_v41 = vsel %vm473_vm1, %v1226_v4, 0 }
 0x5d3   : > { %1023 = vadd.xlane.f32.xlu0 %v1022_v62 }
 0x5d4   : > { %v2710_v63 = vpop.eup %2709 }
 0x5d5   : > { %v1040_v1 = vsel %vm377_vm0, %v2710_v63, 0.0  ;;  %v2712_v2 = vpop.eup %2711 }
 0x5d6   : > { %1032 = vadd.xlane.f32.xlu1 %v1031_v0  ;;  %v1034_v3 = vsel %vm377_vm0, %v2712_v2, 0.0 }
 0x5d7   : > { %1041 = vadd.xlane.f32.xlu0 %v1040_v1 }
 0x5db   : > { %1035 = vadd.xlane.f32.xlu0 %v1034_v3 }
 0x5e7   : > { %1219 = vrot.lane.b32.xlu1 %v3370_v24, %s3059_s19 }
 0x5eb   : > { %1294 = vrot.lane.b32.xlu1 %v3376_v33, %s3058_s13 }
 0x5ef   : > { %1290 = vrot.lane.b32.xlu1 %v3376_v33, %s3059_s19 }
 0x5f1   : > { %1292 = vrot.lane.b32.xlu0 %v3378_v34, %s3058_s13  ;;  %s3735_s13 = scalar_lea.hbm %s3791_s6, %s2300_s15 }
 0x5f5   : > { %1221 = vrot.lane.b32.xlu0 %v3368_v23, %s3059_s19 }
 0x5f9   : > { %1288 = vrot.lane.b32.xlu0 %v3378_v34, %s3059_s19  ;;  %s2963_s19 = scalar_lea.vmem %s3738_s14, 1024 }
 0x5fa   : > { %p2964_p7 = scmp.ne.s32.totalorder %s3738_s14, %s2963_s19 }
 0x5fc   : > { %p2965_p12 = pnand %p2964_p7, %p3810_p4 }
 0x5fe   : > { %p2966_p13 = pneg %p2965_p12 }
 0x657   : > { %v1027_v5 = vpop.xlane.xlu1 %1026 }
 0x65b   : > { %v1021_v6 = vpop.xlane.xlu1 %1020 }
 0x65c   : > { %v1030_v7 = vpop.xlane.xlu0 %1029 }
 0x65d   : > { %2713 = vrcp.f32 %v1030_v7 }
 0x65e   : > { %2715 = vrcp.f32 %v1021_v6  ;;  %v1214_v6 = vld [vmem:[#allocation12 + $0x98] sm:$0xff] }
 0x65f   : > { %v1039_v8 = vpop.xlane.xlu1 %1038  ;;  %2717 = vrcp.f32 %v1027_v5 }
 0x660   : > { %v1024_v9 = vpop.xlane.xlu0 %1023 }
 0x661   : > { %2719 = vrcp.f32 %v1024_v9 }
 0x663   : > { %v1033_v10 = vpop.xlane.xlu1 %1032 }
 0x664   : > { %v1042_v11 = vpop.xlane.xlu0 %1041 }
 0x665   : > { %2721 = vrcp.f32 %v1042_v11 }
 0x666   : > { %2723 = vrcp.f32 %v1033_v10 }
 0x667   : > { %v2714_v12 = vpop.eup %2713  ;;  %2725 = vrcp.f32 %v1039_v8  ;;  %v1220_v29 = vpop.permute.xlu1 %1219  ;;  %v1215_v8 = vld [vmem:[#allocation12 + $0xa0] sm:$0xff] }
 0x668   : > { %v1036_v13 = vpop.xlane.xlu0 %1035  ;;  %v2716_v14 = vpop.eup %2715  ;;  %v1054_v17 = vmul.f32 %v2714_v12, %v2702_v53  ;;  %v1217_v12 = vld [vmem:[#allocation12 + $0xb0] sm:$0xff] }
 0x669   : > { %2727 = vrcp.f32 %v1036_v13  ;;  %v2718_v15 = vpop.eup %2717  ;;  %v1051_v19 = vmul.f32 %v2716_v14, %v3484_v52  ;;  %v1216_v14 = vld [vmem:[#allocation12 + $0xa8] sm:$0xff] }
 0x66a   : > { %v1053_v21 = vmul.f32 %v2718_v15, %v3480_v46 }
 0x66b   : > { %v2720_v16 = vpop.eup %2719  ;;  %v1295_v43 = vpop.permute.xlu1 %1294 }
 0x66c   : > { %v1293_v18 = vpop.permute.xlu0 %1292  ;;  %v1052_v20 = vmul.f32 %v2720_v16, %v2704_v58  ;;  %v1060_v25 = vpack.c.bf16 %v1054_v17, %v1053_v21  ;;  %v1306_v45 = vsel %vm473_vm1, %v1295_v43, 0 }
 0x66d   : > { %2539 = vmatprep.subr.msk.bf16.mxu0 %vm473_vm1, %v1293_v18  ;;  %v1303_v42 = vsel %vm473_vm1, %v1293_v18, 0 }
 0x66e   : > { %v1059_v22 = vpack.c.bf16 %v1052_v20, %v1051_v19 }
 0x66f   : > { %v2722_v26 = vpop.eup %2721  ;;  %v1291_v46 = vpop.permute.xlu1 %1290 }
 0x670   : > { %2441 = vmatprep.mubr.msk.bf16.mxu1 %vm377_vm0, %v1059_v22  ;;  %v2724_v27 = vpop.eup %2723  ;;  %v1058_v32 = vmul.f32 %v2722_v26, %v2710_v63  ;;  %v1222_v35 = vpop.permute.xlu0 %1221  ;;  %v1212_v63 = vld [vmem:[#allocation12 + $0x88] sm:$0xff]  ;;  %v1218_v22 = vld [vmem:[#allocation12 + $0xb8] sm:$0xff] }
 0x671   : > { %2442 = vmatmul.mubr.msk.bf16.vlgmr.msra.gmra.mrb[12].mxu1 %vm377_vm0, %v1060_v25  ;;  %v2726_v30 = vpop.eup %2725  ;;  %v1055_v36 = vmul.f32 %v2724_v27, %v2708_v61  ;;  %v1213_v61 = vld [vmem:[#allocation12 + $0x90] sm:$0xff] }
 0x672   : > { %2454 = vmatpush3.bf16.xpose.msra.mxu1 %v1234_v28  ;;  %2457 = vmatprep.mubr.msk.bf16.mxu1 %vm473_vm1, %v1220_v29  ;;  %v1057_v38 = vmul.f32 %v2726_v30, %v3490_v59  ;;  %v1211_v59 = vld [vmem:[#allocation12 + $0x80] sm:$0xff] }
 0x673   : > { %v2728_v31 = vpop.eup %2727  ;;  %2538 = vmatprep.subr.msk.bf16.mxu1 %vm473_vm1, %v1226_v4 }
 0x674   : > { %v1056_v37 = vmul.f32 %v2728_v31, %v2712_v2  ;;  %v1062_v40 = vpack.c.bf16 %v1058_v32, %v1057_v38  ;;  %v1289_v44 = vpop.permute.xlu0 %1288 }
 0x676   : > { %v1061_v39 = vpack.c.bf16 %v1056_v37, %v1055_v36 }
 0x678   : > { %2449 = vmatprep.mubr.msk.bf16.mxu0 %vm377_vm0, %v1061_v39 }
 0x679   : > { %2450 = vmatmul.mubr.msk.bf16.vlgmr.msra.gmra.mrb[20].mxu0 %vm377_vm0, %v1062_v40 }
 0x67a   : > { %2456 = vmatpush3.bf16.xpose.msra.mxu1 %v1237_v41  ;;  %2462 = vmatpush3.bf16.xpose.msra.mxu0 %v1303_v42 }
 0x67b   : > { %2540 = vmatprep.subr.msk.bf16.mxu0 %vm473_vm1, %v1295_v43  ;;  %2465 = vmatprep.mubr.msk.bf16.mxu0 %vm473_vm1, %v1289_v44 }
 0x681   : > { %2458 = vmatmul.mubr.msk.bf16.vlgmr.msra.gmra.mrb[16].mxu1 %vm473_vm1, %v1222_v35 }
 0x682   : > { %2464 = vmatpush3.bf16.xpose.msra.mxu0 %v1306_v45 }
 0x689   : > { %2466 = vmatmul.mubr.msk.bf16.vlgmr.msra.gmra.mrb[24].mxu0 %vm473_vm1, %v1291_v46 }
 0x744   : > { %v3524_v47 = vpop.f32.mrb[12].mxu1 }
 0x745   : > { %v3526_v48 = vpop.f32.mrb[13].mxu1 }
 0x746   : > { %v3528_v49 = vpop.f32.mrb[14].mxu1 }
 0x747   : > { %v1186_v50 = vpack.c.bf16 %v3528_v49, %v3524_v47  ;;  %v3532_v51 = vpop.f32.mrb[15].mxu1 }
 0x748   : > { %v1185_v52 = vpack.c.bf16 %v3532_v51, %v3526_v48 }
 0x74c   : > { %v3536_v53 = vpop.f32.mrb[20].mxu0 }
 0x74d   : > { %v3538_v54 = vpop.f32.mrb[21].mxu0 }
 0x74e   : > { %v3540_v55 = vpop.f32.mrb[22].mxu0 }
 0x74f   : > { %v1188_v56 = vpack.c.bf16 %v3540_v55, %v3536_v53  ;;  %v3544_v57 = vpop.f32.mrb[23].mxu0 }
 0x750   : > { %v1187_v58 = vpack.c.bf16 %v3544_v57, %v3538_v54 }
 0x754   : > { %v2459_v60 = vpop.f32.mrb[16].mxu1 }
 0x755   : > { %v1273_v62 = vpop.f32.mrb[17].mxu1  ;;  %v1282_v3 = vadd.f32 %v2459_v60, %v1213_v61 }
 0x756   : > { %v1274_v0 = vadd.f32 %v1273_v62, %v1211_v59  ;;  %v2460_v1 = vpop.f32.mrb[18].mxu1 }
 0x757   : > { %v1276_v2 = vpop.f32.mrb[19].mxu1  ;;  %v1285_v9 = vadd.f32 %v2460_v1, %v1214_v6  ;;  %v1363_v11 = vsel %vm377_vm0, %v1282_v3, -inf }
 0x758   : > { %v1277_v4 = vadd.f32 %v1276_v2, %v1212_v63  ;;  %v1357_v5 = vsel %vm377_vm0, %v1274_v0, -inf }
 0x759   : > { %1358 = vmax.xlane.f32.xlu0 %v1357_v5  ;;  %v1366_v20 = vsel %vm377_vm0, %v1285_v9, -inf }
 0x75a   : > { %v1360_v7 = vsel %vm377_vm0, %v1277_v4, -inf }
 0x75b   : > { %1361 = vmax.xlane.f32.xlu1 %v1360_v7 }
 0x75c   : > { %v2467_v10 = vpop.f32.mrb[24].mxu0 }
 0x75d   : > { %1364 = vmax.xlane.f32.xlu0 %v1363_v11  ;;  %v1342_v13 = vpop.f32.mrb[25].mxu0  ;;  %v1351_v18 = vadd.f32 %v2467_v10, %v1217_v12 }
 0x75e   : > { %v1343_v15 = vadd.f32 %v1342_v13, %v1215_v8  ;;  %v2468_v16 = vpop.f32.mrb[26].mxu0 }
 0x75f   : > { %v1345_v17 = vpop.f32.mrb[27].mxu0  ;;  %v1354_v25 = vadd.f32 %v2468_v16, %v1218_v22  ;;  %v1375_v27 = vsel %vm377_vm0, %v1351_v18, -inf }
 0x760   : > { %v1346_v19 = vadd.f32 %v1345_v17, %v1216_v14  ;;  %v1369_v21 = vsel %vm377_vm0, %v1343_v15, -inf }
 0x761   : > { %1367 = vmax.xlane.f32.xlu0 %v1366_v20  ;;  %1370 = vmax.xlane.f32.xlu1 %v1369_v21  ;;  %v1378_v28 = vsel %vm377_vm0, %v1354_v25, -inf }
 0x762   : > { %v1372_v26 = vsel %vm377_vm0, %v1346_v19, -inf }
 0x765   : > { %1373 = vmax.xlane.f32.xlu0 %v1372_v26  ;;  %1376 = vmax.xlane.f32.xlu1 %v1375_v27 }
 0x769   : > { %1379 = vmax.xlane.f32.xlu0 %v1378_v28 }
 0x776   : > { %1449 = vrot.lane.b32.xlu1 %v3370_v24, %s3060_s16 }
 0x77a   : > { %1510 = vrot.lane.b32.xlu1 %v3378_v34, %s3060_s16 }
 0x77e   : > { %1512 = vrot.lane.b32.xlu1 %v3376_v33, %s3060_s16 }
 0x77f   : > { %1451 = vrot.lane.b32.xlu0 %v3368_v23, %s3060_s16  ;;  %s3067_s16 = smov [#allocation14]  }
 0x782   : > { %1611 = vrot.lane.b32.xlu1 %v3368_v23, %s3061_s25 }
 0x783   : > { %1609 = vrot.lane.b32.xlu0 %v3370_v24, %s3061_s25 }
 0x7e6   : > { %v1359_v29 = vpop.xlane.xlu0 %1358 }
 0x7e7   : > { %v1381_v30 = vsub.f32 %v1274_v0, %v1359_v29 }
 0x7e8   : > { %v1362_v31 = vpop.xlane.xlu1 %1361 }
 0x7e9   : > { %v1389_v36 = vmul.f32 1.442695, %v1381_v30  ;;  %v1382_v38 = vsub.f32 %v1277_v4, %v1362_v31 }
 0x7ea   : > { %v1365_v32 = vpop.xlane.xlu0 %1364 }
 0x7eb   : > { %v1383_v35 = vsub.f32 %v1282_v3, %v1365_v32  ;;  %v1391_v44 = vmul.f32 1.442695, %v1382_v38 }
 0x7ed   : > { %v1393_v37 = vmul.f32 1.442695, %v1383_v35 }
 0x7ee   : > { %v1371_v39 = vpop.xlane.xlu1 %1370  ;;  %v1368_v40 = vpop.xlane.xlu0 %1367 }
 0x7ef   : > { %2729 = vpow2.f32 %v1393_v37  ;;  %v1384_v41 = vsub.f32 %v1285_v9, %v1368_v40  ;;  %v1385_v42 = vsub.f32 %v1343_v15, %v1371_v39 }
 0x7f0   : > { %2731 = vpow2.f32 %v1389_v36 }
 0x7f1   : > { %v1395_v43 = vmul.f32 1.442695, %v1384_v41  ;;  %v1397_v60 = vmul.f32 1.442695, %v1385_v42 }
 0x7f2   : > { %v1377_v45 = vpop.xlane.xlu1 %1376  ;;  %v1374_v46 = vpop.xlane.xlu0 %1373 }
 0x7f3   : > { %v1387_v59 = vsub.f32 %v1351_v18, %v1377_v45  ;;  %2733 = vpow2.f32 %v1395_v43  ;;  %v1386_v62 = vsub.f32 %v1346_v19, %v1374_v46 }
 0x7f4   : > { %2735 = vpow2.f32 %v1391_v44 }
 0x7f5   : > { %v1401_v61 = vmul.f32 1.442695, %v1387_v59  ;;  %v1399_v4 = vmul.f32 1.442695, %v1386_v62 }
 0x7f6   : > { %v1450_v63 = vpop.permute.xlu1 %1449  ;;  %v1380_v0 = vpop.xlane.xlu0 %1379 }
 0x7f7   : > { %2737 = vpow2.f32 %v1401_v61  ;;  %v1388_v1 = vsub.f32 %v1354_v25, %v1380_v0  ;;  %2469 = vmatprep.subr.bf16.mxu1 %v1450_v63 }
 0x7f8   : > { %2470 = vmatpush3.bf16.msra.mxu1 %v1450_v63  ;;  %2739 = vpow2.f32 %v1397_v60 }
 0x7f9   : > { %v3564_v2 = vpop.eup %2729  ;;  %v1403_v3 = vmul.f32 1.442695, %v1388_v1 }
 0x7fa   : > { %v1511_v5 = vpop.permute.xlu1 %1510  ;;  %v1452_v6 = vpop.permute.xlu0 %1451  ;;  %v1411_v7 = vsel %vm377_vm0, %v3564_v2, 0.0 }
 0x7fb   : > { %v3568_v8 = vpop.eup %2731  ;;  %2741 = vpow2.f32 %v1403_v3  ;;  %2477 = vmatprep.subr.bf16.mxu0 %v1511_v5  ;;  %1412 = vadd.xlane.f32.xlu1 %v1411_v7 }
 0x7fc   : > { %2471 = vmatprep.subr.bf16.mxu1 %v1452_v6  ;;  %2478 = vmatpush3.bf16.msra.mxu0 %v1511_v5  ;;  %2743 = vpow2.f32 %v1399_v4  ;;  %v1405_v12 = vsel %vm377_vm0, %v3568_v8, 0.0 }
 0x7fd   : > { %2472 = vmatpush3.bf16.msra.mxu1 %v1452_v6  ;;  %v2734_v9 = vpop.eup %2733 }
 0x7fe   : > { %v1513_v10 = vpop.permute.xlu1 %1512  ;;  %v1610_v11 = vpop.permute.xlu0 %1609  ;;  %v1414_v13 = vsel %vm377_vm0, %v2734_v9, 0.0 }
 0x7ff   : > { %2479 = vmatprep.subr.bf16.mxu0 %v1513_v10  ;;  %1406 = vadd.xlane.f32.xlu1 %v1405_v12  ;;  %v2736_v14 = vpop.eup %2735  ;;  %v1620_v62 = vsel %vm473_vm1, %v1610_v11, 0 }
 0x800   : > { %1415 = vadd.xlane.f32.xlu0 %v1414_v13  ;;  %2541 = vmatprep.subr.msk.bf16.mxu1 %vm473_vm1, %v1610_v11  ;;  %v1408_v18 = vsel %vm377_vm0, %v2736_v14, 0.0 }
 0x801   : > { %v3574_v15 = vpop.eup %2737  ;;  %2480 = vmatpush3.bf16.msra.mxu0 %v1513_v10 }
 0x802   : > { %v1423_v16 = vsel %vm377_vm0, %v3574_v15, 0.0  ;;  %v2740_v17 = vpop.eup %2739  ;;  %v1612_v26 = vpop.permute.xlu1 %1611 }
 0x803   : > { %1424 = vadd.xlane.f32.xlu1 %v1423_v16  ;;  %v1417_v20 = vsel %vm377_vm0, %v2740_v17, 0.0 }
 0x804   : > { %1409 = vadd.xlane.f32.xlu0 %v1408_v18 }
 0x805   : > { %v2742_v19 = vpop.eup %2741 }
 0x806   : > { %v1426_v21 = vsel %vm377_vm0, %v2742_v19, 0.0  ;;  %v2744_v22 = vpop.eup %2743 }
 0x807   : > { %1418 = vadd.xlane.f32.xlu1 %v1417_v20  ;;  %v1420_v25 = vsel %vm377_vm0, %v2744_v22, 0.0 }
 0x808   : > { %1427 = vadd.xlane.f32.xlu0 %v1426_v21 }
 0x80c   : > { %1421 = vadd.xlane.f32.xlu0 %v1420_v25 }
 0x818   : > { %1605 = vrot.lane.b32.xlu1 %v3370_v24, %s3062_s29 }
 0x81c   : > { %1680 = vrot.lane.b32.xlu1 %v3376_v33, %s3061_s25 }
 0x820   : > { %1676 = vrot.lane.b32.xlu1 %v3376_v33, %s3062_s29 }
 0x822   : > { %1678 = vrot.lane.b32.xlu0 %v3378_v34, %s3061_s25  ;;  %s2967_s25 = sshll.u32 %s3067_s16, 4  ;;  %s2968_s25 = int_to_ptr.vmem [resolvable:$false] %s2967_s25 }
 0x823   : > { %p2970_p1 = scmp.lt.s32.totalorder %s3738_s14, %s2968_s25 }
 0x826   : > { %1607 = vrot.lane.b32.xlu0 %v3368_v23, %s3062_s29 }
 0x82a   : > { %1674 = vrot.lane.b32.xlu0 %v3378_v34, %s3062_s29  ;;  %s2969_s29 = scalar_lea.vmem %s2968_s25, 2048 }
 0x82b   : > { %p2971_p3 = scmp.lt.s32.totalorder %s2969_s29, %s2963_s19 }
 0x82d   : > { %p2972_p2 = por %p2971_p3, %p2970_p1 }
 0x82f   : > { %p2973_p8 = pnand %p2972_p2, %p2966_p13 }
 0x888   : > { %v1413_v27 = vpop.xlane.xlu1 %1412 }
 0x88c   : > { %v1407_v28 = vpop.xlane.xlu1 %1406 }
 0x88d   : > { %v1416_v29 = vpop.xlane.xlu0 %1415 }
 0x88e   : > { %2745 = vrcp.f32 %v1416_v29  ;;  %v1597_v29 = vld [vmem:[#allocation12 + $0xc0] sm:$0xff] }
 0x88f   : > { %2747 = vrcp.f32 %v1407_v28 }
 0x890   : > { %v1425_v30 = vpop.xlane.xlu1 %1424  ;;  %2749 = vrcp.f32 %v1413_v27 }
 0x891   : > { %v1410_v31 = vpop.xlane.xlu0 %1409 }
 0x892   : > { %2751 = vrcp.f32 %v1410_v31  ;;  %v1599_v31 = vld [vmem:[#allocation12 + $0xd0] sm:$0xff] }
 0x894   : > { %v1419_v32 = vpop.xlane.xlu1 %1418 }
 0x895   : > { %v1428_v35 = vpop.xlane.xlu0 %1427 }
 0x896   : > { %2753 = vrcp.f32 %v1428_v35  ;;  %v1598_v35 = vld [vmem:[#allocation12 + $0xc8] sm:$0xff] }
 0x897   : > { %2755 = vrcp.f32 %v1419_v32 }
 0x898   : > { %v2746_v36 = vpop.eup %2745  ;;  %2757 = vrcp.f32 %v1425_v30  ;;  %v1606_v63 = vpop.permute.xlu1 %1605 }
 0x899   : > { %v1422_v37 = vpop.xlane.xlu0 %1421  ;;  %v2748_v38 = vpop.eup %2747  ;;  %v1440_v41 = vmul.f32 %v2746_v36, %v2734_v9  ;;  %v1623_v9 = vsel %vm473_vm1, %v1612_v26, 0 }
 0x89a   : > { %2759 = vrcp.f32 %v1422_v37  ;;  %v2750_v39 = vpop.eup %2749  ;;  %v1437_v43 = vmul.f32 %v2748_v38, %v3568_v8 }
 0x89b   : > { %v1439_v45 = vmul.f32 %v2750_v39, %v3564_v2 }
 0x89c   : > { %v2752_v40 = vpop.eup %2751  ;;  %v1681_v11 = vpop.permute.xlu1 %1680 }
 0x89d   : > { %v1679_v42 = vpop.permute.xlu0 %1678  ;;  %v1438_v44 = vmul.f32 %v2752_v40, %v2736_v14  ;;  %v1446_v59 = vpack.c.bf16 %v1440_v41, %v1439_v45  ;;  %v1692_v13 = vsel %vm473_vm1, %v1681_v11, 0 }
 0x89e   : > { %2543 = vmatprep.subr.msk.bf16.mxu0 %vm473_vm1, %v1679_v42  ;;  %v1689_v10 = vsel %vm473_vm1, %v1679_v42, 0  ;;  %v1600_v42 = vld [vmem:[#allocation12 + $0xd8] sm:$0xff] }
 0x89f   : > { %v1445_v46 = vpack.c.bf16 %v1438_v44, %v1437_v43  ;;  %v1601_v44 = vld [vmem:[#allocation12 + $0xe0] sm:$0xff] }
 0x8a0   : > { %v2754_v60 = vpop.eup %2753  ;;  %v1677_v14 = vpop.permute.xlu1 %1676 }
 0x8a1   : > { %2473 = vmatprep.mubr.msk.bf16.mxu1 %vm377_vm0, %v1445_v46  ;;  %v2756_v61 = vpop.eup %2755  ;;  %v1444_v3 = vmul.f32 %v2754_v60, %v2742_v19  ;;  %v1608_v2 = vpop.permute.xlu0 %1607  ;;  %v1603_v60 = vld [vmem:[#allocation12 + $0xf0] sm:$0xff] }
 0x8a2   : > { %2474 = vmatmul.mubr.msk.bf16.vlgmr.msra.gmra.mrb[20].mxu1 %vm377_vm0, %v1446_v59  ;;  %v2758_v0 = vpop.eup %2757  ;;  %v1441_v4 = vmul.f32 %v2756_v61, %v2740_v17 }
 0x8a3   : > { %2486 = vmatpush3.bf16.xpose.msra.mxu1 %v1620_v62  ;;  %2489 = vmatprep.mubr.msk.bf16.mxu1 %vm473_vm1, %v1606_v63  ;;  %v1443_v6 = vmul.f32 %v2758_v0, %v3574_v15  ;;  %v1602_v62 = vld [vmem:[#allocation12 + $0xe8] sm:$0xff] }
 0x8a4   : > { %v2760_v1 = vpop.eup %2759  ;;  %2542 = vmatprep.subr.msk.bf16.mxu1 %vm473_vm1, %v1612_v26 }
 0x8a5   : > { %v1442_v5 = vmul.f32 %v2760_v1, %v2744_v22  ;;  %v1448_v8 = vpack.c.bf16 %v1444_v3, %v1443_v6  ;;  %v1675_v12 = vpop.permute.xlu0 %1674  ;;  %v1604_v6 = vld [vmem:[#allocation12 + $0xf8] sm:$0xff] }
 0x8a7   : > { %v1447_v7 = vpack.c.bf16 %v1442_v5, %v1441_v4 }
 0x8a9   : > { %2481 = vmatprep.mubr.msk.bf16.mxu0 %vm377_vm0, %v1447_v7 }
 0x8aa   : > { %2482 = vmatmul.mubr.msk.bf16.vlgmr.msra.gmra.mrb[28].mxu0 %vm377_vm0, %v1448_v8 }
 0x8ab   : > { %2488 = vmatpush3.bf16.xpose.msra.mxu1 %v1623_v9  ;;  %2494 = vmatpush3.bf16.xpose.msra.mxu0 %v1689_v10 }
 0x8ac   : > { %2544 = vmatprep.subr.msk.bf16.mxu0 %vm473_vm1, %v1681_v11  ;;  %2497 = vmatprep.mubr.msk.bf16.mxu0 %vm473_vm1, %v1675_v12 }
 0x8b2   : > { %2490 = vmatmul.mubr.msk.bf16.vlgmr.msra.gmra.mrb[24].mxu1 %vm473_vm1, %v1608_v2 }
 0x8b3   : > { %2496 = vmatpush3.bf16.xpose.msra.mxu0 %v1692_v13 }
 0x8ba   : > { %2498 = vmatmul.mubr.msk.bf16.vlgmr.msra.gmra.mrb[32].mxu0 %vm473_vm1, %v1677_v14 }
 0x975   : > { %v3608_v15 = vpop.f32.mrb[20].mxu1 }
 0x976   : > { %v3610_v16 = vpop.f32.mrb[21].mxu1 }
 0x977   : > { %v3612_v17 = vpop.f32.mrb[22].mxu1 }
 0x978   : > { %v1572_v18 = vpack.c.bf16 %v3612_v17, %v3608_v15  ;;  %v3616_v19 = vpop.f32.mrb[23].mxu1 }
 0x979   : > { %v1571_v20 = vpack.c.bf16 %v3616_v19, %v3610_v16 }
 0x97d   : > { %v3620_v21 = vpop.f32.mrb[28].mxu0 }
 0x97e   : > { %v3622_v22 = vpop.f32.mrb[29].mxu0 }
 0x97f   : > { %v3624_v25 = vpop.f32.mrb[30].mxu0 }
 0x980   : > { %v1574_v26 = vpack.c.bf16 %v3624_v25, %v3620_v21  ;;  %v3628_v27 = vpop.f32.mrb[31].mxu0 }
 0x981   : > { %v1573_v28 = vpack.c.bf16 %v3628_v27, %v3622_v22 }
 0x985   : > { %v2491_v30 = vpop.f32.mrb[24].mxu1 }
 0x986   : > { %v1659_v32 = vpop.f32.mrb[25].mxu1  ;;  %v1668_v39 = vadd.f32 %v2491_v30, %v1599_v31 }
 0x987   : > { %v1660_v36 = vadd.f32 %v1659_v32, %v1597_v29  ;;  %v2492_v37 = vpop.f32.mrb[26].mxu1 }
 0x988   : > { %v1662_v38 = vpop.f32.mrb[27].mxu1  ;;  %v1671_v45 = vadd.f32 %v2492_v37, %v1600_v42  ;;  %v1749_v59 = vsel %vm377_vm0, %v1668_v39, -inf }
 0x989   : > { %v1663_v40 = vadd.f32 %v1662_v38, %v1598_v35  ;;  %v1743_v41 = vsel %vm377_vm0, %v1660_v36, -inf }
 0x98a   : > { %1744 = vmax.xlane.f32.xlu0 %v1743_v41  ;;  %v1752_v4 = vsel %vm377_vm0, %v1671_v45, -inf }
 0x98b   : > { %v1746_v43 = vsel %vm377_vm0, %v1663_v40, -inf }
 0x98c   : > { %1747 = vmax.xlane.f32.xlu1 %v1746_v43 }
 0x98d   : > { %v2499_v46 = vpop.f32.mrb[32].mxu0 }
 0x98e   : > { %1750 = vmax.xlane.f32.xlu0 %v1749_v59  ;;  %v1728_v61 = vpop.f32.mrb[33].mxu0  ;;  %v1737_v3 = vadd.f32 %v2499_v46, %v1603_v60 }
 0x98f   : > { %v1729_v63 = vadd.f32 %v1728_v61, %v1601_v44  ;;  %v2500_v0 = vpop.f32.mrb[34].mxu0 }
 0x990   : > { %v1731_v1 = vpop.f32.mrb[35].mxu0  ;;  %v1740_v7 = vadd.f32 %v2500_v0, %v1604_v6  ;;  %v1761_v9 = vsel %vm377_vm0, %v1737_v3, -inf }
 0x991   : > { %v1732_v2 = vadd.f32 %v1731_v1, %v1602_v62  ;;  %v1755_v5 = vsel %vm377_vm0, %v1729_v63, -inf }
 0x992   : > { %1753 = vmax.xlane.f32.xlu0 %v1752_v4  ;;  %1756 = vmax.xlane.f32.xlu1 %v1755_v5  ;;  %v1764_v10 = vsel %vm377_vm0, %v1740_v7, -inf }
 0x993   : > { %v1758_v8 = vsel %vm377_vm0, %v1732_v2, -inf }
 0x996   : > { %1759 = vmax.xlane.f32.xlu0 %v1758_v8  ;;  %1762 = vmax.xlane.f32.xlu1 %v1761_v9 }
 0x99a   : > { %1765 = vmax.xlane.f32.xlu0 %v1764_v10 }
 0x9a7   : > { %1835 = vrot.lane.b32.xlu1 %v3370_v24, %s3063_s10 }
 0xa17   : > { %v1745_v11 = vpop.xlane.xlu0 %1744 }
 0xa18   : > { %v1767_v12 = vsub.f32 %v1660_v36, %v1745_v11 }
 0xa19   : > { %v1748_v13 = vpop.xlane.xlu1 %1747 }
 0xa1a   : > { %v1775_v30 = vmul.f32 1.442695, %v1767_v12  ;;  %v1768_v32 = vsub.f32 %v1663_v40, %v1748_v13 }
 0xa1b   : > { %v1751_v14 = vpop.xlane.xlu0 %1750 }
 0xa1c   : > { %v1769_v29 = vsub.f32 %v1668_v39, %v1751_v14  ;;  %v1777_v43 = vmul.f32 1.442695, %v1768_v32 }
 0xa1e   : > { %v1779_v31 = vmul.f32 1.442695, %v1769_v29 }
 0xa1f   : > { %v1757_v35 = vpop.xlane.xlu1 %1756  ;;  %v1754_v37 = vpop.xlane.xlu0 %1753 }
 0xa20   : > { %2761 = vpow2.f32 %v1779_v31  ;;  %v1770_v38 = vsub.f32 %v1671_v45, %v1754_v37  ;;  %v1771_v41 = vsub.f32 %v1729_v63, %v1757_v35 }
 0xa21   : > { %2763 = vpow2.f32 %v1775_v30 }
 0xa22   : > { %v1781_v42 = vmul.f32 1.442695, %v1770_v38  ;;  %v1783_v24 = vmul.f32 1.442695, %v1771_v41 }
 0xa23   : > { %v1763_v44 = vpop.xlane.xlu1 %1762  ;;  %v1760_v46 = vpop.xlane.xlu0 %1759 }
 0xa24   : > { %v1773_v59 = vsub.f32 %v1737_v3, %v1763_v44  ;;  %2765 = vpow2.f32 %v1781_v42  ;;  %v1772_v60 = vsub.f32 %v1732_v2, %v1760_v46 }
 0xa25   : > { %2767 = vpow2.f32 %v1777_v43 }
 0xa26   : > { %v1787_v36 = vmul.f32 1.442695, %v1773_v59  ;;  %v1785_v63 = vmul.f32 1.442695, %v1772_v60 }
 0xa27   : > { %v1836_v39 = vpop.permute.xlu1 %1835  ;;  %v1766_v61 = vpop.xlane.xlu0 %1765 }
 0xa28   : > { %2769 = vpow2.f32 %v1787_v36  ;;  %v1774_v40 = vsub.f32 %v1740_v7, %v1766_v61  ;;  %2501 = vmatprep.subr.bf16.mxu1 %v1836_v39  ;;  %v2664_v61 = vld [vmem:[#allocation9 + $0x8] sm:$0xff]  }
 0xa29   : > { %2502 = vmatpush3.bf16.msra.mxu1 %v1836_v39  ;;  %2771 = vpow2.f32 %v1783_v24  ;;  %v2663_v39 = vld [vmem:[#allocation9] sm:$0xff]  }
 0xa2a   : > { %v3642_v62 = vpop.eup %2761  ;;  %v1789_v45 = vmul.f32 1.442695, %v1774_v40 }
 0xa2b   : > { %v1797_v0 = vsel %vm377_vm0, %v3642_v62, 0.0  ;;  %v2764_v1 = vpop.eup %2763 }
 0xa2c   : > { %2773 = vpow2.f32 %v1789_v45  ;;  %1798 = vadd.xlane.f32.xlu1 %v1797_v0  ;;  %v1791_v2 = vsel %vm377_vm0, %v2764_v1, 0.0 }
 0xa2d   : > { %2775 = vpow2.f32 %v1785_v63 }
 0xa2e   : > { %v2766_v3 = vpop.eup %2765 }
 0xa2f   : > { %v1800_v4 = vsel %vm377_vm0, %v2766_v3, 0.0  ;;  %v2768_v5 = vpop.eup %2767 }
 0xa30   : > { %1792 = vadd.xlane.f32.xlu1 %v1791_v2  ;;  %1801 = vadd.xlane.f32.xlu0 %v1800_v4  ;;  %v1794_v9 = vsel %vm377_vm0, %v2768_v5, 0.0 }
 0xa32   : > { %v3648_v6 = vpop.eup %2769 }
 0xa33   : > { %v1809_v7 = vsel %vm377_vm0, %v3648_v6, 0.0  ;;  %v3652_v8 = vpop.eup %2771 }
 0xa34   : > { %1810 = vadd.xlane.f32.xlu1 %v1809_v7  ;;  %1795 = vadd.xlane.f32.xlu0 %v1794_v9  ;;  %v1803_v11 = vsel %vm377_vm0, %v3652_v8, 0.0 }
 0xa36   : > { %v3655_v10 = vpop.eup %2773 }
 0xa37   : > { %v1812_v12 = vsel %vm377_vm0, %v3655_v10, 0.0  ;;  %v3661_v13 = vpop.eup %2775 }
 0xa38   : > { %1804 = vadd.xlane.f32.xlu1 %v1803_v11  ;;  %1813 = vadd.xlane.f32.xlu0 %v1812_v12  ;;  %v1806_v14 = vsel %vm377_vm0, %v3661_v13, 0.0  ;;  %v2287_v12 = vld [vmem:[#allocation11] ss:$0 sm:$0xff] }
 0xa3c   : > { %1807 = vadd.xlane.f32.xlu0 %v1806_v14 }
 0xa49   : > { %1896 = vrot.lane.b32.xlu1 %v3378_v34, %s3063_s10 }
 0xa4d   : > { %1898 = vrot.lane.b32.xlu1 %v3376_v33, %s3063_s10 }
 0xa51   : > { %1195 = vrot.lane.b32.xlu1 %v1186_v50, %s3064_s12 }
 0xa52   : > { %1837 = vrot.lane.b32.xlu0 %v3368_v23, %s3063_s10 }
 0xa55   : > { %1581 = vrot.lane.b32.xlu1 %v1572_v18, %s3065_s9 }
 0xa56   : > { %1193 = vrot.lane.b32.xlu0 %v1185_v52, %s3064_s12 }
 0xa59   : > { %1199 = vrot.lane.b32.xlu1 %v1188_v56, %s3064_s12 }
 0xa5a   : > { %1579 = vrot.lane.b32.xlu0 %v1571_v20, %s3065_s9 }
 0xa5e   : > { %1197 = vrot.lane.b32.xlu0 %v1187_v58, %s3064_s12 }
 0xab9   : > { %v1799_v23 = vpop.xlane.xlu1 %1798 }
 0xabd   : > { %v1793_v33 = vpop.xlane.xlu1 %1792  ;;  %v1802_v34 = vpop.xlane.xlu0 %1801 }
 0xabe   : > { %2777 = vrcp.f32 %v1802_v34 }
 0xabf   : > { %2779 = vrcp.f32 %v1793_v33 }
 0xac0   : > { %2781 = vrcp.f32 %v1799_v23 }
 0xac1   : > { %v1811_v47 = vpop.xlane.xlu1 %1810  ;;  %v1796_v48 = vpop.xlane.xlu0 %1795 }
 0xac2   : > { %2783 = vrcp.f32 %v1796_v48 }
 0xac5   : > { %v1805_v49 = vpop.xlane.xlu1 %1804  ;;  %v1814_v50 = vpop.xlane.xlu0 %1813 }
 0xac6   : > { %2785 = vrcp.f32 %v1814_v50 }
 0xac7   : > { %2787 = vrcp.f32 %v1805_v49 }
 0xac8   : > { %v2778_v52 = vpop.eup %2777  ;;  %2789 = vrcp.f32 %v1811_v47 }
 0xac9   : > { %v1897_v51 = vpop.permute.xlu1 %1896  ;;  %v1808_v53 = vpop.xlane.xlu0 %1807  ;;  %v1826_v57 = vmul.f32 %v2778_v52, %v2766_v3 }
 0xaca   : > { %2509 = vmatprep.subr.bf16.mxu0 %v1897_v51  ;;  %v2780_v54 = vpop.eup %2779  ;;  %2791 = vrcp.f32 %v1808_v53 }
 0xacb   : > { %2510 = vmatpush3.bf16.msra.mxu0 %v1897_v51  ;;  %v2782_v55 = vpop.eup %2781  ;;  %v1823_v16 = vmul.f32 %v2780_v54, %v2764_v1 }
 0xacc   : > { %v2784_v56 = vpop.eup %2783  ;;  %v1825_v18 = vmul.f32 %v2782_v55, %v3642_v62 }
 0xacd   : > { %v1899_v58 = vpop.permute.xlu1 %1898  ;;  %v1838_v15 = vpop.permute.xlu0 %1837  ;;  %v1824_v17 = vmul.f32 %v2784_v56, %v2768_v5 }
 0xace   : > { %2511 = vmatprep.subr.bf16.mxu0 %v1899_v58  ;;  %2503 = vmatprep.subr.bf16.mxu1 %v1838_v15  ;;  %v1832_v29 = vpack.c.bf16 %v1826_v57, %v1825_v18 }
 0xacf   : > { %2512 = vmatpush3.bf16.msra.mxu0 %v1899_v58  ;;  %2504 = vmatpush3.bf16.msra.mxu1 %v1838_v15  ;;  %v1831_v19 = vpack.c.bf16 %v1824_v17, %v1823_v16 }
 0xad0   : > { %v2786_v30 = vpop.eup %2785  ;;  %2517 = vmatprep.subr.bf16.mxu1 %v2663_v39 }
 0xad1   : > { %v1196_v20 = vpop.permute.xlu1 %1195  ;;  %2505 = vmatprep.mubr.msk.bf16.mxu1 %vm377_vm0, %v1831_v19  ;;  %v1194_v31 = vpop.permute.xlu0 %1193  ;;  %v1830_v38 = vmul.f32 %v2786_v30, %v3655_v10 }
 0xad2   : > { %1207 = vst.msk [vmem:[#allocation2 + $0x8] sm:$0xff] %vm1205_vm2, %v1196_v20  ;;  %v2788_v32 = vpop.eup %2787  ;;  %1206 = vst.msk [vmem:[#allocation2] sm:$0xff] %vm1205_vm2, %v1194_v31  ;;  %2506 = vmatmul.mubr.msk.bf16.vlgmr.msra.gmra.mrb[28].mxu1 %vm377_vm0, %v1832_v29 }
 0xad3   : > { %v2790_v35 = vpop.eup %2789  ;;  %v1827_v43 = vmul.f32 %v2788_v32, %v3652_v8  ;;  %2518 = vmatpush3.bf16.msra.mxu1 %v2663_v39 }
 0xad4   : > { %v2792_v37 = vpop.eup %2791  ;;  %v1829_v46 = vmul.f32 %v2790_v35, %v3648_v6  ;;  %2519 = vmatprep.subr.bf16.mxu1 %v2664_v61 }
 0xad5   : > { %v1582_v41 = vpop.permute.xlu1 %1581  ;;  %v1580_v42 = vpop.permute.xlu0 %1579  ;;  %v1828_v44 = vmul.f32 %v2792_v37, %v3661_v13 }
 0xad6   : > { %1593 = vst.msk [vmem:[#allocation2 + $0x8] sm:$0xff] %vm1591_vm3, %v1582_v41  ;;  %1592 = vst.msk [vmem:[#allocation2] sm:$0xff] %vm1591_vm3, %v1580_v42  ;;  %v1834_v36 = vpack.c.bf16 %v1830_v38, %v1829_v46 }
 0xad7   : > { %v1833_v59 = vpack.c.bf16 %v1828_v44, %v1827_v43  ;;  %2520 = vmatpush3.bf16.msra.mxu1 %v2664_v61 }
 0xad9   : > { %v1200_v24 = vpop.permute.xlu1 %1199  ;;  %2513 = vmatprep.mubr.msk.bf16.mxu0 %vm377_vm0, %v1833_v59  ;;  %v1198_v60 = vpop.permute.xlu0 %1197 }
 0xada   : > { %1209 = vst.msk [vmem:[#allocation2 + $0x18] sm:$0xff] %vm1205_vm2, %v1200_v24  ;;  %1208 = vst.msk [vmem:[#allocation2 + $0x10] sm:$0xff] %vm1205_vm2, %v1198_v60  ;;  %2514 = vmatmul.mubr.msk.bf16.vlgmr.msra.gmra.mrb[36].mxu0 %vm377_vm0, %v1834_v36 }
 0xba5   : > { %v2507_v40 = vpop.f32.mrb[28].mxu1 }
 0xba6   : > { %v1881_v62 = vpop.f32.mrb[29].mxu1 }
 0xba7   : > { %v2508_v45 = vpop.f32.mrb[30].mxu1 }
 0xba8   : > { %v1958_v63 = vpack.c.bf16 %v2508_v45, %v2507_v40  ;;  %v1884_v0 = vpop.f32.mrb[31].mxu1 }
 0xba9   : > { %v1957_v1 = vpack.c.bf16 %v1884_v0, %v1881_v62 }
 0xbaa   : > { %1967 = vrot.lane.b32.xlu1 %v1958_v63, %s3066_s28 }
 0xbab   : > { %1965 = vrot.lane.b32.xlu0 %v1957_v1, %s3066_s28 }
 0xbad   : > { %v2515_v3 = vpop.f32.mrb[36].mxu0 }
 0xbae   : > { %v1942_v2 = vpop.f32.mrb[37].mxu0  ;;  %1585 = vrot.lane.b32.xlu1 %v1574_v26, %s3065_s9 }
 0xbaf   : > { %v2516_v4 = vpop.f32.mrb[38].mxu0  ;;  %1583 = vrot.lane.b32.xlu0 %v1573_v28, %s3065_s9 }
 0xbb0   : > { %v1960_v5 = vpack.c.bf16 %v2516_v4, %v2515_v3  ;;  %v1945_v6 = vpop.f32.mrb[39].mxu0 }
 0xbb1   : > { %v1959_v7 = vpack.c.bf16 %v1945_v6, %v1942_v2 }
 0xbb2   : > { %1971 = vrot.lane.b32.xlu1 %v1960_v5, %s3066_s28 }
 0xbb3   : > { %1969 = vrot.lane.b32.xlu0 %v1959_v7, %s3066_s28 }
 0xc1c   : > { %v1968_v8 = vpop.permute.xlu1 %1967 }
 0xc1d   : > { %1979 = vst.msk [vmem:[#allocation2 + $0x8] sm:$0xff] %vm1977_vm4, %v1968_v8  ;;  %v1966_v9 = vpop.permute.xlu0 %1965 }
 0xc1e   : > { %1978 = vst.msk [vmem:[#allocation2] sm:$0xff] %vm1977_vm4, %v1966_v9 }
 0xc20   : > { %v1586_v10 = vpop.permute.xlu1 %1585 }
 0xc21   : > { %1595 = vst.msk [vmem:[#allocation2 + $0x18] sm:$0xff] %vm1591_vm3, %v1586_v10  ;;  %v1584_v21 = vpop.permute.xlu0 %1583 }
 0xc22   : > { %1594 = vst.msk [vmem:[#allocation2 + $0x10] sm:$0xff] %vm1591_vm3, %v1584_v21 }
 0xc24   : > { %v1972_v25 = vpop.permute.xlu1 %1971  ;;  %v1983_v27 = vld [vmem:[#allocation2 + $0x8] sm:$0xff] }
 0xc25   : > { %1981 = vst.msk [vmem:[#allocation2 + $0x18] sm:$0xff] %vm1977_vm4, %v1972_v25  ;;  %v1970_v22 = vpop.permute.xlu0 %1969  ;;  %v1982_v26 = vld [vmem:[#allocation2] sm:$0xff] }
 0xc26   : > { %1980 = vst.msk [vmem:[#allocation2 + $0x10] sm:$0xff] %vm1977_vm4, %v1970_v22  ;;  %2521 = vmatprep.mubr.msk.bf16.mxu1 %vm377_vm0, %v1982_v26 }
 0xc27   : > { %2522 = vmatmul.mubr.msk.bf16.vlgmr.msra.gmra.mrb[32].mxu1 %vm377_vm0, %v1983_v27 }
 0xc2c   : > { %v1985_v11 = vld [vmem:[#allocation2 + $0x18] sm:$0xff] }
 0xc2d   : > { %v1984_v28 = vld [vmem:[#allocation2 + $0x10] sm:$0xff] }
 0xc2e   : > { %2525 = vmatprep.mubr.msk.bf16.mxu1 %vm377_vm0, %v1984_v28 }
 0xc2f   : > { %2526 = vmatmul.mubr.msk.bf16.gmra.mrb[36].mxu1 %vm377_vm0, %v1985_v11 }
 0xcfa   : > { %v2523_v13 = vpop.f32.mrb[32].mxu1 }
 0xcfb   : > { %v2064_v14 = vadd.f32 %v2523_v13, %v2287_v12  ;;  %v2055_v23 = vpop.f32.mrb[33].mxu1 }
 0xcfc   : > { %v2056_v33 = vadd.f32 %v2287_v12, %v2055_v23  ;;  %v2524_v34 = vpop.f32.mrb[34].mxu1 }
 0xcfd   : > { %2088 = vst.msk [vmem:[%s338_s26 + $0x10] sm:$0xff] %vm377_vm0, %v2064_v14  ;;  %v2067_v47 = vadd.f32 %v2524_v34, %v2287_v12  ;;  %v2058_v48 = vpop.f32.mrb[35].mxu1 }
 0xcfe   : > { %2086 = vst.msk [vmem:[%s338_s26] sm:$0xff] %vm377_vm0, %v2056_v33  ;;  %v2059_v49 = vadd.f32 %v2287_v12, %v2058_v48 }
 0xcff   : > { %2089 = vst.msk [vmem:[%s338_s26 + $0x18] sm:$0xff] %vm377_vm0, %v2067_v47 }
 0xd00   : > { %2087 = vst.msk [vmem:[%s338_s26 + $0x8] sm:$0xff] %vm377_vm0, %v2059_v49 }
 0xd02   : > { %v2527_v50 = vpop.f32.mrb[36].mxu1 }
 0xd03   : > { %v2080_v51 = vadd.f32 %v2527_v50, %v2287_v12  ;;  %v2071_v52 = vpop.f32.mrb[37].mxu1 }
 0xd04   : > { %v2072_v53 = vadd.f32 %v2287_v12, %v2071_v52  ;;  %v2528_v54 = vpop.f32.mrb[38].mxu1 }
 0xd05   : > { %2092 = vst.msk [vmem:[%s338_s26 + $0x30] sm:$0xff] %vm377_vm0, %v2080_v51  ;;  %v2083_v55 = vadd.f32 %v2528_v54, %v2287_v12  ;;  %v2074_v56 = vpop.f32.mrb[39].mxu1 }
 0xd06   : > { %2090 = vst.msk [vmem:[%s338_s26 + $0x20] sm:$0xff] %vm377_vm0, %v2072_v53  ;;  %v2075_v57 = vadd.f32 %v2287_v12, %v2074_v56 }
 0xd07   : > { %2093 = vst.msk [vmem:[%s338_s26 + $0x38] sm:$0xff] %vm377_vm0, %v2083_v55 }
 0xd08   : > { %2091 = vst.msk [vmem:[%s338_s26 + $0x28] sm:$0xff] %vm377_vm0, %v2075_v57 }
 0xd09   : > { %2976 = shalt.err (!%p2973_p8)
}
 0xd0a   : > { %s2977_s10 = scalar_lea.hbm %s3735_s13, 1024  ;;  %s2981_s26 = scalar_lea.hbm %s3791_s6, 2048 }
 0xd0b   : > { %p2978_p6 = scmp.ne.s32.totalorder %s3735_s13, %s2977_s10  ;;  %p2982_p0 = scmp.lt.u32.totalorder %s3735_s13, %s3791_s6 }
 0xd0c   : > { %p2983_p5 = scmp.lt.u32.totalorder %s2981_s26, %s2977_s10  ;;  %p2985_p7 = scmp.lt.u32.totalorder %s2977_s10, %s3735_s13 }
 0xd0d   : > { %p2979_p10 = pnand %p2978_p6, %p3810_p4 }
 0xd0e   : > { %p2984_p9 = por %p2983_p5, %p2982_p0 }
 0xd0f   : > { %p2980_p11 = pneg %p2979_p10 }
 0xd10   : > { %p2986_p12 = por %p2985_p7, %p2984_p9 }
 0xd12   : > { %p2987_p13 = pnand %p2986_p12, %p2980_p11 }
 0xd14   : > { %2990 = shalt.err (!%p2987_p13)
}
 0xd15   : > { %s3068_s11 = smov 128  }
 0xd16   : > { %2567 = dma.vmem_to_hbm [thread:$0]  (%p3810_p4), %s3738_s14, 1024, %s3735_s13, %s2095_s27, %s3068_s11, %s3068_s11, %s3064_s12  }
 0xd17 PF: > { %s2123_s19 = sand.u32 1, %s3029_s21   ;;  %p3811_p1 = scmp.ne.s32.totalorder %s3801_s17, 0 }
 0xd18   : > { %p3812_p3 = scmp.ge.s32.totalorder %s3041_s24, 2  ;;  %s2124_s16 = scalar_lea.sflag [#allocation5], %s2123_s19 }
 0xd1a   : > { %p2590_p2 = pnand %p3812_p3, %p3811_p1 }
 0xd1c   : > { %3024 = dma.done.wait (!%p2590_p2), %s2124_s16, 1024  }
 0xd1d   : > { %3026 = vsyncadd (!%p2590_p2), %s2124_s16, 4294966272  ;;  %p22_p8 = scmp.ge.s32.totalorder %s3266_s30, 4   ;;  %s3813_s21 = smov %s3033_s22 }
 0xd1e   : > { %s3814_s22 = smov %s3037_s23  ;;  %s3815_s23 = smov %s3278_s7 }
 0xd1f   : > { %s3816_s24 = smov %s3266_s30  ;;  %24 = sbr.rel (!%p22_p8) target bundleno = 8 (0x8), region = 112 }
 0xd26   :  { %2129 = vsyncpa [#allocation4], 1 }
 0xd27   :  { %2131 = vsyncpa [#allocation4 + $0x1], 1 }
 0xd28   :  { %2132 = vsyncpa [#allocation7], 1 }
 0xd29   :  { %2133 = vsyncpa [#allocation10], 1 }
 0xd2a   :  { %2134 = vsyncpa [#allocation13], 1 }
 0xd2b   :  { %2135 = vsyncpa [#allocation5], 1 }
 0xd2c   :  { %2137 = vsyncpa [#allocation5 + $0x1], 1 }

// kernel: tpu_custom_call.1
= control target key start
LH: loop header
LB: loop body
LE: loop exit
PB: predicated region body
PF: predicated region fallthrough
CT: control target
= control target key end

     0   :  { %11 = vsyncpa [#allocation4], 0  ;;  %s3785_s0 = inlined_call_operand.hbm [shape: f32[128,32], index: 0, kind: input, shape index: {}]   ;;  %s3786_s1 = inlined_call_operand.hbm [shape: bf16[32,96], index: 1, kind: input, shape index: {}]   ;;  %s3787_s2 = inlined_call_operand.hbm [shape: f32[1,96], index: 2, kind: input, shape index: {}]   ;;  %s3788_s3 = inlined_call_operand.hbm [shape: bf16[32,32], index: 3, kind: input, shape index: {}]   ;;  %s3789_s4 = inlined_call_operand.hbm [shape: f32[1,32], index: 4, kind: input, shape index: {}]   ;;  %s3790_s5 = inlined_call_operand.hbm [shape: f32[4,2,32,32], index: 5, kind: input, shape index: {}]   ;;  %s3791_s6 = inlined_call_operand.hbm [shape: f32[128,32], index: 6, kind: output, shape index: {}]  }
   0x1   :  { %13 = vsyncpa [#allocation4 + $0x1], 0 }
   0x2   :  { %14 = vsyncpa [#allocation7], 0 }
   0x3   :  { %15 = vsyncpa [#allocation10], 0 }
   0x4   :  { %16 = vsyncpa [#allocation13], 0 }
   0x5   :  { %17 = vsyncpa [#allocation5], 0 }
   0x6   :  { %19 = vsyncpa [#allocation5 + $0x1], 0  ;;  %s3104_s21 = smov 0   ;;  %s3106_s22 = smov 0  }
   0x7   :  { %s3108_s23 = smov 0   ;;  %s3110_s24 = smov 0  }
   0x8 LB: > { %s3043_s25 = smov [#allocation6]   ;;  %s3125_s27 = sadd.s32 4294967295, %s3041_s24   ;;  %s3041_s24 = sphi %s3110_s24, %s3816_s24   ;;  %s3037_s23 = sphi %s3108_s23, %s3815_s23   ;;  %s3033_s22 = sphi %s3106_s22, %s3814_s22   ;;  %s3029_s21 = sphi %s3104_s21, %s3813_s21  }
   0x9   : > { %s199_s26 = sshll.u32 %s3043_s25, 4  ;;  %p2230_p0 = scmp.ge.s32.totalorder %s3041_s24, 1  ;;  %s3130_s26 = int_to_ptr.vmem [resolvable:$true] %s199_s26 }
   0xa   : > { %p3792_p1 = scmp.eq.s32.totalorder %s3125_s27, 0  ;;  %p187_p2 = scmp.lt.s32.totalorder %s3041_s24, 3 }
   0xb   : > { %s3044_s29 = smov [#allocation9]   ;;  %s3045_s8 = smov [#allocation8]  }
   0xc   : > { %p3132_p3 = pnand %p2230_p0, %p187_p2  ;;  %s223_s30 = sshll.u32 %s3044_s29, 4  ;;  %s3145_s30 = int_to_ptr.vmem [resolvable:$true] %s223_s30 }
   0xd   : > { %s213_s9 = sshll.u32 %s3045_s8, 4  ;;  %s2793_s12 = scalar_lea.hbm %s3786_s1, 256  ;;  %s3147_s9 = int_to_ptr.vmem [resolvable:$true] %s213_s9 }
   0xe   : > { %s3795_s28 = scalar_select %p3132_p3, 1, 0 }
   0xf   : > { %p2569_p5 = pneg %p3132_p3  ;;  %p2794_p7 = scmp.ne.s32.totalorder %s3786_s1, %s2793_s12 }
  0x10   : > { %p2800_p11 = scmp.lt.u32.totalorder %s2793_s12, %s3786_s1 }
  0x11   : > { %p3141_p6 = pnand %p2569_p5, %p3792_p1 }
  0x13   : > { %p3157_p8 = pneg %p3141_p6 }
  0x15   : > { %p2796_p9 = pnand %p3157_p8, %p2794_p7 }
  0x17   : > { %p2797_p10 = pneg %p2796_p9 }
  0x19   : > { %p2802_p12 = pnand %p2800_p11, %p2797_p10 }
  0x1b   : > { %2805 = shalt.err (!%p2802_p12)
}
  0x1c   : > { %s2806_s18 = scalar_lea.vmem %s3130_s26, 256  ;;  %p2814_p5 = scmp.lt.s32.totalorder %s3130_s26, %s3130_s26 }
  0x1d   : > { %p2807_p13 = scmp.ne.s32.totalorder %s3130_s26, %s2806_s18  ;;  %p2815_p4 = scmp.lt.s32.totalorder %s2806_s18, %s2806_s18 }
  0x1f   : > { %p2809_p0 = pnand %p2807_p13, %p3157_p8  ;;  %p2816_p7 = por %p2815_p4, %p2814_p5 }
  0x21   : > { %p2810_p2 = pneg %p2809_p0 }
  0x23   : > { %p2817_p9 = pnand %p2816_p7, %p2810_p2 }
  0x25   : > { %2820 = shalt.err (!%p2817_p9)
}
  0x26   : > { %s3046_s19 = smov 64   ;;  %s3047_s20 = smov 4  }
  0x27   : > { %2572 = dma.hbm_to_vmem [thread:$0]  (!%p3141_p6), %s3786_s1, 256, %s3130_s26, [#allocation7], %s3046_s19, %s3046_s19, %s3047_s20  }
  0x28   : > { %s2821_s11 = scalar_lea.hbm %s3788_s3, 256 }
  0x29   : > { %p2822_p4 = scmp.ne.s32.totalorder %s3788_s3, %s2821_s11  ;;  %p2828_p12 = scmp.lt.u32.totalorder %s2821_s11, %s3788_s3 }
  0x2b   : > { %p2824_p10 = pnand %p2822_p4, %p3157_p8 }
  0x2d   : > { %p2825_p11 = pneg %p2824_p10 }
  0x2f   : > { %p2830_p13 = pnand %p2828_p12, %p2825_p11 }
  0x31   : > { %2833 = shalt.err (!%p2830_p13)
}
  0x32   : > { %s2834_s26 = scalar_lea.vmem %s3145_s30, 256  ;;  %p2842_p7 = scmp.lt.s32.totalorder %s3145_s30, %s3145_s30 }
  0x33   : > { %p2835_p0 = scmp.ne.s32.totalorder %s3145_s30, %s2834_s26  ;;  %p2843_p9 = scmp.lt.s32.totalorder %s2834_s26, %s2834_s26 }
  0x35   : > { %p2837_p2 = pnand %p2835_p0, %p3157_p8  ;;  %p2844_p4 = por %p2843_p9, %p2842_p7 }
  0x37   : > { %p2838_p5 = pneg %p2837_p2 }
  0x39   : > { %p2845_p10 = pnand %p2844_p4, %p2838_p5 }
  0x3b   : > { %2848 = shalt.err (!%p2845_p10)
}
  0x3c   : > { %2578 = dma.hbm_to_vmem [thread:$0]  (!%p3141_p6), %s3788_s3, 256, %s3145_s30, [#allocation10], %s3046_s19, %s3046_s19, %s3047_s20  }
  0x3d   : > { %s2849_s8 = scalar_lea.hbm %s3787_s2, 16 }
  0x3e   : > { %p2850_p11 = scmp.ne.s32.totalorder %s3787_s2, %s2849_s8  ;;  %p2856_p0 = scmp.lt.u32.totalorder %s2849_s8, %s3787_s2 }
  0x40   : > { %p2852_p12 = pnand %p2850_p11, %p3157_p8 }
  0x42   : > { %p2853_p13 = pneg %p2852_p12 }
  0x44   : > { %p2858_p2 = pnand %p2856_p0, %p2853_p13 }
  0x46   : > { %2861 = shalt.err (!%p2858_p2)
}
  0x47   : > { %s2862_s30 = scalar_lea.vmem %s3147_s9, 16  ;;  %s2869_s19 = scalar_lea.vmem %s3147_s9, 32 }
  0x48   : > { %p2863_p5 = scmp.ne.s32.totalorder %s3147_s9, %s2862_s30  ;;  %p2870_p4 = scmp.lt.s32.totalorder %s3147_s9, %s3147_s9 }
  0x49   : > { %p2871_p10 = scmp.lt.s32.totalorder %s2869_s19, %s2862_s30 }
  0x4a   : > { %p2865_p7 = pnand %p2863_p5, %p3157_p8 }
  0x4b   : > { %p2872_p11 = por %p2871_p10, %p2870_p4 }
  0x4c   : > { %p2866_p9 = pneg %p2865_p7 }
  0x4e   : > { %p2873_p12 = pnand %p2872_p11, %p2866_p9 }
  0x50   : > { %2876 = shalt.err (!%p2873_p12)
}
  0x51   : > { %2575 = dma.hbm_to_vmem [thread:$0]  (!%p3141_p6), %s3787_s2, 16, %s3147_s9, [#allocation7]  }
  0x52   : > { %s3048_s16 = smov [#allocation11]   ;;  %s3049_s17 = smov [#allocation12]  }
  0x53   : > { %s237_s26 = sshll.u32 %s3048_s16, 4  ;;  %s247_s18 = sshll.u32 %s3049_s17, 4  ;;  %s238_s26 = int_to_ptr.vmem [resolvable:$true] %s237_s26  ;;  %s248_s18 = int_to_ptr.vmem [resolvable:$true] %s247_s18 }
  0x54   : > { %s2877_s8 = scalar_lea.hbm %s3789_s4, 16 }
  0x55   : > { %p2878_p13 = scmp.ne.s32.totalorder %s3789_s4, %s2877_s8  ;;  %p2884_p5 = scmp.lt.u32.totalorder %s2877_s8, %s3789_s4 }
  0x57   : > { %p2880_p0 = pnand %p2878_p13, %p3157_p8 }
  0x59   : > { %p2881_p2 = pneg %p2880_p0 }
  0x5b   : > { %p2886_p7 = pnand %p2884_p5, %p2881_p2 }
  0x5d   : > { %2889 = shalt.err (!%p2886_p7)
}
  0x5e   : > { %s2890_s9 = scalar_lea.vmem %s238_s26, 16  ;;  %s2897_s30 = scalar_lea.vmem %s238_s26, 32 }
  0x5f   : > { %p2891_p9 = scmp.ne.s32.totalorder %s238_s26, %s2890_s9  ;;  %p2898_p11 = scmp.lt.s32.totalorder %s238_s26, %s238_s26 }
  0x60   : > { %p2899_p12 = scmp.lt.s32.totalorder %s2897_s30, %s2890_s9 }
  0x61   : > { %p2893_p4 = pnand %p2891_p9, %p3157_p8 }
  0x62   : > { %p2900_p1 = por %p2899_p12, %p2898_p11 }
  0x63   : > { %p2894_p10 = pneg %p2893_p4 }
  0x65   : > { %p2901_p3 = pnand %p2900_p1, %p2894_p10 }
  0x67   : > { %2904 = shalt.err (!%p2901_p3)
}
  0x68   : > { %2581 = dma.hbm_to_vmem [thread:$0]  (!%p3141_p6), %s3789_s4, 16, %s238_s26, [#allocation10]  }
  0x69   : > { %s2905_s17 = scalar_lea.hbm %s3790_s5, 4096 }
  0x6a   : > { %p2906_p13 = scmp.ne.s32.totalorder %s3790_s5, %s2905_s17  ;;  %p2912_p3 = scmp.lt.u32.totalorder %s2905_s17, %s3790_s5 }
  0x6c   : > { %p2908_p0 = pnand %p2906_p13, %p3157_p8 }
  0x6e   : > { %p2909_p1 = pneg %p2908_p0 }
  0x70   : > { %p2914_p2 = pnand %p2912_p3, %p2909_p1 }
  0x72   : > { %2917 = shalt.err (!%p2914_p2)
}
  0x73   : > { %s2918_s11 = scalar_lea.vmem %s248_s18, 4096  ;;  %p2926_p4 = scmp.lt.s32.totalorder %s248_s18, %s248_s18 }
  0x74   : > { %p2919_p5 = scmp.ne.s32.totalorder %s248_s18, %s2918_s11  ;;  %p2927_p10 = scmp.lt.s32.totalorder %s2918_s11, %s2918_s11 }
  0x76   : > { %p2921_p7 = pnand %p2919_p5, %p3157_p8  ;;  %p2928_p11 = por %p2927_p10, %p2926_p4 }
  0x78   : > { %p2922_p9 = pneg %p2921_p7 }
  0x7a   : > { %p2929_p12 = pnand %p2928_p11, %p2922_p9 }
  0x7c   : > { %2932 = shalt.err (!%p2929_p12)
}
  0x7d   : > { %s3050_s26 = smov 128   ;;  %s3051_s15 = smov 8  }
  0x7e   : > { %2584 = dma.hbm_to_vmem [thread:$0]  (!%p3141_p6), %s3790_s5, 4096, %s248_s18, [#allocation13], %s3050_s26, %s3050_s26, %s3051_s15  }
  0x7f   : > { %s2229_s9 = sadd.s32 4294967294, %s3041_s24   ;;  %s3266_s30 = sadd.s32 1, %s3041_s24  }
  0x80   : > { %s32_s19 = sadd.s32 1, %s3037_s23  ;;  %s29_s20 = ssub.s32 %s3041_s24, %s3266_s30 }
  0x81   : > { %p39_p8 = scmp.ne.s32.totalorder %s3037_s23, %s3033_s22  ;;  %p30_p13 = scmp.eq.s32.totalorder %s29_s20, 0 }
  0x82   : > { %p40_p0 = scmp.eq.s32.totalorder %s3041_s24, 0  ;;  %p45_p1 = scmp.ne.s32.totalorder %s3033_s22, %s3029_s21 }
  0x83   : > { %p174_p3 = scmp.eq.s32.totalorder %s3125_s27, 1  ;;  %p3798_p5 = scmp.eq.s32.totalorder %s3125_s27, 0 }
  0x84   : > { %s3278_s7 = scalar_select %p30_p13, %s3037_s23, %s32_s19  }
  0x85   : > { %p41_p2 = por %p40_p0, %p39_p8  ;;  %p3282_p7 = por %p3798_p5, %p45_p1 }
  0x86   : > { %p3286_p6 = por %p174_p3, %p39_p8  ;;  %p180_p9 = scmp.eq.s32.totalorder %s2229_s9, 1 }
  0x87   : > { %p2598_p4 = scmp.lt.s32.totalorder %s3041_s24, 2  ;;  %s261_s16 = sand.u32 1, %s3037_s23  }
  0x88   : > { %s3800_s18 = scalar_select %p3286_p6, 1, 0 }
  0x89   : > { %p3292_p10 = por %p180_p9, %p45_p1  ;;  %s2237_s25 = sshll.u32 %s261_s16, 6 }
  0x8a   : > { %s2299_s29 = sshll.u32 %s3041_s24, 10  ;;  %s265_s12 = scalar_lea.vmem [#allocation3], %s2237_s25 }
  0x8b   : > { %s3801_s17 = scalar_select %p3292_p10, 1, 0 }
  0x8c   : > { %s3300_s11 = scalar_lea.hbm %s3785_s0, %s2299_s29  ;;  %s272_s13 = sshll.u32 %s265_s12, 4  ;;  %s3306_s13 = int_to_ptr.vmem [resolvable:$true] %s272_s13 }
  0x8d   : > { %p3302_p11 = pnand %p2598_p4, %p41_p2  ;;  %s3308_s19 = scalar_lea.sflag [#allocation4], %s261_s16 }
  0x8e   : > { %s2933_s20 = scalar_lea.hbm %s3300_s11, 1024  ;;  %s2938_s8 = scalar_lea.hbm %s3785_s0, 2048 }
  0x8f   : > { %p2934_p12 = scmp.ne.s32.totalorder %s3300_s11, %s2933_s20  ;;  %p2935_p8 = pneg %p3302_p11 }
  0x90   : > { %p2939_p1 = scmp.lt.u32.totalorder %s3300_s11, %s3785_s0  ;;  %p2940_p3 = scmp.lt.u32.totalorder %s2938_s8, %s2933_s20 }
  0x91   : > { %p2936_p13 = pnand %p2935_p8, %p2934_p12  ;;  %p2942_p5 = scmp.lt.u32.totalorder %s2933_s20, %s3300_s11 }
  0x92   : > { %p2941_p2 = por %p2940_p3, %p2939_p1 }
  0x93   : > { %p2937_p0 = pneg %p2936_p13 }
  0x94   : > { %p2943_p9 = por %p2942_p5, %p2941_p2 }
  0x96   : > { %p2944_p4 = pnand %p2943_p9, %p2937_p0 }
  0x98   : > { %2947 = shalt.err (!%p2944_p4)
}
  0x99   : > { %s2948_s16 = scalar_lea.vmem %s3306_s13, 1024  ;;  %s3052_s25 = smov [#allocation3]  }
  0x9a   : > { %p2949_p12 = scmp.ne.s32.totalorder %s3306_s13, %s2948_s16  ;;  %s2953_s29 = sshll.u32 %s3052_s25, 4  ;;  %s2954_s29 = int_to_ptr.vmem [resolvable:$false] %s2953_s29 }
  0x9b   : > { %s2955_s10 = scalar_lea.vmem %s2954_s29, 2048  ;;  %p2956_p6 = scmp.lt.s32.totalorder %s3306_s13, %s2954_s29 }
  0x9c   : > { %p2951_p13 = pnand %p2949_p12, %p2935_p8  ;;  %p2957_p1 = scmp.lt.s32.totalorder %s2955_s10, %s2948_s16 }
  0x9e   : > { %p2952_p10 = pneg %p2951_p13  ;;  %p2958_p3 = por %p2957_p1, %p2956_p6 }
  0xa0   : > { %p2959_p2 = pnand %p2958_p3, %p2952_p10 }
  0xa2   : > { %2962 = shalt.err (!%p2959_p2)
}
  0xa3   : > { %2588 = dma.hbm_to_vmem [thread:$0]  (!%p3302_p11), %s3300_s11, 1024, %s3306_s13, %s3308_s19, %s3050_s26, %s3050_s26, %s3051_s15  }
  0xa4   : > { %p3803_p8 = scmp.ne.s32.totalorder %s3795_s28, 0 }
  0xa5   : > { %s3342_s20 = sand.u32 (!%p3803_p8), 1, %s3033_s22  }
  0xa6   : > { %284 = sbr.rel (%p3803_p8) target bundleno = 3351 (0xd17), region = 44  ;;  %s2241_s8 = sshll.u32 (!%p3803_p8), %s3342_s20, 6 }
  0xa7   : > { %s287_s12 = scalar_lea.sflag (!%p3803_p8), [#allocation4], %s3342_s20  ;;  %s290_s9 = scalar_lea.vmem (!%p3803_p8), [#allocation3], %s2241_s8 }
  0xad   : > { %3008 = dma.done.wait (%p3282_p7), %s287_s12, 1024  }
  0xae   : > { %3010 = vsyncadd (%p3282_p7), %s287_s12, 4294966272  ;;  %p3804_p6 = scmp.eq.s32.totalorder %s3125_s27, 0 }
  0xb0   : > { %3012 = dma.done.wait (%p3804_p6), [#allocation7], 272   ;;  %p3805_p10 = pmov %p3804_p6 }
  0xb1   : > { %p3806_p11 = pmov %p3804_p6 }
  0xb2   : > { %3014 = vsyncadd (%p3805_p10), [#allocation7], 4294967024 }
  0xb3   : > { %3016 = dma.done.wait (%p3806_p11), [#allocation10], 272   ;;  %p3807_p0 = pmov %p3804_p6 }
  0xb5   : > { %3018 = vsyncadd (%p3807_p0), [#allocation10], 4294967024  ;;  %p3808_p5 = pmov %p3807_p0 }
  0xb6   : > { %p3809_p9 = pmov %p3807_p0 }
  0xb7   : > { %3020 = dma.done.wait (%p3808_p5), [#allocation13], 4096  }
  0xb8   : > { %3022 = vsyncadd (%p3809_p9), [#allocation13], 4294963200  ;;  %v2661_v0 = vld [vmem:[#allocation6] sm:$0xff]   ;;  %v2662_v1 = vld [vmem:[#allocation6 + $0x8] sm:$0xff]   ;;  %vm377_vm0 = vcmask 261120   ;;  %vm473_vm1 = vcmask 64512  }
  0xb9   : > { %2377 = vmatprep.subr.bf16.mxu0 %v2661_v0  ;;  %v342_v2 = vld [vmem:[%s290_s9] sm:$0xff]  ;;  %v343_v3 = vld [vmem:[%s290_s9 + $0x8] sm:$0xff]  ;;  %v344_v5 = vld [vmem:[%s290_s9 + $0x10] sm:$0xff]  ;;  %s3053_s28 = smov 96   ;;  %s3054_s26 = smov 64   ;;  %vm1205_vm2 = vcmask 130112  }
  0xba   : > { %2378 = vmatpush3.bf16.msra.mxu0 %v2661_v0  ;;  %v350_v4 = vpack.c.bf16 %v343_v3, %v342_v2  ;;  %v345_v6 = vld [vmem:[%s290_s9 + $0x18] sm:$0xff]  ;;  %v346_v7 = vld [vmem:[%s290_s9 + $0x20] sm:$0xff]  ;;  %v347_v8 = vld [vmem:[%s290_s9 + $0x28] sm:$0xff]  ;;  %s3055_s15 = smov 88   ;;  %s3056_s14 = smov 120   ;;  %vm1591_vm3 = vcmask 195712  }
  0xbb   : > { %2379 = vmatprep.subr.bf16.mxu0 %v2662_v1  ;;  %v351_v9 = vpack.c.bf16 %v345_v6, %v344_v5  ;;  %v352_v10 = vpack.c.bf16 %v347_v8, %v346_v7  ;;  %v348_v11 = vld [vmem:[%s290_s9 + $0x30] sm:$0xff]  ;;  %v349_v12 = vld [vmem:[%s290_s9 + $0x38] sm:$0xff]  ;;  %v459_v43 = vld [vmem:[#allocation12] sm:$0xff]  ;;  %s3057_s11 = smov 56   ;;  %s3058_s13 = smov 80   ;;  %vm1977_vm4 = vcmask 261312  }
  0xbc   : > { %2381 = vmatprep.mubr.msk.bf16.mxu0 %vm377_vm0, %v350_v4  ;;  %v353_v13 = vpack.c.bf16 %v349_v12, %v348_v11  ;;  %v2248_v15 = vld [vmem:[#allocation8] ss:$0 sm:$0xff]  ;;  %v461_v45 = vld [vmem:[#allocation12 + $0x10] sm:$0xff]  ;;  %v462_v54 = vld [vmem:[#allocation12 + $0x18] sm:$0xff]  ;;  %s3059_s19 = smov 112   ;;  %s3060_s16 = smov 48  }
  0xbd   : > { %v460_v47 = vld [vmem:[#allocation12 + $0x8] sm:$0xff]  ;;  %v463_v56 = vld [vmem:[#allocation12 + $0x20] sm:$0xff]  ;;  %v465_v60 = vld [vmem:[#allocation12 + $0x30] sm:$0xff]  ;;  %s3061_s25 = smov 72   ;;  %s3062_s29 = smov 104  }
  0xbe   : > { %2380 = vmatpush3.bf16.msra.mxu0 %v2662_v1  ;;  %v464_v62 = vld [vmem:[#allocation12 + $0x28] sm:$0xff]  ;;  %v466_v6 = vld [vmem:[#allocation12 + $0x38] sm:$0xff]  ;;  %s3063_s10 = smov 40   ;;  %s3064_s12 = smov 8  }
  0xbf   : > { %s3065_s9 = smov 16   ;;  %p3810_p4 = scmp.ne.s32.totalorder %s3800_s18, 0 }
  0xc1   : > { %2382 = vmatmul.mubr.msk.bf16.vlgmr.msra.gmra.mrb[0].mxu0 %vm377_vm0, %v351_v9 }
  0xc2   : > { %2385 = vmatprep.mubr.msk.bf16.mxu0 %vm377_vm0, %v352_v10 }
  0xc9   : > { %2386 = vmatmul.mubr.msk.bf16.gmra.mrb[4].mxu0 %vm377_vm0, %v353_v13 }
 0x194   : > { %v2383_v14 = vpop.f32.mrb[0].mxu0 }
 0x195   : > { %v424_v16 = vpop.f32.mrb[1].mxu0  ;;  %v433_v18 = vadd.f32 %v2383_v14, %v2248_v15 }
 0x196   : > { %v2384_v17 = vpop.f32.mrb[2].mxu0  ;;  %v425_v21 = vadd.f32 %v2248_v15, %v424_v16 }
 0x197   : > { %v436_v19 = vadd.f32 %v2384_v17, %v2248_v15  ;;  %v427_v20 = vpop.f32.mrb[3].mxu0 }
 0x198   : > { %v428_v22 = vadd.f32 %v2248_v15, %v427_v20 }
 0x199   : > { %v3368_v23 = vpack.c.bf16 %v436_v19, %v433_v18 }
 0x19a   : > { %v3370_v24 = vpack.c.bf16 %v428_v22, %v425_v21 }
 0x19c   : > { %v2387_v25 = vpop.f32.mrb[4].mxu0  ;;  %469 = vrot.lane.b32.xlu0 %v3370_v24, %s3053_s28  ;;  %2393 = vmatprep.mubr.msk.bf16.mxu1 %vm473_vm1, %v3370_v24 }
 0x19d   : > { %v449_v26 = vadd.f32 %v2387_v25, %v2248_v15  ;;  %v440_v27 = vpop.f32.mrb[5].mxu0 }
 0x19e   : > { %v441_v28 = vadd.f32 %v2248_v15, %v440_v27  ;;  %v2388_v29 = vpop.f32.mrb[6].mxu0 }
 0x19f   : > { %v452_v30 = vadd.f32 %v2388_v29, %v2248_v15  ;;  %v443_v31 = vpop.f32.mrb[7].mxu0 }
 0x1a0   : > { %v444_v32 = vadd.f32 %v2248_v15, %v443_v31  ;;  %471 = vrot.lane.b32.xlu0 %v3368_v23, %s3053_s28 }
 0x1a1   : > { %v3376_v33 = vpack.c.bf16 %v452_v30, %v449_v26 }
 0x1a2   : > { %v3378_v34 = vpack.c.bf16 %v444_v32, %v441_v28 }
 0x1a4   : > { %537 = vrot.lane.b32.xlu1 %v3378_v34, %s3053_s28  ;;  %2401 = vmatprep.mubr.msk.bf16.mxu0 %vm473_vm1, %v3378_v34 }
 0x1a8   : > { %539 = vrot.lane.b32.xlu1 %v3376_v33, %s3053_s28  ;;  %s3066_s28 = smov 24  }
 0x20e   : > { %v470_v35 = vpop.permute.xlu0 %469 }
 0x20f   : > { %2529 = vmatprep.subr.msk.bf16.mxu1 %vm473_vm1, %v470_v35  ;;  %v481_v36 = vsel %vm473_vm1, %v470_v35, 0 }
 0x210   : > { %2390 = vmatpush3.bf16.xpose.msra.mxu1 %v481_v36 }
 0x212   : > { %v472_v37 = vpop.permute.xlu0 %471 }
 0x213   : > { %2530 = vmatprep.subr.msk.bf16.mxu1 %vm473_vm1, %v472_v37  ;;  %v484_v39 = vsel %vm473_vm1, %v472_v37, 0 }
 0x216   : > { %v538_v38 = vpop.permute.xlu1 %537 }
 0x217   : > { %2531 = vmatprep.subr.msk.bf16.mxu0 %vm473_vm1, %v538_v38  ;;  %v548_v40 = vsel %vm473_vm1, %v538_v38, 0 }
 0x218   : > { %2392 = vmatpush3.bf16.xpose.msra.mxu1 %v484_v39  ;;  %2398 = vmatpush3.bf16.xpose.msra.mxu0 %v548_v40 }
 0x21a   : > { %v540_v41 = vpop.permute.xlu1 %539 }
 0x21b   : > { %2532 = vmatprep.subr.msk.bf16.mxu0 %vm473_vm1, %v540_v41  ;;  %v551_v42 = vsel %vm473_vm1, %v540_v41, 0 }
 0x21f   : > { %2394 = vmatmul.mubr.msk.bf16.vlgmr.msra.gmra.mrb[0].mxu1 %vm473_vm1, %v3368_v23 }
 0x220   : > { %2400 = vmatpush3.bf16.xpose.msra.mxu0 %v551_v42 }
 0x227   : > { %2402 = vmatmul.mubr.msk.bf16.vlgmr.msra.gmra.mrb[8].mxu0 %vm473_vm1, %v3376_v33 }
 0x2f2   : > { %v2395_v44 = vpop.f32.mrb[0].mxu1 }
 0x2f3   : > { %v520_v46 = vpop.f32.mrb[1].mxu1  ;;  %v529_v51 = vadd.f32 %v2395_v44, %v461_v45 }
 0x2f4   : > { %v521_v48 = vadd.f32 %v520_v46, %v459_v43  ;;  %v2396_v49 = vpop.f32.mrb[2].mxu1 }
 0x2f5   : > { %v523_v50 = vpop.f32.mrb[3].mxu1  ;;  %v532_v57 = vadd.f32 %v2396_v49, %v462_v54  ;;  %v608_v59 = vsel %vm377_vm0, %v529_v51, -inf }
 0x2f6   : > { %v524_v52 = vadd.f32 %v523_v50, %v460_v47  ;;  %v602_v53 = vsel %vm377_vm0, %v521_v48, -inf }
 0x2f7   : > { %603 = vmax.xlane.f32.xlu0 %v602_v53  ;;  %v611_v5 = vsel %vm377_vm0, %v532_v57, -inf }
 0x2f8   : > { %v605_v55 = vsel %vm377_vm0, %v524_v52, -inf }
 0x2f9   : > { %606 = vmax.xlane.f32.xlu1 %v605_v55 }
 0x2fa   : > { %v2403_v58 = vpop.f32.mrb[8].mxu0 }
 0x2fb   : > { %v587_v61 = vpop.f32.mrb[9].mxu0  ;;  %609 = vmax.xlane.f32.xlu0 %v608_v59  ;;  %v596_v2 = vadd.f32 %v2403_v58, %v465_v60 }
 0x2fc   : > { %v588_v63 = vadd.f32 %v587_v61, %v463_v56  ;;  %v2404_v0 = vpop.f32.mrb[10].mxu0 }
 0x2fd   : > { %v590_v1 = vpop.f32.mrb[11].mxu0  ;;  %v599_v7 = vadd.f32 %v2404_v0, %v466_v6  ;;  %v620_v8 = vsel %vm377_vm0, %v596_v2, -inf }
 0x2fe   : > { %v591_v3 = vadd.f32 %v590_v1, %v464_v62  ;;  %v614_v4 = vsel %vm377_vm0, %v588_v63, -inf }
 0x2ff   : > { %615 = vmax.xlane.f32.xlu1 %v614_v4  ;;  %612 = vmax.xlane.f32.xlu0 %v611_v5  ;;  %v623_v10 = vsel %vm377_vm0, %v599_v7, -inf }
 0x300   : > { %v617_v9 = vsel %vm377_vm0, %v591_v3, -inf }
 0x303   : > { %621 = vmax.xlane.f32.xlu1 %v620_v8  ;;  %618 = vmax.xlane.f32.xlu0 %v617_v9 }
 0x307   : > { %624 = vmax.xlane.f32.xlu0 %v623_v10 }
 0x314   : > { %694 = vrot.lane.b32.xlu1 %v3370_v24, %s3054_s26 }
 0x318   : > { %755 = vrot.lane.b32.xlu1 %v3378_v34, %s3054_s26 }
 0x31c   : > { %757 = vrot.lane.b32.xlu1 %v3376_v33, %s3054_s26 }
 0x31d   : > { %696 = vrot.lane.b32.xlu0 %v3368_v23, %s3054_s26  ;;  %s338_s26 = scalar_lea.vmem [#allocation14], %s2241_s8 }
 0x320   : > { %839 = vrot.lane.b32.xlu1 %v3368_v23, %s3055_s15 }
 0x321   : > { %837 = vrot.lane.b32.xlu0 %v3370_v24, %s3055_s15 }
 0x384   : > { %v604_v11 = vpop.xlane.xlu0 %603 }
 0x385   : > { %v626_v12 = vsub.f32 %v521_v48, %v604_v11 }
 0x386   : > { %v607_v13 = vpop.xlane.xlu1 %606 }
 0x387   : > { %v634_v16 = vmul.f32 1.442695, %v626_v12  ;;  %v627_v18 = vsub.f32 %v524_v52, %v607_v13 }
 0x388   : > { %v610_v14 = vpop.xlane.xlu0 %609 }
 0x389   : > { %v628_v15 = vsub.f32 %v529_v51, %v610_v14  ;;  %v636_v26 = vmul.f32 1.442695, %v627_v18 }
 0x38b   : > { %v638_v17 = vmul.f32 1.442695, %v628_v15 }
 0x38c   : > { %v616_v19 = vpop.xlane.xlu1 %615  ;;  %v613_v20 = vpop.xlane.xlu0 %612 }
 0x38d   : > { %2665 = vpow2.f32 %v638_v17  ;;  %v629_v21 = vsub.f32 %v532_v57, %v613_v20  ;;  %v630_v22 = vsub.f32 %v588_v63, %v616_v19 }
 0x38e   : > { %2667 = vpow2.f32 %v634_v16 }
 0x38f   : > { %v640_v25 = vmul.f32 1.442695, %v629_v21  ;;  %v642_v30 = vmul.f32 1.442695, %v630_v22 }
 0x390   : > { %v622_v27 = vpop.xlane.xlu1 %621  ;;  %v619_v28 = vpop.xlane.xlu0 %618 }
 0x391   : > { %v632_v29 = vsub.f32 %v596_v2, %v622_v27  ;;  %2669 = vpow2.f32 %v640_v25  ;;  %v631_v32 = vsub.f32 %v591_v3, %v619_v28 }
 0x392   : > { %2671 = vpow2.f32 %v636_v26 }
 0x393   : > { %v646_v31 = vmul.f32 1.442695, %v632_v29  ;;  %v644_v40 = vmul.f32 1.442695, %v631_v32 }
 0x394   : > { %v695_v35 = vpop.permute.xlu1 %694  ;;  %v625_v36 = vpop.xlane.xlu0 %624 }
 0x395   : > { %2673 = vpow2.f32 %v646_v31  ;;  %v633_v37 = vsub.f32 %v599_v7, %v625_v36  ;;  %2405 = vmatprep.subr.bf16.mxu1 %v695_v35 }
 0x396   : > { %2406 = vmatpush3.bf16.msra.mxu1 %v695_v35  ;;  %2675 = vpow2.f32 %v642_v30 }
 0x397   : > { %v3412_v38 = vpop.eup %2665  ;;  %v648_v39 = vmul.f32 1.442695, %v633_v37 }
 0x398   : > { %v756_v41 = vpop.permute.xlu1 %755  ;;  %v697_v42 = vpop.permute.xlu0 %696  ;;  %v656_v43 = vsel %vm377_vm0, %v3412_v38, 0.0 }
 0x399   : > { %v3416_v44 = vpop.eup %2667  ;;  %2677 = vpow2.f32 %v648_v39  ;;  %2413 = vmatprep.subr.bf16.mxu0 %v756_v41  ;;  %657 = vadd.xlane.f32.xlu1 %v656_v43 }
 0x39a   : > { %2407 = vmatprep.subr.bf16.mxu1 %v697_v42  ;;  %2414 = vmatpush3.bf16.msra.mxu0 %v756_v41  ;;  %2679 = vpow2.f32 %v644_v40  ;;  %v650_v48 = vsel %vm377_vm0, %v3416_v44, 0.0 }
 0x39b   : > { %2408 = vmatpush3.bf16.msra.mxu1 %v697_v42  ;;  %v2670_v45 = vpop.eup %2669 }
 0x39c   : > { %v758_v46 = vpop.permute.xlu1 %757  ;;  %v3418_v47 = vpop.permute.xlu0 %837  ;;  %v659_v49 = vsel %vm377_vm0, %v2670_v45, 0.0 }
 0x39d   : > { %2415 = vmatprep.subr.bf16.mxu0 %v758_v46  ;;  %651 = vadd.xlane.f32.xlu1 %v650_v48  ;;  %v2672_v50 = vpop.eup %2671  ;;  %v848_v19 = vsel %vm473_vm1, %v3418_v47, 0 }
 0x39e   : > { %660 = vadd.xlane.f32.xlu0 %v659_v49  ;;  %2533 = vmatprep.subr.msk.bf16.mxu1 %vm473_vm1, %v3418_v47  ;;  %v653_v54 = vsel %vm377_vm0, %v2672_v50, 0.0 }
 0x39f   : > { %v3425_v51 = vpop.eup %2673  ;;  %2416 = vmatpush3.bf16.msra.mxu0 %v758_v46 }
 0x3a0   : > { %v668_v52 = vsel %vm377_vm0, %v3425_v51, 0.0  ;;  %v2676_v53 = vpop.eup %2675  ;;  %v840_v60 = vpop.permute.xlu1 %839 }
 0x3a1   : > { %669 = vadd.xlane.f32.xlu1 %v668_v52  ;;  %v662_v56 = vsel %vm377_vm0, %v2676_v53, 0.0  ;;  %v851_v32 = vsel %vm473_vm1, %v840_v60, 0 }
 0x3a2   : > { %654 = vadd.xlane.f32.xlu0 %v653_v54 }
 0x3a3   : > { %v2678_v55 = vpop.eup %2677 }
 0x3a4   : > { %v671_v57 = vsel %vm377_vm0, %v2678_v55, 0.0  ;;  %v2680_v58 = vpop.eup %2679 }
 0x3a5   : > { %663 = vadd.xlane.f32.xlu1 %v662_v56  ;;  %v665_v59 = vsel %vm377_vm0, %v2680_v58, 0.0 }
 0x3a6   : > { %672 = vadd.xlane.f32.xlu0 %v671_v57 }
 0x3aa   : > { %666 = vadd.xlane.f32.xlu0 %v665_v59 }
 0x3b6   : > { %833 = vrot.lane.b32.xlu1 %v3370_v24, %s3056_s14 }
 0x3ba   : > { %908 = vrot.lane.b32.xlu1 %v3376_v33, %s3055_s15 }
 0x3be   : > { %904 = vrot.lane.b32.xlu1 %v3376_v33, %s3056_s14 }
 0x3c0   : > { %906 = vrot.lane.b32.xlu0 %v3378_v34, %s3055_s15  ;;  %s2300_s15 = sshll.u32 %s3125_s27, 10  ;;  %s2095_s27 = scalar_lea.sflag [#allocation5], %s3342_s20 }
 0x3c4   : > { %835 = vrot.lane.b32.xlu0 %v3368_v23, %s3056_s14 }
 0x3c8   : > { %902 = vrot.lane.b32.xlu0 %v3378_v34, %s3056_s14  ;;  %s2108_s14 = sshll.u32 %s338_s26, 4  ;;  %s3738_s14 = int_to_ptr.vmem [resolvable:$true] %s2108_s14 }
 0x426   : > { %v658_v61 = vpop.xlane.xlu1 %657 }
 0x42a   : > { %v652_v62 = vpop.xlane.xlu1 %651 }
 0x42b   : > { %v661_v63 = vpop.xlane.xlu0 %660 }
 0x42c   : > { %2681 = vrcp.f32 %v661_v63 }
 0x42d   : > { %2683 = vrcp.f32 %v652_v62  ;;  %v828_v62 = vld [vmem:[#allocation12 + $0x58] sm:$0xff] }
 0x42e   : > { %v670_v0 = vpop.xlane.xlu1 %669  ;;  %2685 = vrcp.f32 %v658_v61 }
 0x42f   : > { %v655_v1 = vpop.xlane.xlu0 %654 }
 0x430   : > { %2687 = vrcp.f32 %v655_v1 }
 0x432   : > { %v664_v2 = vpop.xlane.xlu1 %663 }
 0x433   : > { %v673_v3 = vpop.xlane.xlu0 %672 }
 0x434   : > { %2689 = vrcp.f32 %v673_v3 }
 0x435   : > { %2691 = vrcp.f32 %v664_v2 }
 0x436   : > { %v2682_v4 = vpop.eup %2681  ;;  %2693 = vrcp.f32 %v670_v0  ;;  %v834_v18 = vpop.permute.xlu1 %833  ;;  %v829_v0 = vld [vmem:[#allocation12 + $0x60] sm:$0xff] }
 0x437   : > { %v667_v5 = vpop.xlane.xlu0 %666  ;;  %v2684_v6 = vpop.eup %2683  ;;  %v685_v9 = vmul.f32 %v2682_v4, %v2670_v45  ;;  %v831_v4 = vld [vmem:[#allocation12 + $0x70] sm:$0xff] }
 0x438   : > { %2695 = vrcp.f32 %v667_v5  ;;  %v2686_v7 = vpop.eup %2685  ;;  %v682_v11 = vmul.f32 %v2684_v6, %v3416_v44  ;;  %v830_v6 = vld [vmem:[#allocation12 + $0x68] sm:$0xff] }
 0x439   : > { %v684_v13 = vmul.f32 %v2686_v7, %v3412_v38 }
 0x43a   : > { %v2688_v8 = vpop.eup %2687  ;;  %v909_v35 = vpop.permute.xlu1 %908 }
 0x43b   : > { %v907_v10 = vpop.permute.xlu0 %906  ;;  %v683_v12 = vmul.f32 %v2688_v8, %v2672_v50  ;;  %v691_v15 = vpack.c.bf16 %v685_v9, %v684_v13  ;;  %v920_v37 = vsel %vm473_vm1, %v909_v35, 0 }
 0x43c   : > { %2535 = vmatprep.subr.msk.bf16.mxu0 %vm473_vm1, %v907_v10  ;;  %v917_v31 = vsel %vm473_vm1, %v907_v10, 0 }
 0x43d   : > { %v690_v14 = vpack.c.bf16 %v683_v12, %v682_v11 }
 0x43e   : > { %v2690_v16 = vpop.eup %2689  ;;  %v905_v38 = vpop.permute.xlu1 %904 }
 0x43f   : > { %2409 = vmatprep.mubr.msk.bf16.mxu1 %vm377_vm0, %v690_v14  ;;  %v2692_v17 = vpop.eup %2691  ;;  %v689_v22 = vmul.f32 %v2690_v16, %v2678_v55  ;;  %v836_v25 = vpop.permute.xlu0 %835  ;;  %v826_v55 = vld [vmem:[#allocation12 + $0x48] sm:$0xff]  ;;  %v832_v14 = vld [vmem:[#allocation12 + $0x78] sm:$0xff] }
 0x440   : > { %2410 = vmatmul.mubr.msk.bf16.vlgmr.msra.gmra.mrb[4].mxu1 %vm377_vm0, %v691_v15  ;;  %v2694_v20 = vpop.eup %2693  ;;  %v686_v26 = vmul.f32 %v2692_v17, %v2676_v53  ;;  %v827_v53 = vld [vmem:[#allocation12 + $0x50] sm:$0xff] }
 0x441   : > { %2422 = vmatpush3.bf16.xpose.msra.mxu1 %v848_v19  ;;  %2425 = vmatprep.mubr.msk.bf16.mxu1 %vm473_vm1, %v834_v18  ;;  %v688_v28 = vmul.f32 %v2694_v20, %v3425_v51  ;;  %v825_v51 = vld [vmem:[#allocation12 + $0x40] sm:$0xff] }
 0x442   : > { %v2696_v21 = vpop.eup %2695  ;;  %2534 = vmatprep.subr.msk.bf16.mxu1 %vm473_vm1, %v840_v60 }
 0x443   : > { %v687_v27 = vmul.f32 %v2696_v21, %v2680_v58  ;;  %v693_v30 = vpack.c.bf16 %v689_v22, %v688_v28  ;;  %v903_v36 = vpop.permute.xlu0 %902 }
 0x445   : > { %v692_v29 = vpack.c.bf16 %v687_v27, %v686_v26 }
 0x447   : > { %2417 = vmatprep.mubr.msk.bf16.mxu0 %vm377_vm0, %v692_v29 }
 0x448   : > { %2418 = vmatmul.mubr.msk.bf16.vlgmr.msra.gmra.mrb[12].mxu0 %vm377_vm0, %v693_v30 }
 0x449   : > { %2424 = vmatpush3.bf16.xpose.msra.mxu1 %v851_v32  ;;  %2430 = vmatpush3.bf16.xpose.msra.mxu0 %v917_v31 }
 0x44a   : > { %2536 = vmatprep.subr.msk.bf16.mxu0 %vm473_vm1, %v909_v35  ;;  %2433 = vmatprep.mubr.msk.bf16.mxu0 %vm473_vm1, %v903_v36 }
 0x450   : > { %2426 = vmatmul.mubr.msk.bf16.vlgmr.msra.gmra.mrb[8].mxu1 %vm473_vm1, %v836_v25 }
 0x451   : > { %2432 = vmatpush3.bf16.xpose.msra.mxu0 %v920_v37 }
 0x458   : > { %2434 = vmatmul.mubr.msk.bf16.vlgmr.msra.gmra.mrb[16].mxu0 %vm473_vm1, %v905_v38 }
 0x513   : > { %v2411_v39 = vpop.f32.mrb[4].mxu1 }
 0x514   : > { %v740_v40 = vpop.f32.mrb[5].mxu1 }
 0x515   : > { %v2412_v41 = vpop.f32.mrb[6].mxu1 }
 0x516   : > { %v817_v42 = vpack.c.bf16 %v2412_v41, %v2411_v39  ;;  %v743_v43 = vpop.f32.mrb[7].mxu1 }
 0x517   : > { %v816_v44 = vpack.c.bf16 %v743_v43, %v740_v40 }
 0x518   : > { %821 = vst.msk [vmem:[#allocation2 + $0x8] sm:$0xff] %vm473_vm1, %v817_v42 }
 0x519   : > { %820 = vst.msk [vmem:[#allocation2] sm:$0xff] %vm473_vm1, %v816_v44 }
 0x51b   : > { %v2419_v45 = vpop.f32.mrb[12].mxu0 }
 0x51c   : > { %v801_v46 = vpop.f32.mrb[13].mxu0 }
 0x51d   : > { %v2420_v47 = vpop.f32.mrb[14].mxu0 }
 0x51e   : > { %v819_v48 = vpack.c.bf16 %v2420_v47, %v2419_v45  ;;  %v804_v49 = vpop.f32.mrb[15].mxu0 }
 0x51f   : > { %v818_v50 = vpack.c.bf16 %v804_v49, %v801_v46 }
 0x520   : > { %823 = vst.msk [vmem:[#allocation2 + $0x18] sm:$0xff] %vm473_vm1, %v819_v48 }
 0x521   : > { %822 = vst.msk [vmem:[#allocation2 + $0x10] sm:$0xff] %vm473_vm1, %v818_v50 }
 0x523   : > { %v2427_v52 = vpop.f32.mrb[8].mxu1 }
 0x524   : > { %v887_v54 = vpop.f32.mrb[9].mxu1  ;;  %v896_v59 = vadd.f32 %v2427_v52, %v827_v53 }
 0x525   : > { %v888_v56 = vadd.f32 %v887_v54, %v825_v51  ;;  %v2428_v57 = vpop.f32.mrb[10].mxu1 }
 0x526   : > { %v890_v58 = vpop.f32.mrb[11].mxu1  ;;  %v899_v1 = vadd.f32 %v2428_v57, %v828_v62  ;;  %v977_v3 = vsel %vm377_vm0, %v896_v59, -inf }
 0x527   : > { %v891_v60 = vadd.f32 %v890_v58, %v826_v55  ;;  %v971_v61 = vsel %vm377_vm0, %v888_v56, -inf }
 0x528   : > { %972 = vmax.xlane.f32.xlu0 %v971_v61  ;;  %v980_v12 = vsel %vm377_vm0, %v899_v1, -inf }
 0x529   : > { %v974_v63 = vsel %vm377_vm0, %v891_v60, -inf }
 0x52a   : > { %975 = vmax.xlane.f32.xlu1 %v974_v63 }
 0x52b   : > { %v2435_v2 = vpop.f32.mrb[16].mxu0 }
 0x52c   : > { %978 = vmax.xlane.f32.xlu0 %v977_v3  ;;  %v956_v5 = vpop.f32.mrb[17].mxu0  ;;  %v965_v10 = vadd.f32 %v2435_v2, %v831_v4 }
 0x52d   : > { %v957_v7 = vadd.f32 %v956_v5, %v829_v0  ;;  %v2436_v8 = vpop.f32.mrb[18].mxu0 }
 0x52e   : > { %v959_v9 = vpop.f32.mrb[19].mxu0  ;;  %v968_v15 = vadd.f32 %v2436_v8, %v832_v14  ;;  %v989_v17 = vsel %vm377_vm0, %v965_v10, -inf }
 0x52f   : > { %v960_v11 = vadd.f32 %v959_v9, %v830_v6  ;;  %v983_v13 = vsel %vm377_vm0, %v957_v7, -inf }
 0x530   : > { %981 = vmax.xlane.f32.xlu0 %v980_v12  ;;  %984 = vmax.xlane.f32.xlu1 %v983_v13  ;;  %v992_v18 = vsel %vm377_vm0, %v968_v15, -inf }
 0x531   : > { %v986_v16 = vsel %vm377_vm0, %v960_v11, -inf }
 0x534   : > { %987 = vmax.xlane.f32.xlu0 %v986_v16  ;;  %990 = vmax.xlane.f32.xlu1 %v989_v17 }
 0x538   : > { %993 = vmax.xlane.f32.xlu0 %v992_v18 }
 0x545   : > { %1063 = vrot.lane.b32.xlu1 %v3370_v24, %s3057_s11 }
 0x549   : > { %1124 = vrot.lane.b32.xlu1 %v3378_v34, %s3057_s11 }
 0x54d   : > { %1126 = vrot.lane.b32.xlu1 %v3376_v33, %s3057_s11 }
 0x54e   : > { %1065 = vrot.lane.b32.xlu0 %v3368_v23, %s3057_s11 }
 0x551   : > { %1225 = vrot.lane.b32.xlu1 %v3368_v23, %s3058_s13 }
 0x552   : > { %1223 = vrot.lane.b32.xlu0 %v3370_v24, %s3058_s13 }
 0x5b5   : > { %v973_v19 = vpop.xlane.xlu0 %972 }
 0x5b6   : > { %v995_v20 = vsub.f32 %v888_v56, %v973_v19 }
 0x5b7   : > { %v976_v21 = vpop.xlane.xlu1 %975 }
 0x5b8   : > { %v1003_v26 = vmul.f32 1.442695, %v995_v20  ;;  %v996_v28 = vsub.f32 %v891_v60, %v976_v21 }
 0x5b9   : > { %v979_v22 = vpop.xlane.xlu0 %978 }
 0x5ba   : > { %v997_v25 = vsub.f32 %v896_v59, %v979_v22  ;;  %v1005_v36 = vmul.f32 1.442695, %v996_v28 }
 0x5bc   : > { %v1007_v27 = vmul.f32 1.442695, %v997_v25 }
 0x5bd   : > { %v985_v29 = vpop.xlane.xlu1 %984  ;;  %v982_v30 = vpop.xlane.xlu0 %981 }
 0x5be   : > { %2697 = vpow2.f32 %v1007_v27  ;;  %v998_v31 = vsub.f32 %v899_v1, %v982_v30  ;;  %v999_v32 = vsub.f32 %v957_v7, %v985_v29 }
 0x5bf   : > { %2699 = vpow2.f32 %v1003_v26 }
 0x5c0   : > { %v1009_v35 = vmul.f32 1.442695, %v998_v31  ;;  %v1011_v40 = vmul.f32 1.442695, %v999_v32 }
 0x5c1   : > { %v991_v37 = vpop.xlane.xlu1 %990  ;;  %v988_v38 = vpop.xlane.xlu0 %987 }
 0x5c2   : > { %v1001_v39 = vsub.f32 %v965_v10, %v991_v37  ;;  %2701 = vpow2.f32 %v1009_v35  ;;  %v1000_v42 = vsub.f32 %v960_v11, %v988_v38 }
 0x5c3   : > { %2703 = vpow2.f32 %v1005_v36 }
 0x5c4   : > { %v1015_v41 = vmul.f32 1.442695, %v1001_v39  ;;  %v1013_v48 = vmul.f32 1.442695, %v1000_v42 }
 0x5c5   : > { %v1064_v43 = vpop.permute.xlu1 %1063  ;;  %v994_v44 = vpop.xlane.xlu0 %993 }
 0x5c6   : > { %2705 = vpow2.f32 %v1015_v41  ;;  %v1002_v45 = vsub.f32 %v968_v15, %v994_v44  ;;  %2437 = vmatprep.subr.bf16.mxu1 %v1064_v43 }
 0x5c7   : > { %2438 = vmatpush3.bf16.msra.mxu1 %v1064_v43  ;;  %2707 = vpow2.f32 %v1011_v40 }
 0x5c8   : > { %v3480_v46 = vpop.eup %2697  ;;  %v1017_v47 = vmul.f32 1.442695, %v1002_v45 }
 0x5c9   : > { %v1125_v49 = vpop.permute.xlu1 %1124  ;;  %v1066_v50 = vpop.permute.xlu0 %1065  ;;  %v1025_v51 = vsel %vm377_vm0, %v3480_v46, 0.0 }
 0x5ca   : > { %v3484_v52 = vpop.eup %2699  ;;  %2709 = vpow2.f32 %v1017_v47  ;;  %2445 = vmatprep.subr.bf16.mxu0 %v1125_v49  ;;  %1026 = vadd.xlane.f32.xlu1 %v1025_v51 }
 0x5cb   : > { %2439 = vmatprep.subr.bf16.mxu1 %v1066_v50  ;;  %2446 = vmatpush3.bf16.msra.mxu0 %v1125_v49  ;;  %2711 = vpow2.f32 %v1013_v48  ;;  %v1019_v56 = vsel %vm377_vm0, %v3484_v52, 0.0 }
 0x5cc   : > { %2440 = vmatpush3.bf16.msra.mxu1 %v1066_v50  ;;  %v2702_v53 = vpop.eup %2701 }
 0x5cd   : > { %v1127_v54 = vpop.permute.xlu1 %1126  ;;  %v1224_v55 = vpop.permute.xlu0 %1223  ;;  %v1028_v57 = vsel %vm377_vm0, %v2702_v53, 0.0 }
 0x5ce   : > { %2447 = vmatprep.subr.bf16.mxu0 %v1127_v54  ;;  %1020 = vadd.xlane.f32.xlu1 %v1019_v56  ;;  %v2704_v58 = vpop.eup %2703  ;;  %v1234_v28 = vsel %vm473_vm1, %v1224_v55, 0 }
 0x5cf   : > { %1029 = vadd.xlane.f32.xlu0 %v1028_v57  ;;  %2537 = vmatprep.subr.msk.bf16.mxu1 %vm473_vm1, %v1224_v55  ;;  %v1022_v62 = vsel %vm377_vm0, %v2704_v58, 0.0 }
 0x5d0   : > { %v3490_v59 = vpop.eup %2705  ;;  %2448 = vmatpush3.bf16.msra.mxu0 %v1127_v54 }
 0x5d1   : > { %v1037_v60 = vsel %vm377_vm0, %v3490_v59, 0.0  ;;  %v2708_v61 = vpop.eup %2707  ;;  %v1226_v4 = vpop.permute.xlu1 %1225 }
 0x5d2   : > { %1038 = vadd.xlane.f32.xlu1 %v1037_v60  ;;  %v1031_v0 = vsel %vm377_vm0, %v2708_v61, 0.0  ;;  %v1237_v41 = vsel %vm473_vm1, %v1226_v4, 0 }
 0x5d3   : > { %1023 = vadd.xlane.f32.xlu0 %v1022_v62 }
 0x5d4   : > { %v2710_v63 = vpop.eup %2709 }
 0x5d5   : > { %v1040_v1 = vsel %vm377_vm0, %v2710_v63, 0.0  ;;  %v2712_v2 = vpop.eup %2711 }
 0x5d6   : > { %1032 = vadd.xlane.f32.xlu1 %v1031_v0  ;;  %v1034_v3 = vsel %vm377_vm0, %v2712_v2, 0.0 }
 0x5d7   : > { %1041 = vadd.xlane.f32.xlu0 %v1040_v1 }
 0x5db   : > { %1035 = vadd.xlane.f32.xlu0 %v1034_v3 }
 0x5e7   : > { %1219 = vrot.lane.b32.xlu1 %v3370_v24, %s3059_s19 }
 0x5eb   : > { %1294 = vrot.lane.b32.xlu1 %v3376_v33, %s3058_s13 }
 0x5ef   : > { %1290 = vrot.lane.b32.xlu1 %v3376_v33, %s3059_s19 }
 0x5f1   : > { %1292 = vrot.lane.b32.xlu0 %v3378_v34, %s3058_s13  ;;  %s3735_s13 = scalar_lea.hbm %s3791_s6, %s2300_s15 }
 0x5f5   : > { %1221 = vrot.lane.b32.xlu0 %v3368_v23, %s3059_s19 }
 0x5f9   : > { %1288 = vrot.lane.b32.xlu0 %v3378_v34, %s3059_s19  ;;  %s2963_s19 = scalar_lea.vmem %s3738_s14, 1024 }
 0x5fa   : > { %p2964_p7 = scmp.ne.s32.totalorder %s3738_s14, %s2963_s19 }
 0x5fc   : > { %p2965_p12 = pnand %p2964_p7, %p3810_p4 }
 0x5fe   : > { %p2966_p13 = pneg %p2965_p12 }
 0x657   : > { %v1027_v5 = vpop.xlane.xlu1 %1026 }
 0x65b   : > { %v1021_v6 = vpop.xlane.xlu1 %1020 }
 0x65c   : > { %v1030_v7 = vpop.xlane.xlu0 %1029 }
 0x65d   : > { %2713 = vrcp.f32 %v1030_v7 }
 0x65e   : > { %2715 = vrcp.f32 %v1021_v6  ;;  %v1214_v6 = vld [vmem:[#allocation12 + $0x98] sm:$0xff] }
 0x65f   : > { %v1039_v8 = vpop.xlane.xlu1 %1038  ;;  %2717 = vrcp.f32 %v1027_v5 }
 0x660   : > { %v1024_v9 = vpop.xlane.xlu0 %1023 }
 0x661   : > { %2719 = vrcp.f32 %v1024_v9 }
 0x663   : > { %v1033_v10 = vpop.xlane.xlu1 %1032 }
 0x664   : > { %v1042_v11 = vpop.xlane.xlu0 %1041 }
 0x665   : > { %2721 = vrcp.f32 %v1042_v11 }
 0x666   : > { %2723 = vrcp.f32 %v1033_v10 }
 0x667   : > { %v2714_v12 = vpop.eup %2713  ;;  %2725 = vrcp.f32 %v1039_v8  ;;  %v1220_v29 = vpop.permute.xlu1 %1219  ;;  %v1215_v8 = vld [vmem:[#allocation12 + $0xa0] sm:$0xff] }
 0x668   : > { %v1036_v13 = vpop.xlane.xlu0 %1035  ;;  %v2716_v14 = vpop.eup %2715  ;;  %v1054_v17 = vmul.f32 %v2714_v12, %v2702_v53  ;;  %v1217_v12 = vld [vmem:[#allocation12 + $0xb0] sm:$0xff] }
 0x669   : > { %2727 = vrcp.f32 %v1036_v13  ;;  %v2718_v15 = vpop.eup %2717  ;;  %v1051_v19 = vmul.f32 %v2716_v14, %v3484_v52  ;;  %v1216_v14 = vld [vmem:[#allocation12 + $0xa8] sm:$0xff] }
 0x66a   : > { %v1053_v21 = vmul.f32 %v2718_v15, %v3480_v46 }
 0x66b   : > { %v2720_v16 = vpop.eup %2719  ;;  %v1295_v43 = vpop.permute.xlu1 %1294 }
 0x66c   : > { %v1293_v18 = vpop.permute.xlu0 %1292  ;;  %v1052_v20 = vmul.f32 %v2720_v16, %v2704_v58  ;;  %v1060_v25 = vpack.c.bf16 %v1054_v17, %v1053_v21  ;;  %v1306_v45 = vsel %vm473_vm1, %v1295_v43, 0 }
 0x66d   : > { %2539 = vmatprep.subr.msk.bf16.mxu0 %vm473_vm1, %v1293_v18  ;;  %v1303_v42 = vsel %vm473_vm1, %v1293_v18, 0 }
 0x66e   : > { %v1059_v22 = vpack.c.bf16 %v1052_v20, %v1051_v19 }
 0x66f   : > { %v2722_v26 = vpop.eup %2721  ;;  %v1291_v46 = vpop.permute.xlu1 %1290 }
 0x670   : > { %2441 = vmatprep.mubr.msk.bf16.mxu1 %vm377_vm0, %v1059_v22  ;;  %v2724_v27 = vpop.eup %2723  ;;  %v1058_v32 = vmul.f32 %v2722_v26, %v2710_v63  ;;  %v1222_v35 = vpop.permute.xlu0 %1221  ;;  %v1212_v63 = vld [vmem:[#allocation12 + $0x88] sm:$0xff]  ;;  %v1218_v22 = vld [vmem:[#allocation12 + $0xb8] sm:$0xff] }
 0x671   : > { %2442 = vmatmul.mubr.msk.bf16.vlgmr.msra.gmra.mrb[12].mxu1 %vm377_vm0, %v1060_v25  ;;  %v2726_v30 = vpop.eup %2725  ;;  %v1055_v36 = vmul.f32 %v2724_v27, %v2708_v61  ;;  %v1213_v61 = vld [vmem:[#allocation12 + $0x90] sm:$0xff] }
 0x672   : > { %2454 = vmatpush3.bf16.xpose.msra.mxu1 %v1234_v28  ;;  %2457 = vmatprep.mubr.msk.bf16.mxu1 %vm473_vm1, %v1220_v29  ;;  %v1057_v38 = vmul.f32 %v2726_v30, %v3490_v59  ;;  %v1211_v59 = vld [vmem:[#allocation12 + $0x80] sm:$0xff] }
 0x673   : > { %v2728_v31 = vpop.eup %2727  ;;  %2538 = vmatprep.subr.msk.bf16.mxu1 %vm473_vm1, %v1226_v4 }
 0x674   : > { %v1056_v37 = vmul.f32 %v2728_v31, %v2712_v2  ;;  %v1062_v40 = vpack.c.bf16 %v1058_v32, %v1057_v38  ;;  %v1289_v44 = vpop.permute.xlu0 %1288 }
 0x676   : > { %v1061_v39 = vpack.c.bf16 %v1056_v37, %v1055_v36 }
 0x678   : > { %2449 = vmatprep.mubr.msk.bf16.mxu0 %vm377_vm0, %v1061_v39 }
 0x679   : > { %2450 = vmatmul.mubr.msk.bf16.vlgmr.msra.gmra.mrb[20].mxu0 %vm377_vm0, %v1062_v40 }
 0x67a   : > { %2456 = vmatpush3.bf16.xpose.msra.mxu1 %v1237_v41  ;;  %2462 = vmatpush3.bf16.xpose.msra.mxu0 %v1303_v42 }
 0x67b   : > { %2540 = vmatprep.subr.msk.bf16.mxu0 %vm473_vm1, %v1295_v43  ;;  %2465 = vmatprep.mubr.msk.bf16.mxu0 %vm473_vm1, %v1289_v44 }
 0x681   : > { %2458 = vmatmul.mubr.msk.bf16.vlgmr.msra.gmra.mrb[16].mxu1 %vm473_vm1, %v1222_v35 }
 0x682   : > { %2464 = vmatpush3.bf16.xpose.msra.mxu0 %v1306_v45 }
 0x689   : > { %2466 = vmatmul.mubr.msk.bf16.vlgmr.msra.gmra.mrb[24].mxu0 %vm473_vm1, %v1291_v46 }
 0x744   : > { %v3524_v47 = vpop.f32.mrb[12].mxu1 }
 0x745   : > { %v3526_v48 = vpop.f32.mrb[13].mxu1 }
 0x746   : > { %v3528_v49 = vpop.f32.mrb[14].mxu1 }
 0x747   : > { %v1186_v50 = vpack.c.bf16 %v3528_v49, %v3524_v47  ;;  %v3532_v51 = vpop.f32.mrb[15].mxu1 }
 0x748   : > { %v1185_v52 = vpack.c.bf16 %v3532_v51, %v3526_v48 }
 0x74c   : > { %v3536_v53 = vpop.f32.mrb[20].mxu0 }
 0x74d   : > { %v3538_v54 = vpop.f32.mrb[21].mxu0 }
 0x74e   : > { %v3540_v55 = vpop.f32.mrb[22].mxu0 }
 0x74f   : > { %v1188_v56 = vpack.c.bf16 %v3540_v55, %v3536_v53  ;;  %v3544_v57 = vpop.f32.mrb[23].mxu0 }
 0x750   : > { %v1187_v58 = vpack.c.bf16 %v3544_v57, %v3538_v54 }
 0x754   : > { %v2459_v60 = vpop.f32.mrb[16].mxu1 }
 0x755   : > { %v1273_v62 = vpop.f32.mrb[17].mxu1  ;;  %v1282_v3 = vadd.f32 %v2459_v60, %v1213_v61 }
 0x756   : > { %v1274_v0 = vadd.f32 %v1273_v62, %v1211_v59  ;;  %v2460_v1 = vpop.f32.mrb[18].mxu1 }
 0x757   : > { %v1276_v2 = vpop.f32.mrb[19].mxu1  ;;  %v1285_v9 = vadd.f32 %v2460_v1, %v1214_v6  ;;  %v1363_v11 = vsel %vm377_vm0, %v1282_v3, -inf }
 0x758   : > { %v1277_v4 = vadd.f32 %v1276_v2, %v1212_v63  ;;  %v1357_v5 = vsel %vm377_vm0, %v1274_v0, -inf }
 0x759   : > { %1358 = vmax.xlane.f32.xlu0 %v1357_v5  ;;  %v1366_v20 = vsel %vm377_vm0, %v1285_v9, -inf }
 0x75a   : > { %v1360_v7 = vsel %vm377_vm0, %v1277_v4, -inf }
 0x75b   : > { %1361 = vmax.xlane.f32.xlu1 %v1360_v7 }
 0x75c   : > { %v2467_v10 = vpop.f32.mrb[24].mxu0 }
 0x75d   : > { %1364 = vmax.xlane.f32.xlu0 %v1363_v11  ;;  %v1342_v13 = vpop.f32.mrb[25].mxu0  ;;  %v1351_v18 = vadd.f32 %v2467_v10, %v1217_v12 }
 0x75e   : > { %v1343_v15 = vadd.f32 %v1342_v13, %v1215_v8  ;;  %v2468_v16 = vpop.f32.mrb[26].mxu0 }
 0x75f   : > { %v1345_v17 = vpop.f32.mrb[27].mxu0  ;;  %v1354_v25 = vadd.f32 %v2468_v16, %v1218_v22  ;;  %v1375_v27 = vsel %vm377_vm0, %v1351_v18, -inf }
 0x760   : > { %v1346_v19 = vadd.f32 %v1345_v17, %v1216_v14  ;;  %v1369_v21 = vsel %vm377_vm0, %v1343_v15, -inf }
 0x761   : > { %1367 = vmax.xlane.f32.xlu0 %v1366_v20  ;;  %1370 = vmax.xlane.f32.xlu1 %v1369_v21  ;;  %v1378_v28 = vsel %vm377_vm0, %v1354_v25, -inf }
 0x762   : > { %v1372_v26 = vsel %vm377_vm0, %v1346_v19, -inf }
 0x765   : > { %1373 = vmax.xlane.f32.xlu0 %v1372_v26  ;;  %1376 = vmax.xlane.f32.xlu1 %v1375_v27 }
 0x769   : > { %1379 = vmax.xlane.f32.xlu0 %v1378_v28 }
 0x776   : > { %1449 = vrot.lane.b32.xlu1 %v3370_v24, %s3060_s16 }
 0x77a   : > { %1510 = vrot.lane.b32.xlu1 %v3378_v34, %s3060_s16 }
 0x77e   : > { %1512 = vrot.lane.b32.xlu1 %v3376_v33, %s3060_s16 }
 0x77f   : > { %1451 = vrot.lane.b32.xlu0 %v3368_v23, %s3060_s16  ;;  %s3067_s16 = smov [#allocation14]  }
 0x782   : > { %1611 = vrot.lane.b32.xlu1 %v3368_v23, %s3061_s25 }
 0x783   : > { %1609 = vrot.lane.b32.xlu0 %v3370_v24, %s3061_s25 }
 0x7e6   : > { %v1359_v29 = vpop.xlane.xlu0 %1358 }
 0x7e7   : > { %v1381_v30 = vsub.f32 %v1274_v0, %v1359_v29 }
 0x7e8   : > { %v1362_v31 = vpop.xlane.xlu1 %1361 }
 0x7e9   : > { %v1389_v36 = vmul.f32 1.442695, %v1381_v30  ;;  %v1382_v38 = vsub.f32 %v1277_v4, %v1362_v31 }
 0x7ea   : > { %v1365_v32 = vpop.xlane.xlu0 %1364 }
 0x7eb   : > { %v1383_v35 = vsub.f32 %v1282_v3, %v1365_v32  ;;  %v1391_v44 = vmul.f32 1.442695, %v1382_v38 }
 0x7ed   : > { %v1393_v37 = vmul.f32 1.442695, %v1383_v35 }
 0x7ee   : > { %v1371_v39 = vpop.xlane.xlu1 %1370  ;;  %v1368_v40 = vpop.xlane.xlu0 %1367 }
 0x7ef   : > { %2729 = vpow2.f32 %v1393_v37  ;;  %v1384_v41 = vsub.f32 %v1285_v9, %v1368_v40  ;;  %v1385_v42 = vsub.f32 %v1343_v15, %v1371_v39 }
 0x7f0   : > { %2731 = vpow2.f32 %v1389_v36 }
 0x7f1   : > { %v1395_v43 = vmul.f32 1.442695, %v1384_v41  ;;  %v1397_v60 = vmul.f32 1.442695, %v1385_v42 }
 0x7f2   : > { %v1377_v45 = vpop.xlane.xlu1 %1376  ;;  %v1374_v46 = vpop.xlane.xlu0 %1373 }
 0x7f3   : > { %v1387_v59 = vsub.f32 %v1351_v18, %v1377_v45  ;;  %2733 = vpow2.f32 %v1395_v43  ;;  %v1386_v62 = vsub.f32 %v1346_v19, %v1374_v46 }
 0x7f4   : > { %2735 = vpow2.f32 %v1391_v44 }
 0x7f5   : > { %v1401_v61 = vmul.f32 1.442695, %v1387_v59  ;;  %v1399_v4 = vmul.f32 1.442695, %v1386_v62 }
 0x7f6   : > { %v1450_v63 = vpop.permute.xlu1 %1449  ;;  %v1380_v0 = vpop.xlane.xlu0 %1379 }
 0x7f7   : > { %2737 = vpow2.f32 %v1401_v61  ;;  %v1388_v1 = vsub.f32 %v1354_v25, %v1380_v0  ;;  %2469 = vmatprep.subr.bf16.mxu1 %v1450_v63 }
 0x7f8   : > { %2470 = vmatpush3.bf16.msra.mxu1 %v1450_v63  ;;  %2739 = vpow2.f32 %v1397_v60 }
 0x7f9   : > { %v3564_v2 = vpop.eup %2729  ;;  %v1403_v3 = vmul.f32 1.442695, %v1388_v1 }
 0x7fa   : > { %v1511_v5 = vpop.permute.xlu1 %1510  ;;  %v1452_v6 = vpop.permute.xlu0 %1451  ;;  %v1411_v7 = vsel %vm377_vm0, %v3564_v2, 0.0 }
 0x7fb   : > { %v3568_v8 = vpop.eup %2731  ;;  %2741 = vpow2.f32 %v1403_v3  ;;  %2477 = vmatprep.subr.bf16.mxu0 %v1511_v5  ;;  %1412 = vadd.xlane.f32.xlu1 %v1411_v7 }
 0x7fc   : > { %2471 = vmatprep.subr.bf16.mxu1 %v1452_v6  ;;  %2478 = vmatpush3.bf16.msra.mxu0 %v1511_v5  ;;  %2743 = vpow2.f32 %v1399_v4  ;;  %v1405_v12 = vsel %vm377_vm0, %v3568_v8, 0.0 }
 0x7fd   : > { %2472 = vmatpush3.bf16.msra.mxu1 %v1452_v6  ;;  %v2734_v9 = vpop.eup %2733 }
 0x7fe   : > { %v1513_v10 = vpop.permute.xlu1 %1512  ;;  %v1610_v11 = vpop.permute.xlu0 %1609  ;;  %v1414_v13 = vsel %vm377_vm0, %v2734_v9, 0.0 }
 0x7ff   : > { %2479 = vmatprep.subr.bf16.mxu0 %v1513_v10  ;;  %1406 = vadd.xlane.f32.xlu1 %v1405_v12  ;;  %v2736_v14 = vpop.eup %2735  ;;  %v1620_v62 = vsel %vm473_vm1, %v1610_v11, 0 }
 0x800   : > { %1415 = vadd.xlane.f32.xlu0 %v1414_v13  ;;  %2541 = vmatprep.subr.msk.bf16.mxu1 %vm473_vm1, %v1610_v11  ;;  %v1408_v18 = vsel %vm377_vm0, %v2736_v14, 0.0 }
 0x801   : > { %v3574_v15 = vpop.eup %2737  ;;  %2480 = vmatpush3.bf16.msra.mxu0 %v1513_v10 }
 0x802   : > { %v1423_v16 = vsel %vm377_vm0, %v3574_v15, 0.0  ;;  %v2740_v17 = vpop.eup %2739  ;;  %v1612_v26 = vpop.permute.xlu1 %1611 }
 0x803   : > { %1424 = vadd.xlane.f32.xlu1 %v1423_v16  ;;  %v1417_v20 = vsel %vm377_vm0, %v2740_v17, 0.0 }
 0x804   : > { %1409 = vadd.xlane.f32.xlu0 %v1408_v18 }
 0x805   : > { %v2742_v19 = vpop.eup %2741 }
 0x806   : > { %v1426_v21 = vsel %vm377_vm0, %v2742_v19, 0.0  ;;  %v2744_v22 = vpop.eup %2743 }
 0x807   : > { %1418 = vadd.xlane.f32.xlu1 %v1417_v20  ;;  %v1420_v25 = vsel %vm377_vm0, %v2744_v22, 0.0 }
 0x808   : > { %1427 = vadd.xlane.f32.xlu0 %v1426_v21 }
 0x80c   : > { %1421 = vadd.xlane.f32.xlu0 %v1420_v25 }
 0x818   : > { %1605 = vrot.lane.b32.xlu1 %v3370_v24, %s3062_s29 }
 0x81c   : > { %1680 = vrot.lane.b32.xlu1 %v3376_v33, %s3061_s25 }
 0x820   : > { %1676 = vrot.lane.b32.xlu1 %v3376_v33, %s3062_s29 }
 0x822   : > { %1678 = vrot.lane.b32.xlu0 %v3378_v34, %s3061_s25  ;;  %s2967_s25 = sshll.u32 %s3067_s16, 4  ;;  %s2968_s25 = int_to_ptr.vmem [resolvable:$false] %s2967_s25 }
 0x823   : > { %p2970_p1 = scmp.lt.s32.totalorder %s3738_s14, %s2968_s25 }
 0x826   : > { %1607 = vrot.lane.b32.xlu0 %v3368_v23, %s3062_s29 }
 0x82a   : > { %1674 = vrot.lane.b32.xlu0 %v3378_v34, %s3062_s29  ;;  %s2969_s29 = scalar_lea.vmem %s2968_s25, 2048 }
 0x82b   : > { %p2971_p3 = scmp.lt.s32.totalorder %s2969_s29, %s2963_s19 }
 0x82d   : > { %p2972_p2 = por %p2971_p3, %p2970_p1 }
 0x82f   : > { %p2973_p8 = pnand %p2972_p2, %p2966_p13 }
 0x888   : > { %v1413_v27 = vpop.xlane.xlu1 %1412 }
 0x88c   : > { %v1407_v28 = vpop.xlane.xlu1 %1406 }
 0x88d   : > { %v1416_v29 = vpop.xlane.xlu0 %1415 }
 0x88e   : > { %2745 = vrcp.f32 %v1416_v29  ;;  %v1597_v29 = vld [vmem:[#allocation12 + $0xc0] sm:$0xff] }
 0x88f   : > { %2747 = vrcp.f32 %v1407_v28 }
 0x890   : > { %v1425_v30 = vpop.xlane.xlu1 %1424  ;;  %2749 = vrcp.f32 %v1413_v27 }
 0x891   : > { %v1410_v31 = vpop.xlane.xlu0 %1409 }
 0x892   : > { %2751 = vrcp.f32 %v1410_v31  ;;  %v1599_v31 = vld [vmem:[#allocation12 + $0xd0] sm:$0xff] }
 0x894   : > { %v1419_v32 = vpop.xlane.xlu1 %1418 }
 0x895   : > { %v1428_v35 = vpop.xlane.xlu0 %1427 }
 0x896   : > { %2753 = vrcp.f32 %v1428_v35  ;;  %v1598_v35 = vld [vmem:[#allocation12 + $0xc8] sm:$0xff] }
 0x897   : > { %2755 = vrcp.f32 %v1419_v32 }
 0x898   : > { %v2746_v36 = vpop.eup %2745  ;;  %2757 = vrcp.f32 %v1425_v30  ;;  %v1606_v63 = vpop.permute.xlu1 %1605 }
 0x899   : > { %v1422_v37 = vpop.xlane.xlu0 %1421  ;;  %v2748_v38 = vpop.eup %2747  ;;  %v1440_v41 = vmul.f32 %v2746_v36, %v2734_v9  ;;  %v1623_v9 = vsel %vm473_vm1, %v1612_v26, 0 }
 0x89a   : > { %2759 = vrcp.f32 %v1422_v37  ;;  %v2750_v39 = vpop.eup %2749  ;;  %v1437_v43 = vmul.f32 %v2748_v38, %v3568_v8 }
 0x89b   : > { %v1439_v45 = vmul.f32 %v2750_v39, %v3564_v2 }
 0x89c   : > { %v2752_v40 = vpop.eup %2751  ;;  %v1681_v11 = vpop.permute.xlu1 %1680 }
 0x89d   : > { %v1679_v42 = vpop.permute.xlu0 %1678  ;;  %v1438_v44 = vmul.f32 %v2752_v40, %v2736_v14  ;;  %v1446_v59 = vpack.c.bf16 %v1440_v41, %v1439_v45  ;;  %v1692_v13 = vsel %vm473_vm1, %v1681_v11, 0 }
 0x89e   : > { %2543 = vmatprep.subr.msk.bf16.mxu0 %vm473_vm1, %v1679_v42  ;;  %v1689_v10 = vsel %vm473_vm1, %v1679_v42, 0  ;;  %v1600_v42 = vld [vmem:[#allocation12 + $0xd8] sm:$0xff] }
 0x89f   : > { %v1445_v46 = vpack.c.bf16 %v1438_v44, %v1437_v43  ;;  %v1601_v44 = vld [vmem:[#allocation12 + $0xe0] sm:$0xff] }
 0x8a0   : > { %v2754_v60 = vpop.eup %2753  ;;  %v1677_v14 = vpop.permute.xlu1 %1676 }
 0x8a1   : > { %2473 = vmatprep.mubr.msk.bf16.mxu1 %vm377_vm0, %v1445_v46  ;;  %v2756_v61 = vpop.eup %2755  ;;  %v1444_v3 = vmul.f32 %v2754_v60, %v2742_v19  ;;  %v1608_v2 = vpop.permute.xlu0 %1607  ;;  %v1603_v60 = vld [vmem:[#allocation12 + $0xf0] sm:$0xff] }
 0x8a2   : > { %2474 = vmatmul.mubr.msk.bf16.vlgmr.msra.gmra.mrb[20].mxu1 %vm377_vm0, %v1446_v59  ;;  %v2758_v0 = vpop.eup %2757  ;;  %v1441_v4 = vmul.f32 %v2756_v61, %v2740_v17 }
 0x8a3   : > { %2486 = vmatpush3.bf16.xpose.msra.mxu1 %v1620_v62  ;;  %2489 = vmatprep.mubr.msk.bf16.mxu1 %vm473_vm1, %v1606_v63  ;;  %v1443_v6 = vmul.f32 %v2758_v0, %v3574_v15  ;;  %v1602_v62 = vld [vmem:[#allocation12 + $0xe8] sm:$0xff] }
 0x8a4   : > { %v2760_v1 = vpop.eup %2759  ;;  %2542 = vmatprep.subr.msk.bf16.mxu1 %vm473_vm1, %v1612_v26 }
 0x8a5   : > { %v1442_v5 = vmul.f32 %v2760_v1, %v2744_v22  ;;  %v1448_v8 = vpack.c.bf16 %v1444_v3, %v1443_v6  ;;  %v1675_v12 = vpop.permute.xlu0 %1674  ;;  %v1604_v6 = vld [vmem:[#allocation12 + $0xf8] sm:$0xff] }
 0x8a7   : > { %v1447_v7 = vpack.c.bf16 %v1442_v5, %v1441_v4 }
 0x8a9   : > { %2481 = vmatprep.mubr.msk.bf16.mxu0 %vm377_vm0, %v1447_v7 }
 0x8aa   : > { %2482 = vmatmul.mubr.msk.bf16.vlgmr.msra.gmra.mrb[28].mxu0 %vm377_vm0, %v1448_v8 }
 0x8ab   : > { %2488 = vmatpush3.bf16.xpose.msra.mxu1 %v1623_v9  ;;  %2494 = vmatpush3.bf16.xpose.msra.mxu0 %v1689_v10 }
 0x8ac   : > { %2544 = vmatprep.subr.msk.bf16.mxu0 %vm473_vm1, %v1681_v11  ;;  %2497 = vmatprep.mubr.msk.bf16.mxu0 %vm473_vm1, %v1675_v12 }
 0x8b2   : > { %2490 = vmatmul.mubr.msk.bf16.vlgmr.msra.gmra.mrb[24].mxu1 %vm473_vm1, %v1608_v2 }
 0x8b3   : > { %2496 = vmatpush3.bf16.xpose.msra.mxu0 %v1692_v13 }
 0x8ba   : > { %2498 = vmatmul.mubr.msk.bf16.vlgmr.msra.gmra.mrb[32].mxu0 %vm473_vm1, %v1677_v14 }
 0x975   : > { %v3608_v15 = vpop.f32.mrb[20].mxu1 }
 0x976   : > { %v3610_v16 = vpop.f32.mrb[21].mxu1 }
 0x977   : > { %v3612_v17 = vpop.f32.mrb[22].mxu1 }
 0x978   : > { %v1572_v18 = vpack.c.bf16 %v3612_v17, %v3608_v15  ;;  %v3616_v19 = vpop.f32.mrb[23].mxu1 }
 0x979   : > { %v1571_v20 = vpack.c.bf16 %v3616_v19, %v3610_v16 }
 0x97d   : > { %v3620_v21 = vpop.f32.mrb[28].mxu0 }
 0x97e   : > { %v3622_v22 = vpop.f32.mrb[29].mxu0 }
 0x97f   : > { %v3624_v25 = vpop.f32.mrb[30].mxu0 }
 0x980   : > { %v1574_v26 = vpack.c.bf16 %v3624_v25, %v3620_v21  ;;  %v3628_v27 = vpop.f32.mrb[31].mxu0 }
 0x981   : > { %v1573_v28 = vpack.c.bf16 %v3628_v27, %v3622_v22 }
 0x985   : > { %v2491_v30 = vpop.f32.mrb[24].mxu1 }
 0x986   : > { %v1659_v32 = vpop.f32.mrb[25].mxu1  ;;  %v1668_v39 = vadd.f32 %v2491_v30, %v1599_v31 }
 0x987   : > { %v1660_v36 = vadd.f32 %v1659_v32, %v1597_v29  ;;  %v2492_v37 = vpop.f32.mrb[26].mxu1 }
 0x988   : > { %v1662_v38 = vpop.f32.mrb[27].mxu1  ;;  %v1671_v45 = vadd.f32 %v2492_v37, %v1600_v42  ;;  %v1749_v59 = vsel %vm377_vm0, %v1668_v39, -inf }
 0x989   : > { %v1663_v40 = vadd.f32 %v1662_v38, %v1598_v35  ;;  %v1743_v41 = vsel %vm377_vm0, %v1660_v36, -inf }
 0x98a   : > { %1744 = vmax.xlane.f32.xlu0 %v1743_v41  ;;  %v1752_v4 = vsel %vm377_vm0, %v1671_v45, -inf }
 0x98b   : > { %v1746_v43 = vsel %vm377_vm0, %v1663_v40, -inf }
 0x98c   : > { %1747 = vmax.xlane.f32.xlu1 %v1746_v43 }
 0x98d   : > { %v2499_v46 = vpop.f32.mrb[32].mxu0 }
 0x98e   : > { %1750 = vmax.xlane.f32.xlu0 %v1749_v59  ;;  %v1728_v61 = vpop.f32.mrb[33].mxu0  ;;  %v1737_v3 = vadd.f32 %v2499_v46, %v1603_v60 }
 0x98f   : > { %v1729_v63 = vadd.f32 %v1728_v61, %v1601_v44  ;;  %v2500_v0 = vpop.f32.mrb[34].mxu0 }
 0x990   : > { %v1731_v1 = vpop.f32.mrb[35].mxu0  ;;  %v1740_v7 = vadd.f32 %v2500_v0, %v1604_v6  ;;  %v1761_v9 = vsel %vm377_vm0, %v1737_v3, -inf }
 0x991   : > { %v1732_v2 = vadd.f32 %v1731_v1, %v1602_v62  ;;  %v1755_v5 = vsel %vm377_vm0, %v1729_v63, -inf }
 0x992   : > { %1753 = vmax.xlane.f32.xlu0 %v1752_v4  ;;  %1756 = vmax.xlane.f32.xlu1 %v1755_v5  ;;  %v1764_v10 = vsel %vm377_vm0, %v1740_v7, -inf }
 0x993   : > { %v1758_v8 = vsel %vm377_vm0, %v1732_v2, -inf }
 0x996   : > { %1759 = vmax.xlane.f32.xlu0 %v1758_v8  ;;  %1762 = vmax.xlane.f32.xlu1 %v1761_v9 }
 0x99a   : > { %1765 = vmax.xlane.f32.xlu0 %v1764_v10 }
 0x9a7   : > { %1835 = vrot.lane.b32.xlu1 %v3370_v24, %s3063_s10 }
 0xa17   : > { %v1745_v11 = vpop.xlane.xlu0 %1744 }
 0xa18   : > { %v1767_v12 = vsub.f32 %v1660_v36, %v1745_v11 }
 0xa19   : > { %v1748_v13 = vpop.xlane.xlu1 %1747 }
 0xa1a   : > { %v1775_v30 = vmul.f32 1.442695, %v1767_v12  ;;  %v1768_v32 = vsub.f32 %v1663_v40, %v1748_v13 }
 0xa1b   : > { %v1751_v14 = vpop.xlane.xlu0 %1750 }
 0xa1c   : > { %v1769_v29 = vsub.f32 %v1668_v39, %v1751_v14  ;;  %v1777_v43 = vmul.f32 1.442695, %v1768_v32 }
 0xa1e   : > { %v1779_v31 = vmul.f32 1.442695, %v1769_v29 }
 0xa1f   : > { %v1757_v35 = vpop.xlane.xlu1 %1756  ;;  %v1754_v37 = vpop.xlane.xlu0 %1753 }
 0xa20   : > { %2761 = vpow2.f32 %v1779_v31  ;;  %v1770_v38 = vsub.f32 %v1671_v45, %v1754_v37  ;;  %v1771_v41 = vsub.f32 %v1729_v63, %v1757_v35 }
 0xa21   : > { %2763 = vpow2.f32 %v1775_v30 }
 0xa22   : > { %v1781_v42 = vmul.f32 1.442695, %v1770_v38  ;;  %v1783_v24 = vmul.f32 1.442695, %v1771_v41 }
 0xa23   : > { %v1763_v44 = vpop.xlane.xlu1 %1762  ;;  %v1760_v46 = vpop.xlane.xlu0 %1759 }
 0xa24   : > { %v1773_v59 = vsub.f32 %v1737_v3, %v1763_v44  ;;  %2765 = vpow2.f32 %v1781_v42  ;;  %v1772_v60 = vsub.f32 %v1732_v2, %v1760_v46 }
 0xa25   : > { %2767 = vpow2.f32 %v1777_v43 }
 0xa26   : > { %v1787_v36 = vmul.f32 1.442695, %v1773_v59  ;;  %v1785_v63 = vmul.f32 1.442695, %v1772_v60 }
 0xa27   : > { %v1836_v39 = vpop.permute.xlu1 %1835  ;;  %v1766_v61 = vpop.xlane.xlu0 %1765 }
 0xa28   : > { %2769 = vpow2.f32 %v1787_v36  ;;  %v1774_v40 = vsub.f32 %v1740_v7, %v1766_v61  ;;  %2501 = vmatprep.subr.bf16.mxu1 %v1836_v39  ;;  %v2664_v61 = vld [vmem:[#allocation9 + $0x8] sm:$0xff]  }
 0xa29   : > { %2502 = vmatpush3.bf16.msra.mxu1 %v1836_v39  ;;  %2771 = vpow2.f32 %v1783_v24  ;;  %v2663_v39 = vld [vmem:[#allocation9] sm:$0xff]  }
 0xa2a   : > { %v3642_v62 = vpop.eup %2761  ;;  %v1789_v45 = vmul.f32 1.442695, %v1774_v40 }
 0xa2b   : > { %v1797_v0 = vsel %vm377_vm0, %v3642_v62, 0.0  ;;  %v2764_v1 = vpop.eup %2763 }
 0xa2c   : > { %2773 = vpow2.f32 %v1789_v45  ;;  %1798 = vadd.xlane.f32.xlu1 %v1797_v0  ;;  %v1791_v2 = vsel %vm377_vm0, %v2764_v1, 0.0 }
 0xa2d   : > { %2775 = vpow2.f32 %v1785_v63 }
 0xa2e   : > { %v2766_v3 = vpop.eup %2765 }
 0xa2f   : > { %v1800_v4 = vsel %vm377_vm0, %v2766_v3, 0.0  ;;  %v2768_v5 = vpop.eup %2767 }
 0xa30   : > { %1792 = vadd.xlane.f32.xlu1 %v1791_v2  ;;  %1801 = vadd.xlane.f32.xlu0 %v1800_v4  ;;  %v1794_v9 = vsel %vm377_vm0, %v2768_v5, 0.0 }
 0xa32   : > { %v3648_v6 = vpop.eup %2769 }
 0xa33   : > { %v1809_v7 = vsel %vm377_vm0, %v3648_v6, 0.0  ;;  %v3652_v8 = vpop.eup %2771 }
 0xa34   : > { %1810 = vadd.xlane.f32.xlu1 %v1809_v7  ;;  %1795 = vadd.xlane.f32.xlu0 %v1794_v9  ;;  %v1803_v11 = vsel %vm377_vm0, %v3652_v8, 0.0 }
 0xa36   : > { %v3655_v10 = vpop.eup %2773 }
 0xa37   : > { %v1812_v12 = vsel %vm377_vm0, %v3655_v10, 0.0  ;;  %v3661_v13 = vpop.eup %2775 }
 0xa38   : > { %1804 = vadd.xlane.f32.xlu1 %v1803_v11  ;;  %1813 = vadd.xlane.f32.xlu0 %v1812_v12  ;;  %v1806_v14 = vsel %vm377_vm0, %v3661_v13, 0.0  ;;  %v2287_v12 = vld [vmem:[#allocation11] ss:$0 sm:$0xff] }
 0xa3c   : > { %1807 = vadd.xlane.f32.xlu0 %v1806_v14 }
 0xa49   : > { %1896 = vrot.lane.b32.xlu1 %v3378_v34, %s3063_s10 }
 0xa4d   : > { %1898 = vrot.lane.b32.xlu1 %v3376_v33, %s3063_s10 }
 0xa51   : > { %1195 = vrot.lane.b32.xlu1 %v1186_v50, %s3064_s12 }
 0xa52   : > { %1837 = vrot.lane.b32.xlu0 %v3368_v23, %s3063_s10 }
 0xa55   : > { %1581 = vrot.lane.b32.xlu1 %v1572_v18, %s3065_s9 }
 0xa56   : > { %1193 = vrot.lane.b32.xlu0 %v1185_v52, %s3064_s12 }
 0xa59   : > { %1199 = vrot.lane.b32.xlu1 %v1188_v56, %s3064_s12 }
 0xa5a   : > { %1579 = vrot.lane.b32.xlu0 %v1571_v20, %s3065_s9 }
 0xa5e   : > { %1197 = vrot.lane.b32.xlu0 %v1187_v58, %s3064_s12 }
 0xab9   : > { %v1799_v23 = vpop.xlane.xlu1 %1798 }
 0xabd   : > { %v1793_v33 = vpop.xlane.xlu1 %1792  ;;  %v1802_v34 = vpop.xlane.xlu0 %1801 }
 0xabe   : > { %2777 = vrcp.f32 %v1802_v34 }
 0xabf   : > { %2779 = vrcp.f32 %v1793_v33 }
 0xac0   : > { %2781 = vrcp.f32 %v1799_v23 }
 0xac1   : > { %v1811_v47 = vpop.xlane.xlu1 %1810  ;;  %v1796_v48 = vpop.xlane.xlu0 %1795 }
 0xac2   : > { %2783 = vrcp.f32 %v1796_v48 }
 0xac5   : > { %v1805_v49 = vpop.xlane.xlu1 %1804  ;;  %v1814_v50 = vpop.xlane.xlu0 %1813 }
 0xac6   : > { %2785 = vrcp.f32 %v1814_v50 }
 0xac7   : > { %2787 = vrcp.f32 %v1805_v49 }
 0xac8   : > { %v2778_v52 = vpop.eup %2777  ;;  %2789 = vrcp.f32 %v1811_v47 }
 0xac9   : > { %v1897_v51 = vpop.permute.xlu1 %1896  ;;  %v1808_v53 = vpop.xlane.xlu0 %1807  ;;  %v1826_v57 = vmul.f32 %v2778_v52, %v2766_v3 }
 0xaca   : > { %2509 = vmatprep.subr.bf16.mxu0 %v1897_v51  ;;  %v2780_v54 = vpop.eup %2779  ;;  %2791 = vrcp.f32 %v1808_v53 }
 0xacb   : > { %2510 = vmatpush3.bf16.msra.mxu0 %v1897_v51  ;;  %v2782_v55 = vpop.eup %2781  ;;  %v1823_v16 = vmul.f32 %v2780_v54, %v2764_v1 }
 0xacc   : > { %v2784_v56 = vpop.eup %2783  ;;  %v1825_v18 = vmul.f32 %v2782_v55, %v3642_v62 }
 0xacd   : > { %v1899_v58 = vpop.permute.xlu1 %1898  ;;  %v1838_v15 = vpop.permute.xlu0 %1837  ;;  %v1824_v17 = vmul.f32 %v2784_v56, %v2768_v5 }
 0xace   : > { %2511 = vmatprep.subr.bf16.mxu0 %v1899_v58  ;;  %2503 = vmatprep.subr.bf16.mxu1 %v1838_v15  ;;  %v1832_v29 = vpack.c.bf16 %v1826_v57, %v1825_v18 }
 0xacf   : > { %2512 = vmatpush3.bf16.msra.mxu0 %v1899_v58  ;;  %2504 = vmatpush3.bf16.msra.mxu1 %v1838_v15  ;;  %v1831_v19 = vpack.c.bf16 %v1824_v17, %v1823_v16 }
 0xad0   : > { %v2786_v30 = vpop.eup %2785  ;;  %2517 = vmatprep.subr.bf16.mxu1 %v2663_v39 }
 0xad1   : > { %v1196_v20 = vpop.permute.xlu1 %1195  ;;  %2505 = vmatprep.mubr.msk.bf16.mxu1 %vm377_vm0, %v1831_v19  ;;  %v1194_v31 = vpop.permute.xlu0 %1193  ;;  %v1830_v38 = vmul.f32 %v2786_v30, %v3655_v10 }
 0xad2   : > { %1207 = vst.msk [vmem:[#allocation2 + $0x8] sm:$0xff] %vm1205_vm2, %v1196_v20  ;;  %v2788_v32 = vpop.eup %2787  ;;  %1206 = vst.msk [vmem:[#allocation2] sm:$0xff] %vm1205_vm2, %v1194_v31  ;;  %2506 = vmatmul.mubr.msk.bf16.vlgmr.msra.gmra.mrb[28].mxu1 %vm377_vm0, %v1832_v29 }
 0xad3   : > { %v2790_v35 = vpop.eup %2789  ;;  %v1827_v43 = vmul.f32 %v2788_v32, %v3652_v8  ;;  %2518 = vmatpush3.bf16.msra.mxu1 %v2663_v39 }
 0xad4   : > { %v2792_v37 = vpop.eup %2791  ;;  %v1829_v46 = vmul.f32 %v2790_v35, %v3648_v6  ;;  %2519 = vmatprep.subr.bf16.mxu1 %v2664_v61 }
 0xad5   : > { %v1582_v41 = vpop.permute.xlu1 %1581  ;;  %v1580_v42 = vpop.permute.xlu0 %1579  ;;  %v1828_v44 = vmul.f32 %v2792_v37, %v3661_v13 }
 0xad6   : > { %1593 = vst.msk [vmem:[#allocation2 + $0x8] sm:$0xff] %vm1591_vm3, %v1582_v41  ;;  %1592 = vst.msk [vmem:[#allocation2] sm:$0xff] %vm1591_vm3, %v1580_v42  ;;  %v1834_v36 = vpack.c.bf16 %v1830_v38, %v1829_v46 }
 0xad7   : > { %v1833_v59 = vpack.c.bf16 %v1828_v44, %v1827_v43  ;;  %2520 = vmatpush3.bf16.msra.mxu1 %v2664_v61 }
 0xad9   : > { %v1200_v24 = vpop.permute.xlu1 %1199  ;;  %2513 = vmatprep.mubr.msk.bf16.mxu0 %vm377_vm0, %v1833_v59  ;;  %v1198_v60 = vpop.permute.xlu0 %1197 }
 0xada   : > { %1209 = vst.msk [vmem:[#allocation2 + $0x18] sm:$0xff] %vm1205_vm2, %v1200_v24  ;;  %1208 = vst.msk [vmem:[#allocation2 + $0x10] sm:$0xff] %vm1205_vm2, %v1198_v60  ;;  %2514 = vmatmul.mubr.msk.bf16.vlgmr.msra.gmra.mrb[36].mxu0 %vm377_vm0, %v1834_v36 }
 0xba5   : > { %v2507_v40 = vpop.f32.mrb[28].mxu1 }
 0xba6   : > { %v1881_v62 = vpop.f32.mrb[29].mxu1 }
 0xba7   : > { %v2508_v45 = vpop.f32.mrb[30].mxu1 }
 0xba8   : > { %v1958_v63 = vpack.c.bf16 %v2508_v45, %v2507_v40  ;;  %v1884_v0 = vpop.f32.mrb[31].mxu1 }
 0xba9   : > { %v1957_v1 = vpack.c.bf16 %v1884_v0, %v1881_v62 }
 0xbaa   : > { %1967 = vrot.lane.b32.xlu1 %v1958_v63, %s3066_s28 }
 0xbab   : > { %1965 = vrot.lane.b32.xlu0 %v1957_v1, %s3066_s28 }
 0xbad   : > { %v2515_v3 = vpop.f32.mrb[36].mxu0 }
 0xbae   : > { %v1942_v2 = vpop.f32.mrb[37].mxu0  ;;  %1585 = vrot.lane.b32.xlu1 %v1574_v26, %s3065_s9 }
 0xbaf   : > { %v2516_v4 = vpop.f32.mrb[38].mxu0  ;;  %1583 = vrot.lane.b32.xlu0 %v1573_v28, %s3065_s9 }
 0xbb0   : > { %v1960_v5 = vpack.c.bf16 %v2516_v4, %v2515_v3  ;;  %v1945_v6 = vpop.f32.mrb[39].mxu0 }
 0xbb1   : > { %v1959_v7 = vpack.c.bf16 %v1945_v6, %v1942_v2 }
 0xbb2   : > { %1971 = vrot.lane.b32.xlu1 %v1960_v5, %s3066_s28 }
 0xbb3   : > { %1969 = vrot.lane.b32.xlu0 %v1959_v7, %s3066_s28 }
 0xc1c   : > { %v1968_v8 = vpop.permute.xlu1 %1967 }
 0xc1d   : > { %1979 = vst.msk [vmem:[#allocation2 + $0x8] sm:$0xff] %vm1977_vm4, %v1968_v8  ;;  %v1966_v9 = vpop.permute.xlu0 %1965 }
 0xc1e   : > { %1978 = vst.msk [vmem:[#allocation2] sm:$0xff] %vm1977_vm4, %v1966_v9 }
 0xc20   : > { %v1586_v10 = vpop.permute.xlu1 %1585 }
 0xc21   : > { %1595 = vst.msk [vmem:[#allocation2 + $0x18] sm:$0xff] %vm1591_vm3, %v1586_v10  ;;  %v1584_v21 = vpop.permute.xlu0 %1583 }
 0xc22   : > { %1594 = vst.msk [vmem:[#allocation2 + $0x10] sm:$0xff] %vm1591_vm3, %v1584_v21 }
 0xc24   : > { %v1972_v25 = vpop.permute.xlu1 %1971  ;;  %v1983_v27 = vld [vmem:[#allocation2 + $0x8] sm:$0xff] }
 0xc25   : > { %1981 = vst.msk [vmem:[#allocation2 + $0x18] sm:$0xff] %vm1977_vm4, %v1972_v25  ;;  %v1970_v22 = vpop.permute.xlu0 %1969  ;;  %v1982_v26 = vld [vmem:[#allocation2] sm:$0xff] }
 0xc26   : > { %1980 = vst.msk [vmem:[#allocation2 + $0x10] sm:$0xff] %vm1977_vm4, %v1970_v22  ;;  %2521 = vmatprep.mubr.msk.bf16.mxu1 %vm377_vm0, %v1982_v26 }
 0xc27   : > { %2522 = vmatmul.mubr.msk.bf16.vlgmr.msra.gmra.mrb[32].mxu1 %vm377_vm0, %v1983_v27 }
 0xc2c   : > { %v1985_v11 = vld [vmem:[#allocation2 + $0x18] sm:$0xff] }
 0xc2d   : > { %v1984_v28 = vld [vmem:[#allocation2 + $0x10] sm:$0xff] }
 0xc2e   : > { %2525 = vmatprep.mubr.msk.bf16.mxu1 %vm377_vm0, %v1984_v28 }
 0xc2f   : > { %2526 = vmatmul.mubr.msk.bf16.gmra.mrb[36].mxu1 %vm377_vm0, %v1985_v11 }
 0xcfa   : > { %v2523_v13 = vpop.f32.mrb[32].mxu1 }
 0xcfb   : > { %v2064_v14 = vadd.f32 %v2523_v13, %v2287_v12  ;;  %v2055_v23 = vpop.f32.mrb[33].mxu1 }
 0xcfc   : > { %v2056_v33 = vadd.f32 %v2287_v12, %v2055_v23  ;;  %v2524_v34 = vpop.f32.mrb[34].mxu1 }
 0xcfd   : > { %2088 = vst.msk [vmem:[%s338_s26 + $0x10] sm:$0xff] %vm377_vm0, %v2064_v14  ;;  %v2067_v47 = vadd.f32 %v2524_v34, %v2287_v12  ;;  %v2058_v48 = vpop.f32.mrb[35].mxu1 }
 0xcfe   : > { %2086 = vst.msk [vmem:[%s338_s26] sm:$0xff] %vm377_vm0, %v2056_v33  ;;  %v2059_v49 = vadd.f32 %v2287_v12, %v2058_v48 }
 0xcff   : > { %2089 = vst.msk [vmem:[%s338_s26 + $0x18] sm:$0xff] %vm377_vm0, %v2067_v47 }
 0xd00   : > { %2087 = vst.msk [vmem:[%s338_s26 + $0x8] sm:$0xff] %vm377_vm0, %v2059_v49 }
 0xd02   : > { %v2527_v50 = vpop.f32.mrb[36].mxu1 }
 0xd03   : > { %v2080_v51 = vadd.f32 %v2527_v50, %v2287_v12  ;;  %v2071_v52 = vpop.f32.mrb[37].mxu1 }
 0xd04   : > { %v2072_v53 = vadd.f32 %v2287_v12, %v2071_v52  ;;  %v2528_v54 = vpop.f32.mrb[38].mxu1 }
 0xd05   : > { %2092 = vst.msk [vmem:[%s338_s26 + $0x30] sm:$0xff] %vm377_vm0, %v2080_v51  ;;  %v2083_v55 = vadd.f32 %v2528_v54, %v2287_v12  ;;  %v2074_v56 = vpop.f32.mrb[39].mxu1 }
 0xd06   : > { %2090 = vst.msk [vmem:[%s338_s26 + $0x20] sm:$0xff] %vm377_vm0, %v2072_v53  ;;  %v2075_v57 = vadd.f32 %v2287_v12, %v2074_v56 }
 0xd07   : > { %2093 = vst.msk [vmem:[%s338_s26 + $0x38] sm:$0xff] %vm377_vm0, %v2083_v55 }
 0xd08   : > { %2091 = vst.msk [vmem:[%s338_s26 + $0x28] sm:$0xff] %vm377_vm0, %v2075_v57 }
 0xd09   : > { %2976 = shalt.err (!%p2973_p8)
}
 0xd0a   : > { %s2977_s10 = scalar_lea.hbm %s3735_s13, 1024  ;;  %s2981_s26 = scalar_lea.hbm %s3791_s6, 2048 }
 0xd0b   : > { %p2978_p6 = scmp.ne.s32.totalorder %s3735_s13, %s2977_s10  ;;  %p2982_p0 = scmp.lt.u32.totalorder %s3735_s13, %s3791_s6 }
 0xd0c   : > { %p2983_p5 = scmp.lt.u32.totalorder %s2981_s26, %s2977_s10  ;;  %p2985_p7 = scmp.lt.u32.totalorder %s2977_s10, %s3735_s13 }
 0xd0d   : > { %p2979_p10 = pnand %p2978_p6, %p3810_p4 }
 0xd0e   : > { %p2984_p9 = por %p2983_p5, %p2982_p0 }
 0xd0f   : > { %p2980_p11 = pneg %p2979_p10 }
 0xd10   : > { %p2986_p12 = por %p2985_p7, %p2984_p9 }
 0xd12   : > { %p2987_p13 = pnand %p2986_p12, %p2980_p11 }
 0xd14   : > { %2990 = shalt.err (!%p2987_p13)
}
 0xd15   : > { %s3068_s11 = smov 128  }
 0xd16   : > { %2567 = dma.vmem_to_hbm [thread:$0]  (%p3810_p4), %s3738_s14, 1024, %s3735_s13, %s2095_s27, %s3068_s11, %s3068_s11, %s3064_s12  }
 0xd17 PF: > { %s2123_s19 = sand.u32 1, %s3029_s21   ;;  %p3811_p1 = scmp.ne.s32.totalorder %s3801_s17, 0 }
 0xd18   : > { %p3812_p3 = scmp.ge.s32.totalorder %s3041_s24, 2  ;;  %s2124_s16 = scalar_lea.sflag [#allocation5], %s2123_s19 }
 0xd1a   : > { %p2590_p2 = pnand %p3812_p3, %p3811_p1 }
 0xd1c   : > { %3024 = dma.done.wait (!%p2590_p2), %s2124_s16, 1024  }
 0xd1d   : > { %3026 = vsyncadd (!%p2590_p2), %s2124_s16, 4294966272  ;;  %p22_p8 = scmp.ge.s32.totalorder %s3266_s30, 4   ;;  %s3813_s21 = smov %s3033_s22 }
 0xd1e   : > { %s3814_s22 = smov %s3037_s23  ;;  %s3815_s23 = smov %s3278_s7 }
 0xd1f   : > { %s3816_s24 = smov %s3266_s30  ;;  %24 = sbr.rel (!%p22_p8) target bundleno = 8 (0x8), region = 112 }
 0xd26   :  { %2129 = vsyncpa [#allocation4], 1 }
 0xd27   :  { %2131 = vsyncpa [#allocation4 + $0x1], 1 }
 0xd28   :  { %2132 = vsyncpa [#allocation7], 1 }
 0xd29   :  { %2133 = vsyncpa [#allocation10], 1 }
 0xd2a   :  { %2134 = vsyncpa [#allocation13], 1 }
 0xd2b   :  { %2135 = vsyncpa [#allocation5], 1 }
 0xd2c   :  { %2137 = vsyncpa [#allocation5 + $0x1], 1 }

</bundles_post_ra>
